<compile_context>
chip_gen: v6e
topology: v6e:2x2x1
jax: 0.10.0
libtpu: 0.0.40
codegen_flags: <defaults>
</compile_context>

<pallas_src>
import jax
import jax.numpy as jnp
import numpy as np
from jax import lax
from jax.experimental import pallas as pl
from jax.experimental.pallas import tpu as pltpu


_LAYERS = (
    dict(K=5, p=1, cin=16, cout=32),   # conv_transpose
    dict(K=3, p=1, cin=32, cout=16),   # conv_transpose2 (in-channels repaired)
    dict(K=3, p=1, cin=16, cout=8),    # conv_transpose3 (in-channels repaired)
)


def _geometry(H, W):
    g = dict(C0=_LAYERS[0]["cin"])
    h, w = H, W
    for i, c in enumerate(_LAYERS, start=1):
        K, p = c["K"], c["p"]
        h, w = h + K - 1 - 2 * p, w + K - 1 - 2 * p
        g[f"H{i}"], g[f"W{i}"] = h, w
        g[f"C{i}"] = c["cout"]
        g[f"q{i}"] = K - 1 - p
        g[f"K{i}"] = K
    return g


def _make_fused_kernel(H, W):
    """Build the fused 3-layer kernel body plus static geometry."""
    g = _geometry(H, W)
    C0 = g["C0"]
    H1, W1, C1 = g["H1"], g["W1"], g["C1"]
    H2, W2, C2 = g["H2"], g["W2"], g["C2"]
    H3, W3, C3 = g["H3"], g["W3"], g["C3"]
    q1, q2, q3 = g["q1"], g["q2"], g["q3"]
    K1, K2, K3 = g["K1"], g["K2"], g["K3"]

    def conv_rows(pad_ref, wb_ref, brow_ref, K, Ho):
        # out(Ho, Wo*Cout) = sum_kh pad[kh:kh+Ho, :] @ Wband[kh]  + bias_row
        acc = None
        for kh in range(K):
            lhs = pad_ref[kh:kh + Ho, :].astype(jnp.bfloat16)
            term = jnp.dot(lhs, wb_ref[kh], preferred_element_type=jnp.float32)
            acc = term if acc is None else acc + term
        return acc + brow_ref[...]

    def fill_rows(pad_ref, q, Hin, interior_f32):
        # Only the height is zero-padded (width padding is folded into the
        # banded weights).  Halo rows are re-zeroed every step (cheap, and
        # megacore-safe); the interior is fully rewritten every step.
        ncols = interior_f32.shape[1]
        zrow = jnp.zeros((q, ncols), jnp.float32)
        pad_ref[0:q, :] = zrow
        pad_ref[q + Hin:q + Hin + q, :] = zrow
        pad_ref[q:q + Hin, :] = interior_f32

    def kernel(x_ref,
               wb1_ref, br1_ref, wb2_ref, br2_ref, wb3_ref, br3_ref,
               v1_ref, v2_ref, v3_ref, v7_ref,
               pad1, pad2, pad3):
        # ---- layer 1 : 16 -> 32, K=5, p=1 (q=3) ----
        fill_rows(pad1, q1, H, x_ref[...])
        v1 = conv_rows(pad1, wb1_ref, br1_ref, K1, H1)        # (H1, W1*C1) f32
        v1_ref[...] = v1

        # ---- layer 2 : 32 -> 16, K=3, p=1 (q=1) ----
        fill_rows(pad2, q2, H1, v1)
        v2 = conv_rows(pad2, wb2_ref, br2_ref, K2, H2)        # (H2, W2*C2) f32
        v2_ref[...] = v2

        # ---- layer 3 : 16 -> 8, K=3, p=1 (q=1), + fused activation ----
        fill_rows(pad3, q3, H2, v2)
        v3 = conv_rows(pad3, wb3_ref, br3_ref, K3, H3)        # (H3, W3*C3) f32
        v3_ref[...] = v3
        # v4 = v3 + 4 ; v5 = clamp_min(v4, 0) ; v6 = clamp_max(v5, 8) ; v7 = v6 / 8
        v7_ref[...] = jnp.clip(v3 + 4.0, 0.0, 8.0) * 0.125

    g.update(H0=H, W0=W,
             P1=(H + 2 * q1, W * C0),
             P2=(H1 + 2 * q2, W1 * C1),
             P3=(H2 + 2 * q3, W2 * C2))
    return kernel, g


def prepare_params(params, spatial_hw):
    """One-time (outside jit) repack of the ConvTranspose2d params into banded
    matmul operands.

    ConvTranspose2d(stride=1, padding=p) == cross-correlation of the input
    zero-padded by q=K-1-p with the spatially flipped, (Cin,Cout)-swapped
    weight.  For each kh we build Wband[kh] of shape (Win*Cin, Wo*Cout) with
        Wband[kh][iw*Cin:(iw+1)*Cin, ow*Cout:(ow+1)*Cout] = Wflip[kh, iw-ow+q]
    whenever 0 <= iw-ow+q < K, which folds both the kw taps and the width
    zero-padding into a single dense matmul per kh.
    """
    H, W = spatial_hw
    del H
    packed = []
    win = W
    for (w_pt, b), cfg in zip(params, _LAYERS):
        K, p, cin, cout = cfg["K"], cfg["p"], cfg["cin"], cfg["cout"]
        q = K - 1 - p
        wo = win + K - 1 - 2 * p
        w_np = np.asarray(w_pt, np.float32)
        assert w_np.shape == (cin, cout, K, K), (w_np.shape, cfg)
        wf = w_np[:, :, ::-1, ::-1].transpose(2, 3, 0, 1)      # (K, K, Cin, Cout)
        wb = np.zeros((K, win * cin, wo * cout), np.float32)
        for kh in range(K):
            for ow in range(wo):
                for kw in range(K):
                    iw = ow + kw - q
                    if 0 <= iw < win:
                        wb[kh,
                           iw * cin:(iw + 1) * cin,
                           ow * cout:(ow + 1) * cout] = wf[kh, kw]
        b_row = np.tile(np.asarray(b, np.float32), wo).reshape(1, wo * cout)
        packed.append((jnp.asarray(wb, jnp.bfloat16),
                       jnp.asarray(b_row, jnp.float32)))
        win = wo
    return tuple(packed)


def _const_spec(a):
    nd = a.ndim
    return pl.BlockSpec(a.shape, lambda n, _nd=nd: (0,) * _nd)


def model_forward(x1_nchw, packed):
    """Reproduces Model.forward: returns (v7, v3, v2, v1) in NCHW."""
    (wb1, br1), (wb2, br2), (wb3, br3) = packed
    N, C0, H, W = x1_nchw.shape
    kernel, g = _make_fused_kernel(H, W)
    assert C0 == g["C0"], (C0, g["C0"])

    # Flattened NHWC rows: (N, H, W*C0).  Cheap, tiny XLA transpose/reshape.
    x_rows = jnp.transpose(x1_nchw, (0, 2, 3, 1)).reshape(N, H, W * C0)
    x_rows = x_rows.astype(jnp.float32)

    v1f, v2f, v3f, v7f = pl.pallas_call(
        kernel,
        out_shape=(
            jax.ShapeDtypeStruct((N, g["H1"], g["W1"] * g["C1"]), jnp.float32),
            jax.ShapeDtypeStruct((N, g["H2"], g["W2"] * g["C2"]), jnp.float32),
            jax.ShapeDtypeStruct((N, g["H3"], g["W3"] * g["C3"]), jnp.float32),
            jax.ShapeDtypeStruct((N, g["H3"], g["W3"] * g["C3"]), jnp.float32),
        ),
        grid=(N,),
        in_specs=[
            pl.BlockSpec((None, H, W * C0), lambda n: (n, 0, 0)),
            _const_spec(wb1), _const_spec(br1),
            _const_spec(wb2), _const_spec(br2),
            _const_spec(wb3), _const_spec(br3),
        ],
        out_specs=(
            pl.BlockSpec((None, g["H1"], g["W1"] * g["C1"]), lambda n: (n, 0, 0)),
            pl.BlockSpec((None, g["H2"], g["W2"] * g["C2"]), lambda n: (n, 0, 0)),
            pl.BlockSpec((None, g["H3"], g["W3"] * g["C3"]), lambda n: (n, 0, 0)),
            pl.BlockSpec((None, g["H3"], g["W3"] * g["C3"]), lambda n: (n, 0, 0)),
        ),
        scratch_shapes=[
            pltpu.VMEM(g["P1"], jnp.float32),   # row-padded x     (H+2q1, W*C0)
            pltpu.VMEM(g["P2"], jnp.float32),   # row-padded v1    (H1+2q2, W1*C1)
            pltpu.VMEM(g["P3"], jnp.float32),   # row-padded v2    (H2+2q3, W2*C2)
        ],
        compiler_params=pltpu.CompilerParams(
            dimension_semantics=("parallel",)),
    )(x_rows, wb1, br1, wb2, br2, wb3, br3)

    def to_nchw(a, Ho, Wo, Co):
        return jnp.transpose(a.reshape(N, Ho, Wo, Co), (0, 3, 1, 2))

    v1 = to_nchw(v1f, g["H1"], g["W1"], g["C1"])
    v2 = to_nchw(v2f, g["H2"], g["W2"], g["C2"])
    v3 = to_nchw(v3f, g["H3"], g["W3"], g["C3"])
    v7 = to_nchw(v7f, g["H3"], g["W3"], g["C3"])
    return v7, v3, v2, v1


def reference_forward(x1_nchw, params):
    """Pure-XLA reference (lax.conv_general_dilated) for the same repaired chain."""
    def convt(x, w_pt, b, p):
        Cin, Cout, K, _ = w_pt.shape
        q = K - 1 - p
        w_oihw = jnp.transpose(w_pt[:, :, ::-1, ::-1], (1, 0, 2, 3))
        y = lax.conv_general_dilated(
            x.astype(jnp.float32), w_oihw.astype(jnp.float32),
            window_strides=(1, 1), padding=[(q, q), (q, q)],
            dimension_numbers=("NCHW", "OIHW", "NCHW"),
            precision=lax.Precision.HIGHEST)
        return y + b.reshape(1, Cout, 1, 1)

    (w1, b1), (w2, b2), (w3, b3) = params
    v1 = convt(x1_nchw, w1, b1, 1)
    v2 = convt(v1, w2, b2, 1)
    v3 = convt(v2, w3, b3, 1)
    v7 = jnp.clip(v3 + 4.0, 0.0, 8.0) / 8.0
    return v7, v3, v2, v1


if __name__ == "__main__":
    key = jax.random.PRNGKey(0)
    k1, k2, k3, k4, k5, k6, kx = jax.random.split(key, 7)

    # Deterministic synthetic parameters, PyTorch ConvTranspose2d layout (Cin, Cout, K, K).
    w1 = 0.05 * jax.random.normal(k1, (16, 32, 5, 5), jnp.float32)
    b1 = 0.05 * jax.random.normal(k2, (32,), jnp.float32)
    w2 = 0.05 * jax.random.normal(k3, (32, 16, 3, 3), jnp.float32)
    b2 = 0.05 * jax.random.normal(k4, (16,), jnp.float32)
    w3 = 0.05 * jax.random.normal(k5, (16, 8, 3, 3), jnp.float32)
    b3 = 0.05 * jax.random.normal(k6, (8,), jnp.float32)
    params = ((w1, b1), (w2, b2), (w3, b3))

    # Small input consistent with the module (NCHW, 16 input channels).
    x1 = jax.random.normal(kx, (2, 16, 16, 16), jnp.float32)

    packed = prepare_params(params, (16, 16))   # one-time banded-weight repack
    fwd = jax.jit(model_forward)
    v7, v3, v2, v1 = jax.block_until_ready(fwd(x1, packed))

    assert v1.shape == (2, 32, 18, 18), v1.shape
    assert v2.shape == (2, 16, 18, 18), v2.shape
    assert v3.shape == (2, 8, 18, 18), v3.shape
    assert v7.shape == (2, 8, 18, 18), v7.shape

    # Numerical check against a plain-XLA f32 reference (tolerance sized for the
    # bf16 matmul operands chained through three layers).
    r7, r3, r2, r1 = reference_forward(x1, params)
    np.testing.assert_allclose(np.asarray(v1), np.asarray(r1), rtol=5e-2, atol=5e-2)
    np.testing.assert_allclose(np.asarray(v2), np.asarray(r2), rtol=5e-2, atol=5e-2)
    np.testing.assert_allclose(np.asarray(v3), np.asarray(r3), rtol=5e-2, atol=5e-2)
    np.testing.assert_allclose(np.asarray(v7), np.asarray(r7), rtol=5e-2, atol=5e-2)
    assert bool(jnp.all(jnp.isfinite(v7)))
    assert bool(jnp.all((v7 >= 0.0) & (v7 <= 1.0)))

    print("KERNEL_OK")
</pallas_src>

<mosaic_0001>
module attributes {stable_mosaic.version = 11 : i64} {
  func.func @kernel(%arg0: i32, %arg1: memref<1x16x256xf32, #tpu.memory_space<vmem>>, %arg2: memref<5x256x576xbf16, #tpu.memory_space<vmem>>, %arg3: memref<1x576xf32, #tpu.memory_space<vmem>>, %arg4: memref<3x576x288xbf16, #tpu.memory_space<vmem>>, %arg5: memref<1x288xf32, #tpu.memory_space<vmem>>, %arg6: memref<3x288x144xbf16, #tpu.memory_space<vmem>>, %arg7: memref<1x144xf32, #tpu.memory_space<vmem>>, %arg8: memref<1x18x576xf32, #tpu.memory_space<vmem>>, %arg9: memref<1x18x288xf32, #tpu.memory_space<vmem>>, %arg10: memref<1x18x144xf32, #tpu.memory_space<vmem>>, %arg11: memref<1x18x144xf32, #tpu.memory_space<vmem>>, %arg12: memref<22x256xf32, #tpu.memory_space<vmem>>, %arg13: memref<20x576xf32, #tpu.memory_space<vmem>>, %arg14: memref<20x288xf32, #tpu.memory_space<vmem>>) attributes {dimension_semantics = [#tpu.dimension_semantics<parallel>], iteration_bounds = array<i64: 2>, scalar_prefetch = 0 : i64, scratch_operands = 3 : i64, tpu.core_type = #tpu.core_type<tc>, window_params = [{transform_indices = @transform_0, window_bounds = array<i64: 1, 16, 256>}, {pipeline_mode = #tpu.pipeline_mode<synchronous>, transform_indices = @transform_1, window_bounds = array<i64: 5, 256, 576>}, {pipeline_mode = #tpu.pipeline_mode<synchronous>, transform_indices = @transform_2, window_bounds = array<i64: 1, 576>}, {pipeline_mode = #tpu.pipeline_mode<synchronous>, transform_indices = @transform_3, window_bounds = array<i64: 3, 576, 288>}, {pipeline_mode = #tpu.pipeline_mode<synchronous>, transform_indices = @transform_4, window_bounds = array<i64: 1, 288>}, {pipeline_mode = #tpu.pipeline_mode<synchronous>, transform_indices = @transform_5, window_bounds = array<i64: 3, 288, 144>}, {pipeline_mode = #tpu.pipeline_mode<synchronous>, transform_indices = @transform_6, window_bounds = array<i64: 1, 144>}, {transform_indices = @transform_7, window_bounds = array<i64: 1, 18, 576>}, {transform_indices = @transform_8, window_bounds = array<i64: 1, 18, 288>}, {transform_indices = @transform_9, window_bounds = array<i64: 1, 18, 144>}, {transform_indices = @transform_10, window_bounds = array<i64: 1, 18, 144>}]} {
    %c0 = arith.constant 0 : index
    %c0_0 = arith.constant 0 : index
    %c0_1 = arith.constant 0 : index
    %0 = vector.load %arg1[%c0, %c0_0, %c0_1] : memref<1x16x256xf32, #tpu.memory_space<vmem>>, vector<1x16x256xf32>
    %1 = vector.shape_cast %0 : vector<1x16x256xf32> to vector<16x256xf32>
    %cst = arith.constant 0.000000e+00 : f32
    %2 = vector.broadcast %cst : f32 to vector<3x256xf32>
    %c0_2 = arith.constant 0 : index
    %c0_3 = arith.constant 0 : index
    %3 = vector.load %arg12[%c0_2, %c0_3] : memref<22x256xf32, #tpu.memory_space<vmem>>, vector<3x256xf32>
    tpu.vector_store %arg12[%c0_2, %c0_3], %2 {strides = array<i32>} : memref<22x256xf32, #tpu.memory_space<vmem>>, vector<3x256xf32>,
    %c19 = arith.constant 19 : index
    %c0_4 = arith.constant 0 : index
    %4 = vector.load %arg12[%c19, %c0_4] : memref<22x256xf32, #tpu.memory_space<vmem>>, vector<3x256xf32>
    tpu.vector_store %arg12[%c19, %c0_4], %2 {strides = array<i32>} : memref<22x256xf32, #tpu.memory_space<vmem>>, vector<3x256xf32>,
    %c3 = arith.constant 3 : index
    %c0_5 = arith.constant 0 : index
    %5 = vector.load %arg12[%c3, %c0_5] : memref<22x256xf32, #tpu.memory_space<vmem>>, vector<16x256xf32>
    tpu.vector_store %arg12[%c3, %c0_5], %1 {strides = array<i32>} : memref<22x256xf32, #tpu.memory_space<vmem>>, vector<16x256xf32>,
    %c0_6 = arith.constant 0 : index
    %c0_7 = arith.constant 0 : index
    %6 = vector.load %arg12[%c0_6, %c0_7] : memref<22x256xf32, #tpu.memory_space<vmem>>, vector<18x256xf32>
    %7 = arith.truncf %6 : vector<18x256xf32> to vector<18x256xbf16>
    %c0_8 = arith.constant 0 : index
    %c0_9 = arith.constant 0 : index
    %c0_10 = arith.constant 0 : index
    %8 = vector.load %arg2[%c0_8, %c0_9, %c0_10] : memref<5x256x576xbf16, #tpu.memory_space<vmem>>, vector<1x256x576xbf16>
    %9 = vector.shape_cast %8 : vector<1x256x576xbf16> to vector<256x576xbf16>
    %cst_11 = arith.constant dense<0.000000e+00> : vector<18x576xf32>
    %10 = tpu.matmul %7, %9, %cst_11 {dimension_numbers = #tpu.dot_dimension_numbers<[1], [0], [0], [1], [0, 0, 1, 1], [], []>} : vector<18x256xbf16>, vector<256x576xbf16>, vector<18x576xf32> -> vector<18x576xf32>
    %c1 = arith.constant 1 : index
    %c0_12 = arith.constant 0 : index
    %11 = vector.load %arg12[%c1, %c0_12] : memref<22x256xf32, #tpu.memory_space<vmem>>, vector<18x256xf32>
    %12 = arith.truncf %11 : vector<18x256xf32> to vector<18x256xbf16>
    %c1_13 = arith.constant 1 : index
    %c0_14 = arith.constant 0 : index
    %c0_15 = arith.constant 0 : index
    %13 = vector.load %arg2[%c1_13, %c0_14, %c0_15] : memref<5x256x576xbf16, #tpu.memory_space<vmem>>, vector<1x256x576xbf16>
    %14 = vector.shape_cast %13 : vector<1x256x576xbf16> to vector<256x576xbf16>
    %cst_16 = arith.constant dense<0.000000e+00> : vector<18x576xf32>
    %15 = tpu.matmul %12, %14, %cst_16 {dimension_numbers = #tpu.dot_dimension_numbers<[1], [0], [0], [1], [0, 0, 1, 1], [], []>} : vector<18x256xbf16>, vector<256x576xbf16>, vector<18x576xf32> -> vector<18x576xf32>
    %16 = arith.addf %10, %15 : vector<18x576xf32>
    %c2 = arith.constant 2 : index
    %c0_17 = arith.constant 0 : index
    %17 = vector.load %arg12[%c2, %c0_17] : memref<22x256xf32, #tpu.memory_space<vmem>>, vector<18x256xf32>
    %18 = arith.truncf %17 : vector<18x256xf32> to vector<18x256xbf16>
    %c2_18 = arith.constant 2 : index
    %c0_19 = arith.constant 0 : index
    %c0_20 = arith.constant 0 : index
    %19 = vector.load %arg2[%c2_18, %c0_19, %c0_20] : memref<5x256x576xbf16, #tpu.memory_space<vmem>>, vector<1x256x576xbf16>
    %20 = vector.shape_cast %19 : vector<1x256x576xbf16> to vector<256x576xbf16>
    %cst_21 = arith.constant dense<0.000000e+00> : vector<18x576xf32>
    %21 = tpu.matmul %18, %20, %cst_21 {dimension_numbers = #tpu.dot_dimension_numbers<[1], [0], [0], [1], [0, 0, 1, 1], [], []>} : vector<18x256xbf16>, vector<256x576xbf16>, vector<18x576xf32> -> vector<18x576xf32>
    %22 = arith.addf %16, %21 : vector<18x576xf32>
    %c3_22 = arith.constant 3 : index
    %c0_23 = arith.constant 0 : index
    %23 = vector.load %arg12[%c3_22, %c0_23] : memref<22x256xf32, #tpu.memory_space<vmem>>, vector<18x256xf32>
    %24 = arith.truncf %23 : vector<18x256xf32> to vector<18x256xbf16>
    %c3_24 = arith.constant 3 : index
    %c0_25 = arith.constant 0 : index
    %c0_26 = arith.constant 0 : index
    %25 = vector.load %arg2[%c3_24, %c0_25, %c0_26] : memref<5x256x576xbf16, #tpu.memory_space<vmem>>, vector<1x256x576xbf16>
    %26 = vector.shape_cast %25 : vector<1x256x576xbf16> to vector<256x576xbf16>
    %cst_27 = arith.constant dense<0.000000e+00> : vector<18x576xf32>
    %27 = tpu.matmul %24, %26, %cst_27 {dimension_numbers = #tpu.dot_dimension_numbers<[1], [0], [0], [1], [0, 0, 1, 1], [], []>} : vector<18x256xbf16>, vector<256x576xbf16>, vector<18x576xf32> -> vector<18x576xf32>
    %28 = arith.addf %22, %27 : vector<18x576xf32>
    %c4 = arith.constant 4 : index
    %c0_28 = arith.constant 0 : index
    %29 = vector.load %arg12[%c4, %c0_28] : memref<22x256xf32, #tpu.memory_space<vmem>>, vector<18x256xf32>
    %30 = arith.truncf %29 : vector<18x256xf32> to vector<18x256xbf16>
    %c4_29 = arith.constant 4 : index
    %c0_30 = arith.constant 0 : index
    %c0_31 = arith.constant 0 : index
    %31 = vector.load %arg2[%c4_29, %c0_30, %c0_31] : memref<5x256x576xbf16, #tpu.memory_space<vmem>>, vector<1x256x576xbf16>
    %32 = vector.shape_cast %31 : vector<1x256x576xbf16> to vector<256x576xbf16>
    %cst_32 = arith.constant dense<0.000000e+00> : vector<18x576xf32>
    %33 = tpu.matmul %30, %32, %cst_32 {dimension_numbers = #tpu.dot_dimension_numbers<[1], [0], [0], [1], [0, 0, 1, 1], [], []>} : vector<18x256xbf16>, vector<256x576xbf16>, vector<18x576xf32> -> vector<18x576xf32>
    %34 = arith.addf %28, %33 : vector<18x576xf32>
    %c0_33 = arith.constant 0 : index
    %c0_34 = arith.constant 0 : index
    %35 = vector.load %arg3[%c0_33, %c0_34] : memref<1x576xf32, #tpu.memory_space<vmem>>, vector<1x576xf32>
    %36 = vector.broadcast %35 : vector<1x576xf32> to vector<18x576xf32>
    %37 = arith.addf %34, %36 : vector<18x576xf32>
    %c0_35 = arith.constant 0 : index
    %c0_36 = arith.constant 0 : index
    %c0_37 = arith.constant 0 : index
    %38 = vector.load %arg8[%c0_35, %c0_36, %c0_37] : memref<1x18x576xf32, #tpu.memory_space<vmem>>, vector<1x18x576xf32>
    %39 = vector.shape_cast %38 : vector<1x18x576xf32> to vector<18x576xf32>
    %40 = vector.shape_cast %37 : vector<18x576xf32> to vector<1x18x576xf32>
    tpu.vector_store %arg8[%c0_35, %c0_36, %c0_37], %40 {strides = array<i32>} : memref<1x18x576xf32, #tpu.memory_space<vmem>>, vector<1x18x576xf32>,
    %cst_38 = arith.constant 0.000000e+00 : f32
    %41 = vector.broadcast %cst_38 : f32 to vector<1x576xf32>
    %c0_39 = arith.constant 0 : index
    %c0_40 = arith.constant 0 : index
    %42 = vector.load %arg13[%c0_39, %c0_40] : memref<20x576xf32, #tpu.memory_space<vmem>>, vector<1x576xf32>
    tpu.vector_store %arg13[%c0_39, %c0_40], %41 {strides = array<i32>} : memref<20x576xf32, #tpu.memory_space<vmem>>, vector<1x576xf32>,
    %c19_41 = arith.constant 19 : index
    %c0_42 = arith.constant 0 : index
    %43 = vector.load %arg13[%c19_41, %c0_42] : memref<20x576xf32, #tpu.memory_space<vmem>>, vector<1x576xf32>
    tpu.vector_store %arg13[%c19_41, %c0_42], %41 {strides = array<i32>} : memref<20x576xf32, #tpu.memory_space<vmem>>, vector<1x576xf32>,
    %c1_43 = arith.constant 1 : index
    %c0_44 = arith.constant 0 : index
    %44 = vector.load %arg13[%c1_43, %c0_44] : memref<20x576xf32, #tpu.memory_space<vmem>>, vector<18x576xf32>
    tpu.vector_store %arg13[%c1_43, %c0_44], %37 {strides = array<i32>} : memref<20x576xf32, #tpu.memory_space<vmem>>, vector<18x576xf32>,
    %c0_45 = arith.constant 0 : index
    %c0_46 = arith.constant 0 : index
    %45 = vector.load %arg13[%c0_45, %c0_46] : memref<20x576xf32, #tpu.memory_space<vmem>>, vector<18x576xf32>
    %46 = arith.truncf %45 : vector<18x576xf32> to vector<18x576xbf16>
    %c0_47 = arith.constant 0 : index
    %c0_48 = arith.constant 0 : index
    %c0_49 = arith.constant 0 : index
    %47 = vector.load %arg4[%c0_47, %c0_48, %c0_49] : memref<3x576x288xbf16, #tpu.memory_space<vmem>>, vector<1x576x288xbf16>
    %48 = vector.shape_cast %47 : vector<1x576x288xbf16> to vector<576x288xbf16>
    %cst_50 = arith.constant dense<0.000000e+00> : vector<18x288xf32>
    %49 = tpu.matmul %46, %48, %cst_50 {dimension_numbers = #tpu.dot_dimension_numbers<[1], [0], [0], [1], [0, 0, 1, 1], [], []>} : vector<18x576xbf16>, vector<576x288xbf16>, vector<18x288xf32> -> vector<18x288xf32>
    %c1_51 = arith.constant 1 : index
    %c0_52 = arith.constant 0 : index
    %50 = vector.load %arg13[%c1_51, %c0_52] : memref<20x576xf32, #tpu.memory_space<vmem>>, vector<18x576xf32>
    %51 = arith.truncf %50 : vector<18x576xf32> to vector<18x576xbf16>
    %c1_53 = arith.constant 1 : index
    %c0_54 = arith.constant 0 : index
    %c0_55 = arith.constant 0 : index
    %52 = vector.load %arg4[%c1_53, %c0_54, %c0_55] : memref<3x576x288xbf16, #tpu.memory_space<vmem>>, vector<1x576x288xbf16>
    %53 = vector.shape_cast %52 : vector<1x576x288xbf16> to vector<576x288xbf16>
    %cst_56 = arith.constant dense<0.000000e+00> : vector<18x288xf32>
    %54 = tpu.matmul %51, %53, %cst_56 {dimension_numbers = #tpu.dot_dimension_numbers<[1], [0], [0], [1], [0, 0, 1, 1], [], []>} : vector<18x576xbf16>, vector<576x288xbf16>, vector<18x288xf32> -> vector<18x288xf32>
    %55 = arith.addf %49, %54 : vector<18x288xf32>
    %c2_57 = arith.constant 2 : index
    %c0_58 = arith.constant 0 : index
    %56 = vector.load %arg13[%c2_57, %c0_58] : memref<20x576xf32, #tpu.memory_space<vmem>>, vector<18x576xf32>
    %57 = arith.truncf %56 : vector<18x576xf32> to vector<18x576xbf16>
    %c2_59 = arith.constant 2 : index
    %c0_60 = arith.constant 0 : index
    %c0_61 = arith.constant 0 : index
    %58 = vector.load %arg4[%c2_59, %c0_60, %c0_61] : memref<3x576x288xbf16, #tpu.memory_space<vmem>>, vector<1x576x288xbf16>
    %59 = vector.shape_cast %58 : vector<1x576x288xbf16> to vector<576x288xbf16>
    %cst_62 = arith.constant dense<0.000000e+00> : vector<18x288xf32>
    %60 = tpu.matmul %57, %59, %cst_62 {dimension_numbers = #tpu.dot_dimension_numbers<[1], [0], [0], [1], [0, 0, 1, 1], [], []>} : vector<18x576xbf16>, vector<576x288xbf16>, vector<18x288xf32> -> vector<18x288xf32>
    %61 = arith.addf %55, %60 : vector<18x288xf32>
    %c0_63 = arith.constant 0 : index
    %c0_64 = arith.constant 0 : index
    %62 = vector.load %arg5[%c0_63, %c0_64] : memref<1x288xf32, #tpu.memory_space<vmem>>, vector<1x288xf32>
    %63 = vector.broadcast %62 : vector<1x288xf32> to vector<18x288xf32>
    %64 = arith.addf %61, %63 : vector<18x288xf32>
    %c0_65 = arith.constant 0 : index
    %c0_66 = arith.constant 0 : index
    %c0_67 = arith.constant 0 : index
    %65 = vector.load %arg9[%c0_65, %c0_66, %c0_67] : memref<1x18x288xf32, #tpu.memory_space<vmem>>, vector<1x18x288xf32>
    %66 = vector.shape_cast %65 : vector<1x18x288xf32> to vector<18x288xf32>
    %67 = vector.shape_cast %64 : vector<18x288xf32> to vector<1x18x288xf32>
    tpu.vector_store %arg9[%c0_65, %c0_66, %c0_67], %67 {strides = array<i32>} : memref<1x18x288xf32, #tpu.memory_space<vmem>>, vector<1x18x288xf32>,
    %cst_68 = arith.constant 0.000000e+00 : f32
    %68 = vector.broadcast %cst_68 : f32 to vector<1x288xf32>
    %c0_69 = arith.constant 0 : index
    %c0_70 = arith.constant 0 : index
    %69 = vector.load %arg14[%c0_69, %c0_70] : memref<20x288xf32, #tpu.memory_space<vmem>>, vector<1x288xf32>
    tpu.vector_store %arg14[%c0_69, %c0_70], %68 {strides = array<i32>} : memref<20x288xf32, #tpu.memory_space<vmem>>, vector<1x288xf32>,
    %c19_71 = arith.constant 19 : index
    %c0_72 = arith.constant 0 : index
    %70 = vector.load %arg14[%c19_71, %c0_72] : memref<20x288xf32, #tpu.memory_space<vmem>>, vector<1x288xf32>
    tpu.vector_store %arg14[%c19_71, %c0_72], %68 {strides = array<i32>} : memref<20x288xf32, #tpu.memory_space<vmem>>, vector<1x288xf32>,
    %c1_73 = arith.constant 1 : index
    %c0_74 = arith.constant 0 : index
    %71 = vector.load %arg14[%c1_73, %c0_74] : memref<20x288xf32, #tpu.memory_space<vmem>>, vector<18x288xf32>
    tpu.vector_store %arg14[%c1_73, %c0_74], %64 {strides = array<i32>} : memref<20x288xf32, #tpu.memory_space<vmem>>, vector<18x288xf32>,
    %c0_75 = arith.constant 0 : index
    %c0_76 = arith.constant 0 : index
    %72 = vector.load %arg14[%c0_75, %c0_76] : memref<20x288xf32, #tpu.memory_space<vmem>>, vector<18x288xf32>
    %73 = arith.truncf %72 : vector<18x288xf32> to vector<18x288xbf16>
    %c0_77 = arith.constant 0 : index
    %c0_78 = arith.constant 0 : index
    %c0_79 = arith.constant 0 : index
    %74 = vector.load %arg6[%c0_77, %c0_78, %c0_79] : memref<3x288x144xbf16, #tpu.memory_space<vmem>>, vector<1x288x144xbf16>
    %75 = vector.shape_cast %74 : vector<1x288x144xbf16> to vector<288x144xbf16>
    %cst_80 = arith.constant dense<0.000000e+00> : vector<18x144xf32>
    %76 = tpu.matmul %73, %75, %cst_80 {dimension_numbers = #tpu.dot_dimension_numbers<[1], [0], [0], [1], [0, 0, 1, 1], [], []>} : vector<18x288xbf16>, vector<288x144xbf16>, vector<18x144xf32> -> vector<18x144xf32>
    %c1_81 = arith.constant 1 : index
    %c0_82 = arith.constant 0 : index
    %77 = vector.load %arg14[%c1_81, %c0_82] : memref<20x288xf32, #tpu.memory_space<vmem>>, vector<18x288xf32>
    %78 = arith.truncf %77 : vector<18x288xf32> to vector<18x288xbf16>
    %c1_83 = arith.constant 1 : index
    %c0_84 = arith.constant 0 : index
    %c0_85 = arith.constant 0 : index
    %79 = vector.load %arg6[%c1_83, %c0_84, %c0_85] : memref<3x288x144xbf16, #tpu.memory_space<vmem>>, vector<1x288x144xbf16>
    %80 = vector.shape_cast %79 : vector<1x288x144xbf16> to vector<288x144xbf16>
    %cst_86 = arith.constant dense<0.000000e+00> : vector<18x144xf32>
    %81 = tpu.matmul %78, %80, %cst_86 {dimension_numbers = #tpu.dot_dimension_numbers<[1], [0], [0], [1], [0, 0, 1, 1], [], []>} : vector<18x288xbf16>, vector<288x144xbf16>, vector<18x144xf32> -> vector<18x144xf32>
    %82 = arith.addf %76, %81 : vector<18x144xf32>
    %c2_87 = arith.constant 2 : index
    %c0_88 = arith.constant 0 : index
    %83 = vector.load %arg14[%c2_87, %c0_88] : memref<20x288xf32, #tpu.memory_space<vmem>>, vector<18x288xf32>
    %84 = arith.truncf %83 : vector<18x288xf32> to vector<18x288xbf16>
    %c2_89 = arith.constant 2 : index
    %c0_90 = arith.constant 0 : index
    %c0_91 = arith.constant 0 : index
    %85 = vector.load %arg6[%c2_89, %c0_90, %c0_91] : memref<3x288x144xbf16, #tpu.memory_space<vmem>>, vector<1x288x144xbf16>
    %86 = vector.shape_cast %85 : vector<1x288x144xbf16> to vector<288x144xbf16>
    %cst_92 = arith.constant dense<0.000000e+00> : vector<18x144xf32>
    %87 = tpu.matmul %84, %86, %cst_92 {dimension_numbers = #tpu.dot_dimension_numbers<[1], [0], [0], [1], [0, 0, 1, 1], [], []>} : vector<18x288xbf16>, vector<288x144xbf16>, vector<18x144xf32> -> vector<18x144xf32>
    %88 = arith.addf %82, %87 : vector<18x144xf32>
    %c0_93 = arith.constant 0 : index
    %c0_94 = arith.constant 0 : index
    %89 = vector.load %arg7[%c0_93, %c0_94] : memref<1x144xf32, #tpu.memory_space<vmem>>, vector<1x144xf32>
    %90 = vector.broadcast %89 : vector<1x144xf32> to vector<18x144xf32>
    %91 = arith.addf %88, %90 : vector<18x144xf32>
    %c0_95 = arith.constant 0 : index
    %c0_96 = arith.constant 0 : index
    %c0_97 = arith.constant 0 : index
    %92 = vector.load %arg10[%c0_95, %c0_96, %c0_97] : memref<1x18x144xf32, #tpu.memory_space<vmem>>, vector<1x18x144xf32>
    %93 = vector.shape_cast %92 : vector<1x18x144xf32> to vector<18x144xf32>
    %94 = vector.shape_cast %91 : vector<18x144xf32> to vector<1x18x144xf32>
    tpu.vector_store %arg10[%c0_95, %c0_96, %c0_97], %94 {strides = array<i32>} : memref<1x18x144xf32, #tpu.memory_space<vmem>>, vector<1x18x144xf32>,
    %cst_98 = arith.constant 4.000000e+00 : f32
    %95 = vector.broadcast %cst_98 : f32 to vector<18x144xf32>
    %96 = arith.addf %91, %95 : vector<18x144xf32>
    %cst_99 = arith.constant 0.000000e+00 : f32
    %cst_100 = arith.constant 8.000000e+00 : f32
    %97 = vector.broadcast %cst_99 : f32 to vector<18x144xf32>
    %98 = arith.maximumf %97, %96 : vector<18x144xf32>
    %99 = vector.broadcast %cst_100 : f32 to vector<18x144xf32>
    %100 = arith.minimumf %99, %98 : vector<18x144xf32>
    %cst_101 = arith.constant 1.250000e-01 : f32
    %101 = vector.broadcast %cst_101 : f32 to vector<18x144xf32>
    %102 = arith.mulf %100, %101 : vector<18x144xf32>
    %c0_102 = arith.constant 0 : index
    %c0_103 = arith.constant 0 : index
    %c0_104 = arith.constant 0 : index
    %103 = vector.load %arg11[%c0_102, %c0_103, %c0_104] : memref<1x18x144xf32, #tpu.memory_space<vmem>>, vector<1x18x144xf32>
    %104 = vector.shape_cast %103 : vector<1x18x144xf32> to vector<18x144xf32>
    %105 = vector.shape_cast %102 : vector<18x144xf32> to vector<1x18x144xf32>
    tpu.vector_store %arg11[%c0_102, %c0_103, %c0_104], %105 {strides = array<i32>} : memref<1x18x144xf32, #tpu.memory_space<vmem>>, vector<1x18x144xf32>,
    return
  }
  func.func @transform_0(%arg0: i32) -> (i32, i32, i32) {
    %c0_i32 = arith.constant 0 : i32
    %c0_i32_0 = arith.constant 0 : i32
    %c0_i32_1 = arith.constant 0 : i32
    return %arg0, %c0_i32, %c0_i32_0 : i32, i32, i32
  }
  func.func @transform_1(%arg0: i32) -> (i32, i32, i32) {
    %c0_i32 = arith.constant 0 : i32
    %c0_i32_0 = arith.constant 0 : i32
    %c0_i32_1 = arith.constant 0 : i32
    %c0_i32_2 = arith.constant 0 : i32
    return %c0_i32, %c0_i32_0, %c0_i32_1 : i32, i32, i32
  }
  func.func @transform_2(%arg0: i32) -> (i32, i32) {
    %c0_i32 = arith.constant 0 : i32
    %c0_i32_0 = arith.constant 0 : i32
    %c0_i32_1 = arith.constant 0 : i32
    return %c0_i32, %c0_i32_0 : i32, i32
  }
  func.func @transform_3(%arg0: i32) -> (i32, i32, i32) {
    %c0_i32 = arith.constant 0 : i32
    %c0_i32_0 = arith.constant 0 : i32
    %c0_i32_1 = arith.constant 0 : i32
    %c0_i32_2 = arith.constant 0 : i32
    return %c0_i32, %c0_i32_0, %c0_i32_1 : i32, i32, i32
  }
  func.func @transform_4(%arg0: i32) -> (i32, i32) {
    %c0_i32 = arith.constant 0 : i32
    %c0_i32_0 = arith.constant 0 : i32
    %c0_i32_1 = arith.constant 0 : i32
    return %c0_i32, %c0_i32_0 : i32, i32
  }
  func.func @transform_5(%arg0: i32) -> (i32, i32, i32) {
    %c0_i32 = arith.constant 0 : i32
    %c0_i32_0 = arith.constant 0 : i32
    %c0_i32_1 = arith.constant 0 : i32
    %c0_i32_2 = arith.constant 0 : i32
    return %c0_i32, %c0_i32_0, %c0_i32_1 : i32, i32, i32
  }
  func.func @transform_6(%arg0: i32) -> (i32, i32) {
    %c0_i32 = arith.constant 0 : i32
    %c0_i32_0 = arith.constant 0 : i32
    %c0_i32_1 = arith.constant 0 : i32
    return %c0_i32, %c0_i32_0 : i32, i32
  }
  func.func @transform_7(%arg0: i32) -> (i32, i32, i32) {
    %c0_i32 = arith.constant 0 : i32
    %c0_i32_0 = arith.constant 0 : i32
    %c0_i32_1 = arith.constant 0 : i32
    return %arg0, %c0_i32, %c0_i32_0 : i32, i32, i32
  }
  func.func @transform_8(%arg0: i32) -> (i32, i32, i32) {
    %c0_i32 = arith.constant 0 : i32
    %c0_i32_0 = arith.constant 0 : i32
    %c0_i32_1 = arith.constant 0 : i32
    return %arg0, %c0_i32, %c0_i32_0 : i32, i32, i32
  }
  func.func @transform_9(%arg0: i32) -> (i32, i32, i32) {
    %c0_i32 = arith.constant 0 : i32
    %c0_i32_0 = arith.constant 0 : i32
    %c0_i32_1 = arith.constant 0 : i32
    return %arg0, %c0_i32, %c0_i32_0 : i32, i32, i32
  }
  func.func @transform_10(%arg0: i32) -> (i32, i32, i32) {
    %c0_i32 = arith.constant 0 : i32
    %c0_i32_0 = arith.constant 0 : i32
    %c0_i32_1 = arith.constant 0 : i32
    return %arg0, %c0_i32, %c0_i32_0 : i32, i32, i32
  }
}

</mosaic_0001>

<bundles_post_ra>
// kernel: model_forward.1
= control target key start
LH: loop header
LB: loop body
LE: loop exit
PB: predicated region body
PF: predicated region fallthrough
CT: control target
= control target key end

     0   :  { %s11930_s13 = smov 0   ;;  %s15186_s0 = inlined_call_operand.vmem [shape: f32[2,16,256], index: 0, kind: input, shape index: {}]   ;;  %s15187_s1 = inlined_call_operand.vmem [shape: bf16[5,256,576], index: 1, kind: input, shape index: {}]   ;;  %s15188_s2 = inlined_call_operand.vmem [shape: f32[1,576], index: 2, kind: input, shape index: {}]   ;;  %s15189_s3 = inlined_call_operand.vmem [shape: bf16[3,576,288], index: 3, kind: input, shape index: {}]   ;;  %s15190_s4 = inlined_call_operand.vmem [shape: f32[1,288], index: 4, kind: input, shape index: {}]   ;;  %s15191_s5 = inlined_call_operand.vmem [shape: bf16[3,288,144], index: 5, kind: input, shape index: {}]   ;;  %s15192_s6 = inlined_call_operand.vmem [shape: f32[1,144], index: 6, kind: input, shape index: {}]   ;;  %s15193_s7 = inlined_call_operand.vmem [shape: f32[2,18,576], index: 7, kind: output, shape index: {0}]   ;;  %s15194_s8 = inlined_call_operand.vmem [shape: f32[2,18,288], index: 8, kind: output, shape index: {1}]   ;;  %s15195_s9 = inlined_call_operand.vmem [shape: f32[2,18,144], index: 9, kind: output, shape index: {2}]   ;;  %s15196_s10 = inlined_call_operand.vmem [shape: f32[2,18,144], index: 10, kind: output, shape index: {3}]  }
   0x1 LB: > { %s8721_s14 = sadd.s32 4294967295, %s11871_s13   ;;  %p8725_p0 = scmp.ge.s32.totalorder %s11871_s13, 1  ;;  %s11871_s13 = sphi %s11930_s13, %s21_s13  }
   0x2   : > { %p319_p1 = scmp.lt.s32.totalorder %s11871_s13, 3 }
   0x4   : > { %p320_p2 = pnand %p8725_p0, %p319_p1 }
   0x5   : > { %p372_p3 = scmp.lt.s32.totalorder (!%p320_p2), %s8721_s14, 1 }
   0x6   : > { %323 = sbr.rel (%p320_p2) target bundleno = 1491 (0x5d3), region = 48 }
   0xb   : > { %v10704_v0 = vld [vmem:[%s15187_s1 + $0x39c] ss:$20 sps:$4 sm:$0xff]   ;;  %v10706_v1 = vld [vmem:[%s15187_s1 + $0x3a4] ss:$20 sps:$4 sm:$0xff]   ;;  %v11873_v2 = vmov 0.0   ;;  %s15198_s14 = smov (!%p372_p3, %s8721_s14), 1 }
   0xc   : > { %403 = vst [vmem:[#allocation2 + $0x20] sm:$0x7] %v11873_v2  ;;  %402 = vst [vmem:[#allocation2 + $0x18] sm:$0x7] %v11873_v2  ;;  %1091 = vmatprep.subr.bf16.mxu0 %v10704_v0  ;;  %v10708_v3 = vld [vmem:[%s15187_s1 + $0x398] ss:$20 sps:$4 sm:$0xff]   ;;  %1142 = vmatprep.subr.bf16.mxu1 %v10706_v1 }
   0xd   : > { %404 = vst [vmem:[#allocation2 + $0x8] sm:$0x38] %v11873_v2  ;;  %405 = vst [vmem:[#allocation2] sm:$0x38] %v11873_v2  ;;  %v10709_v4 = vld [vmem:[%s15187_s1 + $0x3a0] ss:$20 sps:$4 sm:$0xff]   ;;  %1092 = vmatpush1.bf16.msra.mxu0 %v10708_v3 }
   0xe   : > { %v10710_v5 = vld [vmem:[%s15187_s1 + $0x374] ss:$20 sps:$4 sm:$0xff]   ;;  %1143 = vmatpush1.bf16.msra.mxu1 %v10709_v4  ;;  %v10712_v6 = vld [vmem:[%s15187_s1 + $0x37c] ss:$20 sps:$4 sm:$0xff]   ;;  %v10715_v8 = vld [vmem:[%s15187_s1 + $0x378] ss:$20 sps:$4 sm:$0xff]  }
   0xf   : > { %v10714_v7 = vld [vmem:[%s15187_s1 + $0x370] ss:$20 sps:$4 sm:$0xff]   ;;  %1093 = vmatprep.subr.bf16.mxu0 %v10710_v5  ;;  %1144 = vmatprep.subr.bf16.mxu1 %v10712_v6  ;;  %v10716_v9 = vld [vmem:[%s15187_s1 + $0x34c] ss:$20 sps:$4 sm:$0xff]   ;;  %v10718_v10 = vld [vmem:[%s15187_s1 + $0x354] ss:$20 sps:$4 sm:$0xff]  }
  0x10   : > { %v10720_v11 = vld [vmem:[%s15187_s1 + $0x348] ss:$20 sps:$4 sm:$0xff]   ;;  %v10721_v12 = vld [vmem:[%s15187_s1 + $0x350] ss:$20 sps:$4 sm:$0xff]   ;;  %v10724_v14 = vld [vmem:[%s15187_s1 + $0x32c] ss:$20 sps:$4 sm:$0xff]  }
  0x11   : > { %1094 = vmatpush1.bf16.msra.mxu0 %v10714_v7  ;;  %v10722_v13 = vld [vmem:[%s15187_s1 + $0x324] ss:$20 sps:$4 sm:$0xff]   ;;  %v10726_v15 = vld [vmem:[%s15187_s1 + $0x320] ss:$20 sps:$4 sm:$0xff]   ;;  %v10727_v16 = vld [vmem:[%s15187_s1 + $0x328] ss:$20 sps:$4 sm:$0xff]  }
  0x12   : > { %1145 = vmatpush1.bf16.msra.mxu1 %v10715_v8  ;;  %1095 = vmatprep.subr.bf16.mxu0 %v10716_v9  ;;  %v10728_v17 = vld [vmem:[%s15187_s1 + $0x2fc] ss:$20 sps:$4 sm:$0xff]   ;;  %v10730_v18 = vld [vmem:[%s15187_s1 + $0x304] ss:$20 sps:$4 sm:$0xff]   ;;  %v10733_v20 = vld [vmem:[%s15187_s1 + $0x300] ss:$20 sps:$4 sm:$0xff]  }
  0x13   : > { %1146 = vmatprep.subr.bf16.mxu1 %v10718_v10  ;;  %v10732_v19 = vld [vmem:[%s15187_s1 + $0x2f8] ss:$20 sps:$4 sm:$0xff]   ;;  %v10734_v21 = vld [vmem:[%s15187_s1 + $0x2d4] ss:$20 sps:$4 sm:$0xff]   ;;  %v10736_v22 = vld [vmem:[%s15187_s1 + $0x2dc] ss:$20 sps:$4 sm:$0xff]  }
  0x14   : > { %v10738_v23 = vld [vmem:[%s15187_s1 + $0x2d0] ss:$20 sps:$4 sm:$0xff]   ;;  %v10739_v24 = vld [vmem:[%s15187_s1 + $0x2d8] ss:$20 sps:$4 sm:$0xff]   ;;  %v10742_v26 = vld [vmem:[%s15187_s1 + $0x2b4] ss:$20 sps:$4 sm:$0xff]  }
  0x15   : > { %1096 = vmatpush1.bf16.msra.mxu0 %v10720_v11  ;;  %v10740_v25 = vld [vmem:[%s15187_s1 + $0x2ac] ss:$20 sps:$4 sm:$0xff]   ;;  %v10744_v27 = vld [vmem:[%s15187_s1 + $0x2a8] ss:$20 sps:$4 sm:$0xff]   ;;  %v10745_v28 = vld [vmem:[%s15187_s1 + $0x2b0] ss:$20 sps:$4 sm:$0xff]  }
  0x16   : > { %1147 = vmatpush1.bf16.msra.mxu1 %v10721_v12  ;;  %1097 = vmatprep.subr.bf16.mxu0 %v10722_v13  ;;  %v10746_v29 = vld [vmem:[%s15187_s1 + $0x284] ss:$20 sps:$4 sm:$0xff]   ;;  %v10748_v30 = vld [vmem:[%s15187_s1 + $0x28c] ss:$20 sps:$4 sm:$0xff]   ;;  %v10751_v32 = vld [vmem:[%s15187_s1 + $0x288] ss:$20 sps:$4 sm:$0xff]  }
  0x17   : > { %1148 = vmatprep.subr.bf16.mxu1 %v10724_v14  ;;  %v10750_v31 = vld [vmem:[%s15187_s1 + $0x280] ss:$20 sps:$4 sm:$0xff]   ;;  %v10752_v33 = vld [vmem:[%s15187_s1 + $0x4dc] ss:$20 sps:$4 sm:$0xff]   ;;  %v10754_v34 = vld [vmem:[%s15187_s1 + $0x4e4] ss:$20 sps:$4 sm:$0xff]  }
  0x18   : > { %v10756_v35 = vld [vmem:[%s15187_s1 + $0x4d8] ss:$20 sps:$4 sm:$0xff]   ;;  %v10757_v36 = vld [vmem:[%s15187_s1 + $0x4e0] ss:$20 sps:$4 sm:$0xff]   ;;  %v10760_v38 = vld [vmem:[%s15187_s1 + $0x4bc] ss:$20 sps:$4 sm:$0xff]  }
  0x19   : > { %1098 = vmatpush1.bf16.msra.mxu0 %v10726_v15  ;;  %v10758_v37 = vld [vmem:[%s15187_s1 + $0x4b4] ss:$20 sps:$4 sm:$0xff]   ;;  %v10762_v39 = vld [vmem:[%s15187_s1 + $0x4b0] ss:$20 sps:$4 sm:$0xff]   ;;  %v10763_v40 = vld [vmem:[%s15187_s1 + $0x4b8] ss:$20 sps:$4 sm:$0xff]  }
  0x1a   : > { %1149 = vmatpush1.bf16.msra.mxu1 %v10727_v16  ;;  %1099 = vmatprep.subr.bf16.mxu0 %v10728_v17  ;;  %v10764_v41 = vld [vmem:[%s15187_s1 + $0x48c] ss:$20 sps:$4 sm:$0xff]   ;;  %s10328_s25 = sshll.u32 %s15198_s14, 5  ;;  %v10766_v42 = vld [vmem:[%s15187_s1 + $0x494] ss:$20 sps:$4 sm:$0xff]   ;;  %vm410_vm0 = vcmask 1042432  }
  0x1b   : > { %1150 = vmatprep.subr.bf16.mxu1 %v10730_v18  ;;  %v10768_v43 = vld [vmem:[%s15187_s1 + $0x488] ss:$20 sps:$4 sm:$0xff]   ;;  %v10769_v44 = vld [vmem:[%s15187_s1 + $0x490] ss:$20 sps:$4 sm:$0xff]   ;;  %s376_s16 = scalar_lea.vmem %s15186_s0, %s10328_s25  ;;  %v10772_v46 = vld [vmem:[%s15187_s1 + $0x46c] ss:$20 sps:$4 sm:$0xff]  }
  0x1c   : > { %v10770_v45 = vld [vmem:[%s15187_s1 + $0x464] ss:$20 sps:$4 sm:$0xff]   ;;  %v10774_v47 = vld [vmem:[%s15187_s1 + $0x460] ss:$20 sps:$4 sm:$0xff]   ;;  %v10775_v48 = vld [vmem:[%s15187_s1 + $0x468] ss:$20 sps:$4 sm:$0xff]  }
  0x1d   : > { %1100 = vmatpush1.bf16.msra.mxu0 %v10732_v19  ;;  %v399_v49 = vld [vmem:[%s376_s16 + $0x8] sm:$0xff]  ;;  %v10776_v50 = vld [vmem:[%s15187_s1 + $0x43c] ss:$20 sps:$4 sm:$0xff]   ;;  %v398_v53 = vld [vmem:[%s376_s16] sm:$0xff]  ;;  %vm640_vm1 = vsmask.f32 7424 }
  0x1e   : > { %1151 = vmatpush1.bf16.msra.mxu1 %v10733_v20  ;;  %1101 = vmatprep.subr.bf16.mxu0 %v10734_v21  ;;  %v401_v51 = vld [vmem:[%s376_s16 + $0x18] sm:$0xff]  ;;  %v412_v52 = vrot.slane %v399_v49, 5  ;;  %v400_v54 = vld [vmem:[%s376_s16 + $0x10] sm:$0xff]  ;;  %v411_v56 = vrot.slane %v398_v53, 5  ;;  %v10788_v4 = vld [vmem:[%s15187_s1 + $0x3ec] ss:$20 sps:$4 sm:$0xff]  }
  0x1f   : > { %1152 = vmatprep.subr.bf16.mxu1 %v10736_v22  ;;  %v415_v55 = vrot.slane %v401_v51, 5  ;;  %v413_v57 = vrot.slane %v400_v54, 5  ;;  %v10778_v58 = vld [vmem:[%s15187_s1 + $0x444] ss:$20 sps:$4 sm:$0xff]   ;;  %v10781_v62 = vld [vmem:[%s15187_s1 + $0x440] ss:$20 sps:$4 sm:$0xff]  }
  0x20   : > { %424 = vst [vmem:[#allocation2 + $0x20] sm:$0xf8] %v412_v52  ;;  %423 = vst [vmem:[#allocation2 + $0x18] sm:$0xf8] %v411_v56  ;;  %v10780_v61 = vld [vmem:[%s15187_s1 + $0x438] ss:$20 sps:$4 sm:$0xff]  }
  0x21   : > { %1102 = vmatpush1.bf16.msra.mxu0 %v10738_v23  ;;  %v12102_v59 = vsel %vm410_vm0, %v412_v52, %v415_v55  ;;  %428 = vst [vmem:[#allocation2] sm:$0x7] %v415_v55  ;;  %v12104_v60 = vsel %vm410_vm0, %v411_v56, %v413_v57  ;;  %427 = vst [vmem:[#allocation2 + $0x8] sm:$0x7] %v413_v57  ;;  %v10782_v63 = vld [vmem:[%s15187_s1 + $0x414] ss:$20 sps:$4 sm:$0xff]  }
  0x22   : > { %1153 = vmatpush1.bf16.msra.mxu1 %v10739_v24  ;;  %1103 = vmatprep.subr.bf16.mxu0 %v10740_v25  ;;  %426 = vst [vmem:[#allocation2 + $0x10] sm:$0xff] %v12102_v59  ;;  %425 = vst [vmem:[#allocation2 + $0x28] sm:$0xff] %v12104_v60  ;;  %v10784_v0 = vld [vmem:[%s15187_s1 + $0x41c] ss:$20 sps:$4 sm:$0xff]   ;;  %v10787_v3 = vld [vmem:[%s15187_s1 + $0x418] ss:$20 sps:$4 sm:$0xff]  }
  0x23   : > { %1154 = vmatprep.subr.bf16.mxu1 %v10742_v26  ;;  %v10786_v1 = vld [vmem:[%s15187_s1 + $0x410] ss:$20 sps:$4 sm:$0xff]   ;;  %v10790_v5 = vld [vmem:[%s15187_s1 + $0x3f4] ss:$20 sps:$4 sm:$0xff]   ;;  %v10796_v23 = vld [vmem:[%s15187_s1 + $0x3cc] ss:$20 sps:$4 sm:$0xff]  }
  0x24   : > { %v10792_v11 = vld [vmem:[%s15187_s1 + $0x3e8] ss:$20 sps:$4 sm:$0xff]   ;;  %v10793_v12 = vld [vmem:[%s15187_s1 + $0x3f0] ss:$20 sps:$4 sm:$0xff]   ;;  %v10798_v25 = vld [vmem:[%s15187_s1 + $0x3c0] ss:$20 sps:$4 sm:$0xff]  }
  0x25   : > { %1104 = vmatpush1.bf16.msra.mxu0 %v10744_v27  ;;  %v10794_v16 = vld [vmem:[%s15187_s1 + $0x3c4] ss:$20 sps:$4 sm:$0xff]   ;;  %v10799_v26 = vld [vmem:[%s15187_s1 + $0x3c8] ss:$20 sps:$4 sm:$0xff]   ;;  %v10816_v52 = vld [vmem:[%s15187_s1 + $0xa0] ss:$20 sps:$4 sm:$0xff]  }
  0x26   : > { %1155 = vmatpush1.bf16.msra.mxu1 %v10745_v28  ;;  %1105 = vmatprep.subr.bf16.mxu0 %v10746_v29  ;;  %v10814_v49 = vld [vmem:[%s15187_s1 + $0x358] ss:$20 sps:$4 sm:$0xff]   ;;  %v10819_v53 = vld [vmem:[%s15187_s1 + $0x330] ss:$20 sps:$4 sm:$0xff]   ;;  %v10820_v54 = vld [vmem:[%s15187_s1 + $0x448] ss:$20 sps:$4 sm:$0xff]  }
  0x27   : > { %1156 = vmatprep.subr.bf16.mxu1 %v10748_v30  ;;  %v536_v6 = vld [vmem:[#allocation2 + $0x20] sm:$0xfe]  ;;  %v535_v9 = vld [vmem:[#allocation2 + $0x18] sm:$0xfe]  ;;  %vm1916_vm2 = vcmask 1046528   ;;  %vm3342_vm4 = vcmask 1045504  }
  0x28   : > { %v538_v7 = vld [vmem:[#allocation2] sm:$0x7]  ;;  %v540_v8 = vpack.c.bf16 %v12102_v59, %v536_v6  ;;  %v537_v10 = vld [vmem:[#allocation2 + $0x8] sm:$0x7]  ;;  %v539_v14 = vpack.c.bf16 %v12104_v60, %v535_v9  ;;  %v10818_v51 = vld [vmem:[%s15187_s1 + $0xa4] ss:$20 sps:$4 sm:$0xff]  }
  0x29   : > { %1106 = vmatpush1.bf16.msra.mxu0 %v10750_v31  ;;  %v542_v13 = vpack.c.bf16 %v538_v7, %v538_v7  ;;  %v541_v15 = vpack.c.bf16 %v537_v10, %v537_v10  ;;  %v10800_v30 = vld [vmem:[%s15187_s1 + $0x4e8] ss:$20 sps:$4 sm:$0xff]   ;;  %v10821_v56 = vld [vmem:[%s15187_s1 + $0x78] ss:$20 sps:$4 sm:$0xff]   ;;  %v10836_v7 = vld [vmem:[%s15187_s1] ss:$20 sps:$4 sm:$0xff]  }
  0x2a   : > { %1157 = vmatpush1.bf16.msra.mxu1 %v10751_v32  ;;  %1107 = vmatprep.subr.bf16.mxu0 %v10752_v33  ;;  %v654_v17 = vshrl.u32 %v540_v8, 16  ;;  %v656_v18 = vshll.u32 %v540_v8, 16  ;;  %v642_v20 = vshrl.u32 %v539_v14, 16  ;;  %v644_v21 = vshll.u32 %v539_v14, 16  ;;  %v10823_v55 = vld [vmem:[%s15187_s1 + $0x7c] ss:$20 sps:$4 sm:$0xff]  }
  0x2b   : > { %1158 = vmatprep.subr.bf16.mxu1 %v10754_v34  ;;  %v661_v19 = vshll.u32 %v542_v13, 16  ;;  %v649_v22 = vshll.u32 %v541_v15, 16  ;;  %v10803_v34 = vld [vmem:[%s15187_s1 + $0x11c] ss:$20 sps:$4 sm:$0xff]   ;;  %v10838_v6 = vld [vmem:[%s15187_s1 + $0x4] ss:$20 sps:$4 sm:$0xff]  }
  0x2c   : > { %v658_v24 = vrot.slane %v656_v18, 1  ;;  %v646_v28 = vrot.slane %v644_v21, 1  ;;  %v10824_v57 = vld [vmem:[%s15187_s1 + $0x308] ss:$20 sps:$4 sm:$0xff]   ;;  %v10839_v8 = vld [vmem:[%s15187_s1 + $0x290] ss:$20 sps:$4 sm:$0xff]  }
  0x2d   : > { %1108 = vmatpush2.bf16.msra.mxu0 %v10756_v35  ;;  %v663_v27 = vrot.slane %v661_v19, 1  ;;  %v651_v32 = vrot.slane %v649_v22, 1  ;;  %v668_v35 = vshrl.u32 %v542_v13, 16  ;;  %v10842_v9 = vld [vmem:[%s15187_s1 + $0x25c] ss:$20 sps:$4 sm:$0xff]   ;;  %s10691_s17 = smul.u32 120, %s15198_s14 }
  0x2e   : > { %1159 = vmatpush2.bf16.msra.mxu1 %v10757_v36  ;;  %1109 = vmatprep.subr.bf16.mxu0 %v10758_v37  ;;  %v659_v29 = vor.u32 %v658_v24, %v654_v17  ;;  %v647_v31 = vor.u32 %v646_v28, %v642_v20  ;;  %v10801_v36 = vld [vmem:[%s15187_s1 + $0x118] ss:$20 sps:$4 sm:$0xff]   ;;  %v10843_v13 = vld [vmem:[%s15187_s1 + $0x120] ss:$20 sps:$4 sm:$0xff]   ;;  %v10846_v17 = vld [vmem:[%s15187_s1 + $0x230] ss:$20 sps:$4 sm:$0xff]  }
  0x2f   : > { %1160 = vmatprep.subr.bf16.mxu1 %v10760_v38  ;;  %v10804_v38 = vld [vmem:[%s15187_s1 + $0x3a8] ss:$20 sps:$4 sm:$0xff]   ;;  %v10845_v10 = vld [vmem:[%s15187_s1 + $0x124] ss:$20 sps:$4 sm:$0xff]   ;;  %v10854_v19 = vld [vmem:[%s15187_s1 + $0x20c] ss:$20 sps:$4 sm:$0xff]   ;;  %s13671_s20 = scalar_lea.vmem %s15193_s7, %s10691_s17 }
  0x30   : > { %v664_v33 = vsel %vm640_vm1, %v659_v29, %v663_v27  ;;  %v12163_v37 = vsel %vm640_vm1, %v647_v31, %v651_v32  ;;  %v10848_v14 = vld [vmem:[%s15187_s1 + $0x234] ss:$20 sps:$4 sm:$0xff]   ;;  %v10849_v18 = vld [vmem:[%s15187_s1 + $0xf8] ss:$20 sps:$4 sm:$0xff]   ;;  %v10855_v22 = vld [vmem:[%s15187_s1 + $0xd0] ss:$20 sps:$4 sm:$0xff]  }
  0x31   : > { %1110 = vmatpush2.bf16.msra.mxu0 %v10762_v39  ;;  %1123 = vmatprep.mubr.bf16.mxu0 %v664_v33  ;;  %v10805_v39 = vld [vmem:[%s15187_s1 + $0x4c0] ss:$20 sps:$4 sm:$0xff]   ;;  %v10852_v21 = vld [vmem:[%s15187_s1 + $0x208] ss:$20 sps:$4 sm:$0xff]   ;;  %v10869_v28 = vld [vmem:[%s15187_s1 + $0x84] ss:$20 sps:$4 sm:$0xff]  }
  0x32   : > { %1161 = vmatpush2.bf16.msra.mxu1 %v10763_v40  ;;  %1111 = vmatprep.subr.bf16.mxu0 %v10764_v41  ;;  %v10808_v40 = vld [vmem:[%s15187_s1 + $0xf4] ss:$20 sps:$4 sm:$0xff]   ;;  %v10806_v41 = vld [vmem:[%s15187_s1 + $0xf0] ss:$20 sps:$4 sm:$0xff]   ;;  %v10863_v24 = vld [vmem:[%s15187_s1 + $0xac] ss:$20 sps:$4 sm:$0xff]  }
  0x33   : > { %1162 = vmatprep.subr.bf16.mxu1 %v10766_v42  ;;  %1174 = vmatprep.mubr.bf16.mxu1 %v664_v33  ;;  %v10809_v42 = vld [vmem:[%s15187_s1 + $0x380] ss:$20 sps:$4 sm:$0xff]   ;;  %v10864_v29 = vld [vmem:[%s15187_s1 + $0x1b8] ss:$20 sps:$4 sm:$0xff]   ;;  %vm2613_vm3 = vsmask.f32 6400 }
  0x34   : > { %v10857_v20 = vld [vmem:[%s15187_s1 + $0xd4] ss:$20 sps:$4 sm:$0xff]   ;;  %vm4017_vm7 = vcmask 1040384   ;;  %vm3980_vm8 = vcmask 523264   ;;  %vm4062_vm9 = vcmask 523265   ;;  %vm3991_vm10 = vcmask 517120  }
  0x35   : > { %1112 = vmatpush2.bf16.msra.mxu0 %v10768_v43  ;;  %v12180_v43 = vor.u32 %v668_v35, %v663_v27  ;;  %v10866_v27 = vld [vmem:[%s15187_s1 + $0x1bc] ss:$20 sps:$4 sm:$0xff]   ;;  %v10872_v31 = vld [vmem:[%s15187_s1 + $0x194] ss:$20 sps:$4 sm:$0xff]   ;;  %v10878_v35 = vld [vmem:[%s15187_s1 + $0x16c] ss:$20 sps:$4 sm:$0xff]  }
  0x36   : > { %1163 = vmatpush2.bf16.msra.mxu1 %v10769_v44  ;;  %1113 = vmatprep.subr.bf16.mxu0 %v10770_v45  ;;  %v665_v44 = vshrl.u32 %v541_v15, 16  ;;  %v10810_v45 = vld [vmem:[%s15187_s1 + $0x498] ss:$20 sps:$4 sm:$0xff]   ;;  %vm4073_vm11 = vcmask 518144   ;;  %s10692_s23 = smul.u32 72, %s15198_s14  ;;  %vm7364_vm12 = vcmask 261120  }
  0x37   : > { %1164 = vmatprep.subr.bf16.mxu1 %v10772_v46  ;;  %v10813_v46 = vld [vmem:[%s15187_s1 + $0xcc] ss:$20 sps:$4 sm:$0xff]   ;;  %vm7415_vm13 = vcmask 261121   ;;  %vm7371_vm14 = vcmask 254976   ;;  %vm7422_vm15 = vcmask 256000   ;;  %s10693_s25 = smul.u32 48, %s15198_s14 }
  0x38   : > { %vm8530_vm0 = vcmask 130048  }
  0x39   : > { %1114 = vmatpush2.bf16.msra.mxu0 %v10774_v47  ;;  %v10811_v47 = vld [vmem:[%s15187_s1 + $0xc8] ss:$20 sps:$4 sm:$0xff]   ;;  %s15154_s27 = scalar_lea.vmem %s15195_s9, %s10693_s25  ;;  %s15167_s30 = scalar_lea.vmem %s15196_s10, %s10693_s25 }
  0x3a   : > { %1165 = vmatpush2.bf16.msra.mxu1 %v10775_v48  ;;  %1115 = vmatprep.subr.bf16.mxu0 %v10776_v50  ;;  %v12195_v48 = vor.u32 %v665_v44, %v651_v32  ;;  %v10815_v50 = vld [vmem:[%s15187_s1 + $0x470] ss:$20 sps:$4 sm:$0xff]  }
  0x3b   : > { %1166 = vmatprep.subr.bf16.mxu1 %v10778_v58  ;;  %v10825_v58 = vld [vmem:[%s15187_s1 + $0x420] ss:$20 sps:$4 sm:$0xff]   ;;  %v10875_v32 = vld [vmem:[%s15187_s1 + $0x5c] ss:$20 sps:$4 sm:$0xff]   ;;  %v10890_v44 = vld [vmem:[%s15187_s1 + $0x264] ss:$20 sps:$4 sm:$0xff]  }
  0x3d   : > { %1116 = vmatpush2.bf16.msra.mxu0 %v10780_v61  ;;  %v10828_v61 = vld [vmem:[%s15187_s1 + $0x54] ss:$20 sps:$4 sm:$0xff]  }
  0x3e   : > { %1167 = vmatpush2.bf16.msra.mxu1 %v10781_v62  ;;  %1117 = vmatprep.subr.bf16.mxu0 %v10782_v63  ;;  %v10826_v62 = vld [vmem:[%s15187_s1 + $0x50] ss:$20 sps:$4 sm:$0xff]   ;;  %v10829_v63 = vld [vmem:[%s15187_s1 + $0x2e0] ss:$20 sps:$4 sm:$0xff]  }
  0x3f   : > { %1168 = vmatprep.subr.bf16.mxu1 %v10784_v0  ;;  %v10830_v0 = vld [vmem:[%s15187_s1 + $0x3f8] ss:$20 sps:$4 sm:$0xff]  }
  0x41   : > { %1118 = vmatpush2.bf16.msra.mxu0 %v10786_v1  ;;  %v10833_v1 = vld [vmem:[%s15187_s1 + $0x2c] ss:$20 sps:$4 sm:$0xff]  }
  0x42   : > { %1169 = vmatpush2.bf16.msra.mxu1 %v10787_v3  ;;  %1119 = vmatprep.subr.bf16.mxu0 %v10788_v4  ;;  %v10831_v3 = vld [vmem:[%s15187_s1 + $0x28] ss:$20 sps:$4 sm:$0xff]   ;;  %v10834_v4 = vld [vmem:[%s15187_s1 + $0x2b8] ss:$20 sps:$4 sm:$0xff]  }
  0x43   : > { %1170 = vmatprep.subr.bf16.mxu1 %v10790_v5  ;;  %v10835_v5 = vld [vmem:[%s15187_s1 + $0x3d0] ss:$20 sps:$4 sm:$0xff]  }
  0x45   : > { %1120 = vmatpush2.bf16.msra.mxu0 %v10792_v11  ;;  %v10840_v11 = vld [vmem:[%s15187_s1 + $0x258] ss:$20 sps:$4 sm:$0xff]  }
  0x46   : > { %1171 = vmatpush2.bf16.msra.mxu1 %v10793_v12  ;;  %1121 = vmatprep.subr.bf16.mxu0 %v10794_v16  ;;  %v430_v12 = vld [vmem:[#allocation2 + $0x20] sm:$0xff]  ;;  %v10851_v16 = vld [vmem:[%s15187_s1 + $0xfc] ss:$20 sps:$4 sm:$0xff]  }
  0x47   : > { %1172 = vmatprep.subr.bf16.mxu1 %v10796_v23  ;;  %v12278_v15 = vpack.c.bf16 %v12102_v59, %v430_v12  ;;  %v10860_v23 = vld [vmem:[%s15187_s1 + $0x1e4] ss:$20 sps:$4 sm:$0xff]  }
  0x48   : > { %v10921_v12 = vld [vmem:[%s15187_s1 + $0x178] ss:$20 sps:$4 sm:$0xff]  }
  0x49   : > { %1122 = vmatpush2.bf16.msra.mxu0 %v10798_v25  ;;  %v10858_v25 = vld [vmem:[%s15187_s1 + $0x1e0] ss:$20 sps:$4 sm:$0xff]  }
  0x4a   : > { %1173 = vmatpush2.bf16.msra.mxu1 %v10799_v26  ;;  %10329 = vmatprep.subr.bf16.mxu0 %v10800_v30  ;;  %v10861_v26 = vld [vmem:[%s15187_s1 + $0xa8] ss:$20 sps:$4 sm:$0xff]   ;;  %v10867_v30 = vld [vmem:[%s15187_s1 + $0x80] ss:$20 sps:$4 sm:$0xff]  }
  0x4b   : > { %1657 = vmatprep.subr.bf16.mxu1 %v10803_v34  ;;  %v10873_v34 = vld [vmem:[%s15187_s1 + $0x58] ss:$20 sps:$4 sm:$0xff]  }
  0x4c   : > { %1124 = vmatmul.mubr.bf16.vlgmr.msra.gmra.mxu0 %v12163_v37 }
  0x4d   : > { %1175 = vmatmul.mubr.bf16.vlgmr.msra.gmra.mxu1 %v12163_v37  ;;  %10330 = vmatpush3.bf16.msra.mxu0 %v10804_v38  ;;  %v10879_v38 = vld [vmem:[%s15187_s1 + $0x30] ss:$20 sps:$4 sm:$0xff]  }
  0x4e   : > { %1658 = vmatpush1.bf16.msra.mxu1 %v10801_v36  ;;  %10331 = vmatprep.subr.bf16.mxu0 %v10805_v39  ;;  %v10881_v36 = vld [vmem:[%s15187_s1 + $0x34] ss:$20 sps:$4 sm:$0xff]   ;;  %v10884_v39 = vld [vmem:[%s15187_s1 + $0x144] ss:$20 sps:$4 sm:$0xff]  }
  0x4f   : > { %1659 = vmatprep.subr.bf16.mxu1 %v10808_v40  ;;  %1133 = vmatprep.mubr.bf16.mxu0 %v12180_v43  ;;  %v10887_v40 = vld [vmem:[%s15187_s1 + $0xc] ss:$20 sps:$4 sm:$0xff]  }
  0x50   : > { %1184 = vmatprep.mubr.bf16.mxu1 %v12180_v43 }
  0x51   : > { %10332 = vmatpush3.bf16.msra.mxu0 %v10809_v42  ;;  %v10885_v42 = vld [vmem:[%s15187_s1 + $0x8] ss:$20 sps:$4 sm:$0xff]  }
  0x52   : > { %1660 = vmatpush1.bf16.msra.mxu1 %v10806_v41  ;;  %10333 = vmatprep.subr.bf16.mxu0 %v10810_v45  ;;  %v10882_v41 = vld [vmem:[%s15187_s1 + $0x140] ss:$20 sps:$4 sm:$0xff]   ;;  %v10891_v45 = vld [vmem:[%s15187_s1 + $0x268] ss:$20 sps:$4 sm:$0xff]  }
  0x53   : > { %1661 = vmatprep.subr.bf16.mxu1 %v10813_v46  ;;  %v10888_v46 = vld [vmem:[%s15187_s1 + $0x260] ss:$20 sps:$4 sm:$0xff]  }
  0x54   : > { %1134 = vmatmul.mubr.bf16.gmra.mxu0 %v12195_v48 }
  0x55   : > { %1185 = vmatmul.mubr.bf16.gmra.mxu1 %v12195_v48  ;;  %10334 = vmatpush3.bf16.msra.mxu0 %v10814_v49  ;;  %v10892_v49 = vld [vmem:[%s15187_s1 + $0x128] ss:$20 sps:$4 sm:$0xff]  }
  0x56   : > { %1662 = vmatpush1.bf16.msra.mxu1 %v10811_v47  ;;  %10335 = vmatprep.subr.bf16.mxu0 %v10815_v50  ;;  %v10895_v50 = vld [vmem:[%s15187_s1 + $0x23c] ss:$20 sps:$4 sm:$0xff]  }
  0x57   : > { %1663 = vmatprep.subr.bf16.mxu1 %v10818_v51  ;;  %1225 = vmatprep.mubr.bf16.mxu0 %v664_v33  ;;  %v10870_v33 = vld [vmem:[%s15187_s1 + $0x190] ss:$20 sps:$4 sm:$0xff]   ;;  %v10896_v51 = vld [vmem:[%s15187_s1 + $0x240] ss:$20 sps:$4 sm:$0xff]  }
  0x58   : > { %1689 = vmatprep.mubr.bf16.mxu1 %v12278_v15 }
  0x59   : > { %10336 = vmatpush3.bf16.msra.mxu0 %v10819_v53  ;;  %v10897_v53 = vld [vmem:[%s15187_s1 + $0x100] ss:$20 sps:$4 sm:$0xff]  }
  0x5a   : > { %1664 = vmatpush1.bf16.msra.mxu1 %v10816_v52  ;;  %10337 = vmatprep.subr.bf16.mxu0 %v10820_v54  ;;  %v433_v54 = vld [vmem:[#allocation2 + $0x8] sm:$0x3] }
  0x5b   : > { %1665 = vmatprep.subr.bf16.mxu1 %v10823_v55  ;;  %v10900_v55 = vld [vmem:[%s15187_s1 + $0x214] ss:$20 sps:$4 sm:$0xff]  }
  0x5d   : > { %10338 = vmatpush3.bf16.msra.mxu0 %v10824_v57  ;;  %v12403_v57 = vpack.c.bf16 %v433_v54, %v433_v54  ;;  %v10970_v54 = vld [vmem:[%s15187_s1 + $0x500] ss:$20 sps:$4 sm:$0xff]  }
  0x5e   : > { %1666 = vmatpush1.bf16.msra.mxu1 %v10821_v56  ;;  %10339 = vmatprep.subr.bf16.mxu0 %v10825_v58  ;;  %v10901_v56 = vld [vmem:[%s15187_s1 + $0x218] ss:$20 sps:$4 sm:$0xff]   ;;  %v10898_v58 = vld [vmem:[%s15187_s1 + $0x210] ss:$20 sps:$4 sm:$0xff]  }
  0x5f   : > { %1667 = vmatprep.subr.bf16.mxu1 %v10828_v61  ;;  %v10902_v61 = vld [vmem:[%s15187_s1 + $0xd8] ss:$20 sps:$4 sm:$0xff]  }
  0x61   : > { %10340 = vmatpush3.bf16.msra.mxu0 %v10829_v63  ;;  %v10906_v63 = vld [vmem:[%s15187_s1 + $0x1f0] ss:$20 sps:$4 sm:$0xff]  }
  0x62   : > { %1668 = vmatpush1.bf16.msra.mxu1 %v10826_v62  ;;  %10341 = vmatprep.subr.bf16.mxu0 %v10830_v0  ;;  %v10905_v62 = vld [vmem:[%s15187_s1 + $0x1ec] ss:$20 sps:$4 sm:$0xff]   ;;  %v10903_v0 = vld [vmem:[%s15187_s1 + $0x1e8] ss:$20 sps:$4 sm:$0xff]  }
  0x63   : > { %1669 = vmatprep.subr.bf16.mxu1 %v10833_v1  ;;  %v10907_v1 = vld [vmem:[%s15187_s1 + $0xb0] ss:$20 sps:$4 sm:$0xff]  }
  0x65   : > { %10342 = vmatpush3.bf16.msra.mxu0 %v10834_v4  ;;  %v10911_v4 = vld [vmem:[%s15187_s1 + $0x1c8] ss:$20 sps:$4 sm:$0xff]  }
  0x66   : > { %1670 = vmatpush1.bf16.msra.mxu1 %v10831_v3  ;;  %10343 = vmatprep.subr.bf16.mxu0 %v10835_v5  ;;  %v10910_v3 = vld [vmem:[%s15187_s1 + $0x1c4] ss:$20 sps:$4 sm:$0xff]   ;;  %v10908_v5 = vld [vmem:[%s15187_s1 + $0x1c0] ss:$20 sps:$4 sm:$0xff]  }
  0x67   : > { %1671 = vmatprep.subr.bf16.mxu1 %v10838_v6  ;;  %v10912_v6 = vld [vmem:[%s15187_s1 + $0x88] ss:$20 sps:$4 sm:$0xff]  }
  0x69   : > { %10344 = vmatpush3.bf16.msra.mxu0 %v10839_v8  ;;  %v10916_v8 = vld [vmem:[%s15187_s1 + $0x1a0] ss:$20 sps:$4 sm:$0xff]  }
  0x6a   : > { %1672 = vmatpush1.bf16.msra.mxu1 %v10836_v7  ;;  %1708 = vmatprep.subr.bf16.mxu0 %v10845_v10  ;;  %v10915_v7 = vld [vmem:[%s15187_s1 + $0x19c] ss:$20 sps:$4 sm:$0xff]   ;;  %v10917_v10 = vld [vmem:[%s15187_s1 + $0x60] ss:$20 sps:$4 sm:$0xff]  }
  0x6b   : > { %1673 = vmatprep.subr.bf16.mxu1 %v10842_v9  ;;  %v10913_v9 = vld [vmem:[%s15187_s1 + $0x198] ss:$20 sps:$4 sm:$0xff]  }
  0x6c   : > { %1226 = vmatmul.mubr.bf16.vlgmr.msra.gmra.mxu0 %v12163_v37  ;;  %v10876_v37 = vld [vmem:[%s15187_s1 + $0x168] ss:$20 sps:$4 sm:$0xff]  }
  0x6d   : > { %1709 = vmatpush1.bf16.msra.mxu0 %v10843_v13  ;;  %1233 = vmatprep.mubr.bf16.mxu0 %v12180_v43  ;;  %v429_v43 = vld [vmem:[#allocation2 + $0x18] sm:$0xff]  ;;  %v10918_v13 = vld [vmem:[%s15187_s1 + $0x170] ss:$20 sps:$4 sm:$0xff]  }
  0x6e   : > { %1674 = vmatpush2.bf16.msra.mxu1 %v10840_v11  ;;  %1710 = vmatprep.subr.bf16.mxu0 %v10851_v16  ;;  %v12376_v47 = vpack.c.bf16 %v12104_v60, %v429_v43  ;;  %v10893_v60 = vld [vmem:[%s15187_s1 + $0x238] ss:$20 sps:$4 sm:$0xff]   ;;  %v10920_v11 = vld [vmem:[%s15187_s1 + $0x174] ss:$20 sps:$4 sm:$0xff]   ;;  %v10926_v16 = vld [vmem:[%s15187_s1 + $0x150] ss:$20 sps:$4 sm:$0xff]  }
  0x6f   : > { %1675 = vmatprep.subr.bf16.mxu1 %v10848_v14  ;;  %v10922_v14 = vld [vmem:[%s15187_s1 + $0x38] ss:$20 sps:$4 sm:$0xff]  }
  0x70   : > { %v10952_v43 = vld [vmem:[%s15187_s1 + $0x578] ss:$20 sps:$4 sm:$0xff]  }
  0x71   : > { %1711 = vmatpush1.bf16.msra.mxu0 %v10849_v18  ;;  %v10927_v18 = vld [vmem:[%s15187_s1 + $0x10] ss:$20 sps:$4 sm:$0xff]  }
  0x72   : > { %1676 = vmatpush2.bf16.msra.mxu1 %v10846_v17  ;;  %1712 = vmatprep.subr.bf16.mxu0 %v10857_v20  ;;  %v10923_v17 = vld [vmem:[%s15187_s1 + $0x148] ss:$20 sps:$4 sm:$0xff]   ;;  %v10933_v20 = vld [vmem:[%s15187_s1 + $0x624] ss:$20 sps:$4 sm:$0xff]  }
  0x73   : > { %1677 = vmatprep.subr.bf16.mxu1 %v10854_v19  ;;  %v10930_v19 = vld [vmem:[%s15187_s1 + $0x61c] ss:$20 sps:$4 sm:$0xff]  }
  0x74   : > { %1234 = vmatmul.mubr.bf16.gmra.mxu0 %v12195_v48  ;;  %v434_v48 = vld [vmem:[#allocation2] sm:$0x3] }
  0x75   : > { %1713 = vmatpush1.bf16.msra.mxu0 %v10855_v22  ;;  %1740 = vmatprep.mubr.bf16.mxu0 %v12278_v15  ;;  %v12390_v52 = vpack.c.bf16 %v434_v48, %v434_v48  ;;  %v10931_v22 = vld [vmem:[%s15187_s1 + $0x620] ss:$20 sps:$4 sm:$0xff]   ;;  %v10961_v48 = vld [vmem:[%s15187_s1 + $0x558] ss:$20 sps:$4 sm:$0xff]  }
  0x76   : > { %1678 = vmatpush2.bf16.msra.mxu1 %v10852_v21  ;;  %1714 = vmatprep.subr.bf16.mxu0 %v10863_v24  ;;  %v10928_v21 = vld [vmem:[%s15187_s1 + $0x618] ss:$20 sps:$4 sm:$0xff]   ;;  %v10939_v24 = vld [vmem:[%s15187_s1 + $0x5fc] ss:$20 sps:$4 sm:$0xff]  }
  0x77   : > { %1679 = vmatprep.subr.bf16.mxu1 %v10860_v23  ;;  %v10936_v23 = vld [vmem:[%s15187_s1 + $0x5f4] ss:$20 sps:$4 sm:$0xff]  }
  0x79   : > { %1715 = vmatpush1.bf16.msra.mxu0 %v10861_v26  ;;  %v10937_v26 = vld [vmem:[%s15187_s1 + $0x5f8] ss:$20 sps:$4 sm:$0xff]  }
  0x7a   : > { %1680 = vmatpush2.bf16.msra.mxu1 %v10858_v25  ;;  %1716 = vmatprep.subr.bf16.mxu0 %v10869_v28  ;;  %v10934_v25 = vld [vmem:[%s15187_s1 + $0x5f0] ss:$20 sps:$4 sm:$0xff]   ;;  %v10945_v28 = vld [vmem:[%s15187_s1 + $0x5d4] ss:$20 sps:$4 sm:$0xff]  }
  0x7b   : > { %1681 = vmatprep.subr.bf16.mxu1 %v10866_v27  ;;  %v10942_v27 = vld [vmem:[%s15187_s1 + $0x5cc] ss:$20 sps:$4 sm:$0xff]  }
  0x7d   : > { %1717 = vmatpush1.bf16.msra.mxu0 %v10867_v30  ;;  %v1810_v30 = vld [vmem:[#allocation2] sm:$0xf] }
  0x7e   : > { %1682 = vmatpush2.bf16.msra.mxu1 %v10864_v29  ;;  %1718 = vmatprep.subr.bf16.mxu0 %v10875_v32  ;;  %v1808_v29 = vld [vmem:[#allocation2 + $0x20] sm:$0xfc]  ;;  %v10940_v32 = vld [vmem:[%s15187_s1 + $0x5c8] ss:$20 sps:$4 sm:$0xff]  }
  0x7f   : > { %1683 = vmatprep.subr.bf16.mxu1 %v10872_v31  ;;  %v1812_v31 = vpack.c.bf16 %v12102_v59, %v1808_v29  ;;  %v10951_v59 = vld [vmem:[%s15187_s1 + $0x5ac] ss:$20 sps:$4 sm:$0xff]  }
  0x80   : > { %v2511_v29 = vld [vmem:[#allocation2] sm:$0x1f] }
  0x81   : > { %1719 = vmatpush1.bf16.msra.mxu0 %v10873_v34  ;;  %v10943_v34 = vld [vmem:[%s15187_s1 + $0x5d0] ss:$20 sps:$4 sm:$0xff]  }
  0x82   : > { %1684 = vmatpush2.bf16.msra.mxu1 %v10870_v33  ;;  %1720 = vmatprep.subr.bf16.mxu0 %v10881_v36  ;;  %v1814_v33 = vpack.c.bf16 %v1810_v30, %v1810_v30  ;;  %v10948_v36 = vld [vmem:[%s15187_s1 + $0x5a4] ss:$20 sps:$4 sm:$0xff]  }
  0x83   : > { %1685 = vmatprep.subr.bf16.mxu1 %v10878_v35  ;;  %v1920_v35 = vrot.slane %v1812_v31, 1  ;;  %v11020_v30 = vld [vmem:[%s15187_s1 + $0x644] ss:$20 sps:$4 sm:$0xff]   ;;  %v11023_v31 = vld [vmem:[%s15187_s1 + $0x64c] ss:$20 sps:$4 sm:$0xff]  }
  0x85   : > { %1721 = vmatpush1.bf16.msra.mxu0 %v10879_v38  ;;  %v10946_v38 = vld [vmem:[%s15187_s1 + $0x5a0] ss:$20 sps:$4 sm:$0xff]  }
  0x86   : > { %1686 = vmatpush2.bf16.msra.mxu1 %v10876_v37  ;;  %1722 = vmatprep.subr.bf16.mxu0 %v10887_v40  ;;  %v12520_v37 = vrot.slane %v1814_v33, 1  ;;  %v10949_v40 = vld [vmem:[%s15187_s1 + $0x5a8] ss:$20 sps:$4 sm:$0xff]  }
  0x87   : > { %1687 = vmatprep.subr.bf16.mxu1 %v10884_v39 }
  0x88   : > { %v12529_v39 = vsel %vm1916_vm2, %v1920_v35, %v12520_v37  ;;  %v11018_v35 = vld [vmem:[%s15187_s1 + $0x640] ss:$20 sps:$4 sm:$0xff]  }
  0x89   : > { %1723 = vmatpush1.bf16.msra.mxu0 %v10885_v42  ;;  %v10957_v42 = vld [vmem:[%s15187_s1 + $0x584] ss:$20 sps:$4 sm:$0xff]  }
  0x8a   : > { %1688 = vmatpush2.bf16.msra.mxu1 %v10882_v41  ;;  %1724 = vmatprep.subr.bf16.mxu0 %v10890_v44  ;;  %v10954_v41 = vld [vmem:[%s15187_s1 + $0x57c] ss:$20 sps:$4 sm:$0xff]   ;;  %v10955_v44 = vld [vmem:[%s15187_s1 + $0x580] ss:$20 sps:$4 sm:$0xff]  }
  0x8b   : > { %10357 = vmatprep.subr.bf16.mxu1 %v10891_v45  ;;  %v10960_v45 = vld [vmem:[%s15187_s1 + $0x554] ss:$20 sps:$4 sm:$0xff]  }
  0x8d   : > { %1690 = vmatmul.mubr.bf16.vlgmr.msra.gmra.mxu1 %v12376_v47  ;;  %1725 = vmatpush2.bf16.msra.mxu0 %v10888_v46  ;;  %v10963_v46 = vld [vmem:[%s15187_s1 + $0x55c] ss:$20 sps:$4 sm:$0xff]  }
  0x8e   : > { %10358 = vmatpush3.bf16.msra.mxu1 %v10892_v49  ;;  %1726 = vmatprep.subr.bf16.mxu0 %v10895_v50  ;;  %v10966_v49 = vld [vmem:[%s15187_s1 + $0x52c] ss:$20 sps:$4 sm:$0xff]   ;;  %v10969_v50 = vld [vmem:[%s15187_s1 + $0x534] ss:$20 sps:$4 sm:$0xff]  }
  0x8f   : > { %10359 = vmatprep.subr.bf16.mxu1 %v10896_v51  ;;  %1699 = vmatprep.mubr.bf16.mxu1 %v12390_v52  ;;  %v10964_v51 = vld [vmem:[%s15187_s1 + $0x528] ss:$20 sps:$4 sm:$0xff]  }
  0x91   : > { %1727 = vmatpush2.bf16.msra.mxu0 %v10893_v60  ;;  %v10967_v60 = vld [vmem:[%s15187_s1 + $0x530] ss:$20 sps:$4 sm:$0xff]  }
  0x92   : > { %10360 = vmatpush3.bf16.msra.mxu1 %v10897_v53  ;;  %1728 = vmatprep.subr.bf16.mxu0 %v10900_v55  ;;  %v10975_v53 = vld [vmem:[%s15187_s1 + $0x50c] ss:$20 sps:$4 sm:$0xff]   ;;  %v10973_v55 = vld [vmem:[%s15187_s1 + $0x508] ss:$20 sps:$4 sm:$0xff]  }
  0x93   : > { %10361 = vmatprep.subr.bf16.mxu1 %v10901_v56  ;;  %v10978_v56 = vld [vmem:[%s15187_s1 + $0x75c] ss:$20 sps:$4 sm:$0xff]  }
  0x95   : > { %1700 = vmatmul.mubr.bf16.gmra.mxu1 %v12403_v57  ;;  %1729 = vmatpush2.bf16.msra.mxu0 %v10898_v58  ;;  %v10976_v58 = vld [vmem:[%s15187_s1 + $0x758] ss:$20 sps:$4 sm:$0xff]  }
  0x96   : > { %10362 = vmatpush3.bf16.msra.mxu1 %v10902_v61  ;;  %1730 = vmatprep.subr.bf16.mxu0 %v10905_v62  ;;  %v10979_v61 = vld [vmem:[%s15187_s1 + $0x760] ss:$20 sps:$4 sm:$0xff]  }
  0x97   : > { %10363 = vmatprep.subr.bf16.mxu1 %v10906_v63  ;;  %1791 = vmatprep.mubr.bf16.mxu1 %v12278_v15  ;;  %v10925_v15 = vld [vmem:[%s15187_s1 + $0x14c] ss:$20 sps:$4 sm:$0xff]   ;;  %v10984_v62 = vld [vmem:[%s15187_s1 + $0x734] ss:$20 sps:$4 sm:$0xff]   ;;  %v10987_v63 = vld [vmem:[%s15187_s1 + $0x73c] ss:$20 sps:$4 sm:$0xff]  }
  0x99   : > { %1731 = vmatpush2.bf16.msra.mxu0 %v10903_v0  ;;  %v10982_v0 = vld [vmem:[%s15187_s1 + $0x730] ss:$20 sps:$4 sm:$0xff]  }
  0x9a   : > { %10364 = vmatpush3.bf16.msra.mxu1 %v10907_v1  ;;  %1732 = vmatprep.subr.bf16.mxu0 %v10910_v3  ;;  %v10985_v1 = vld [vmem:[%s15187_s1 + $0x738] ss:$20 sps:$4 sm:$0xff]  }
  0x9b   : > { %10365 = vmatprep.subr.bf16.mxu1 %v10911_v4  ;;  %v10990_v3 = vld [vmem:[%s15187_s1 + $0x70c] ss:$20 sps:$4 sm:$0xff]   ;;  %v10993_v4 = vld [vmem:[%s15187_s1 + $0x714] ss:$20 sps:$4 sm:$0xff]  }
  0x9d   : > { %1733 = vmatpush2.bf16.msra.mxu0 %v10908_v5  ;;  %v10988_v5 = vld [vmem:[%s15187_s1 + $0x708] ss:$20 sps:$4 sm:$0xff]  }
  0x9e   : > { %10366 = vmatpush3.bf16.msra.mxu1 %v10912_v6  ;;  %1734 = vmatprep.subr.bf16.mxu0 %v10915_v7  ;;  %v10991_v6 = vld [vmem:[%s15187_s1 + $0x710] ss:$20 sps:$4 sm:$0xff]  }
  0x9f   : > { %10367 = vmatprep.subr.bf16.mxu1 %v10916_v8  ;;  %v10996_v7 = vld [vmem:[%s15187_s1 + $0x6e4] ss:$20 sps:$4 sm:$0xff]   ;;  %v10999_v8 = vld [vmem:[%s15187_s1 + $0x6ec] ss:$20 sps:$4 sm:$0xff]  }
  0xa1   : > { %1735 = vmatpush2.bf16.msra.mxu0 %v10913_v9  ;;  %v10994_v9 = vld [vmem:[%s15187_s1 + $0x6e0] ss:$20 sps:$4 sm:$0xff]  }
  0xa2   : > { %10368 = vmatpush3.bf16.msra.mxu1 %v10917_v10  ;;  %1736 = vmatprep.subr.bf16.mxu0 %v10920_v11  ;;  %v10997_v10 = vld [vmem:[%s15187_s1 + $0x6e8] ss:$20 sps:$4 sm:$0xff]  }
  0xa3   : > { %10369 = vmatprep.subr.bf16.mxu1 %v10921_v12  ;;  %v11002_v11 = vld [vmem:[%s15187_s1 + $0x6bc] ss:$20 sps:$4 sm:$0xff]   ;;  %v11005_v12 = vld [vmem:[%s15187_s1 + $0x6c4] ss:$20 sps:$4 sm:$0xff]  }
  0xa5   : > { %1737 = vmatpush2.bf16.msra.mxu0 %v10918_v13  ;;  %v11000_v13 = vld [vmem:[%s15187_s1 + $0x6b8] ss:$20 sps:$4 sm:$0xff]  }
  0xa6   : > { %10370 = vmatpush3.bf16.msra.mxu1 %v10922_v14  ;;  %1738 = vmatprep.subr.bf16.mxu0 %v10925_v15  ;;  %v11003_v14 = vld [vmem:[%s15187_s1 + $0x6c0] ss:$20 sps:$4 sm:$0xff]  }
  0xa7   : > { %10371 = vmatprep.subr.bf16.mxu1 %v10926_v16  ;;  %v11008_v15 = vld [vmem:[%s15187_s1 + $0x694] ss:$20 sps:$4 sm:$0xff]   ;;  %v11011_v16 = vld [vmem:[%s15187_s1 + $0x69c] ss:$20 sps:$4 sm:$0xff]  }
  0xa9   : > { %1739 = vmatpush2.bf16.msra.mxu0 %v10923_v17  ;;  %v11006_v17 = vld [vmem:[%s15187_s1 + $0x690] ss:$20 sps:$4 sm:$0xff]  }
  0xaa   : > { %10372 = vmatpush3.bf16.msra.mxu1 %v10927_v18  ;;  %2343 = vmatprep.subr.bf16.mxu0 %v10930_v19  ;;  %v11009_v18 = vld [vmem:[%s15187_s1 + $0x698] ss:$20 sps:$4 sm:$0xff]  }
  0xab   : > { %2394 = vmatprep.subr.bf16.mxu1 %v10933_v20  ;;  %v11014_v19 = vld [vmem:[%s15187_s1 + $0x66c] ss:$20 sps:$4 sm:$0xff]   ;;  %v11017_v20 = vld [vmem:[%s15187_s1 + $0x674] ss:$20 sps:$4 sm:$0xff]  }
  0xac   : > { %1741 = vmatmul.mubr.bf16.vlgmr.msra.gmra.mxu0 %v12376_v47 }
  0xad   : > { %1792 = vmatmul.mubr.bf16.vlgmr.msra.gmra.mxu1 %v12376_v47  ;;  %2344 = vmatpush1.bf16.msra.mxu0 %v10928_v21  ;;  %v10958_v47 = vld [vmem:[%s15187_s1 + $0x550] ss:$20 sps:$4 sm:$0xff]   ;;  %v1807_v21 = vld [vmem:[#allocation2 + $0x18] sm:$0xfc] }
  0xae   : > { %2395 = vmatpush1.bf16.msra.mxu1 %v10931_v22  ;;  %2345 = vmatprep.subr.bf16.mxu0 %v10936_v23  ;;  %v1809_v22 = vld [vmem:[#allocation2 + $0x8] sm:$0xf] }
  0xaf   : > { %2396 = vmatprep.subr.bf16.mxu1 %v10939_v24  ;;  %1750 = vmatprep.mubr.bf16.mxu0 %v12390_v52  ;;  %v11012_v23 = vld [vmem:[%s15187_s1 + $0x668] ss:$20 sps:$4 sm:$0xff]   ;;  %v2509_v24 = vld [vmem:[#allocation2 + $0x20] sm:$0xf8] }
  0xb0   : > { %1799 = vmatprep.mubr.bf16.mxu1 %v12390_v52  ;;  %v10972_v52 = vld [vmem:[%s15187_s1 + $0x504] ss:$20 sps:$4 sm:$0xff]  }
  0xb1   : > { %2346 = vmatpush1.bf16.msra.mxu0 %v10934_v25  ;;  %v11015_v25 = vld [vmem:[%s15187_s1 + $0x670] ss:$20 sps:$4 sm:$0xff]  }
  0xb2   : > { %2397 = vmatpush1.bf16.msra.mxu1 %v10937_v26  ;;  %2347 = vmatprep.subr.bf16.mxu0 %v10942_v27  ;;  %v12668_v26 = vld [vmem:[#allocation2 + $0x28] sm:$0xff] }
  0xb3   : > { %2398 = vmatprep.subr.bf16.mxu1 %v10945_v28  ;;  %v1811_v27 = vpack.c.bf16 %v12668_v26, %v1807_v21  ;;  %v1813_v28 = vpack.c.bf16 %v1809_v22, %v1809_v22  ;;  %v11066_v21 = vld [vmem:[%s15187_s1 + $0x9dc] ss:$20 sps:$4 sm:$0xff]   ;;  %v11069_v22 = vld [vmem:[%s15187_s1 + $0x8a4] ss:$20 sps:$4 sm:$0xff]  }
  0xb4   : > { %1751 = vmatmul.mubr.bf16.gmra.mxu0 %v12403_v57 }
  0xb5   : > { %1800 = vmatmul.mubr.bf16.gmra.mxu1 %v12403_v57  ;;  %2348 = vmatpush1.bf16.msra.mxu0 %v10940_v32  ;;  %v10981_v57 = vld [vmem:[%s15187_s1 + $0x764] ss:$20 sps:$4 sm:$0xff]   ;;  %v12677_v32 = vld [vmem:[#allocation2 + $0x10] sm:$0xff] }
  0xb6   : > { %2399 = vmatpush1.bf16.msra.mxu1 %v10943_v34  ;;  %2349 = vmatprep.subr.bf16.mxu0 %v10948_v36  ;;  %v2513_v33 = vpack.c.bf16 %v12677_v32, %v2509_v24  ;;  %v2515_v34 = vpack.c.bf16 %v2511_v29, %v2511_v29  ;;  %v11021_v36 = vld [vmem:[%s15187_s1 + $0x648] ss:$20 sps:$4 sm:$0xff]   ;;  %v11067_v24 = vld [vmem:[%s15187_s1 + $0x8a0] ss:$20 sps:$4 sm:$0xff]  }
  0xb7   : > { %2400 = vmatprep.subr.bf16.mxu1 %v10951_v59  ;;  %2375 = vmatprep.mubr.bf16.mxu0 %v12529_v39  ;;  %v1917_v59 = vrot.slane %v1811_v27, 1  ;;  %v11075_v27 = vld [vmem:[%s15187_s1 + $0x87c] ss:$20 sps:$4 sm:$0xff]  }
  0xb8   : > { %2426 = vmatprep.mubr.bf16.mxu1 %v12529_v39 }
  0xb9   : > { %2350 = vmatpush1.bf16.msra.mxu0 %v10946_v38  ;;  %v12686_v38 = vrot.slane %v1813_v28, 1 }
  0xba   : > { %2401 = vmatpush1.bf16.msra.mxu1 %v10949_v40  ;;  %2351 = vmatprep.subr.bf16.mxu0 %v10954_v41  ;;  %v11024_v40 = vld [vmem:[%s15187_s1 + $0x768] ss:$20 sps:$4 sm:$0xff]  }
  0xbb   : > { %2402 = vmatprep.subr.bf16.mxu1 %v10957_v42  ;;  %v11027_v41 = vld [vmem:[%s15187_s1 + $0x89c] ss:$20 sps:$4 sm:$0xff]   ;;  %v11025_v42 = vld [vmem:[%s15187_s1 + $0x898] ss:$20 sps:$4 sm:$0xff]  }
  0xbd   : > { %2352 = vmatpush1.bf16.msra.mxu0 %v10952_v43  ;;  %v2632_v43 = vshrl.u32 %v2513_v33, 16 }
  0xbe   : > { %2403 = vmatpush1.bf16.msra.mxu1 %v10955_v44  ;;  %2353 = vmatprep.subr.bf16.mxu0 %v10960_v45  ;;  %v2635_v44 = vshll.u32 %v2513_v33, 16  ;;  %v11028_v45 = vld [vmem:[%s15187_s1 + $0x628] ss:$20 sps:$4 sm:$0xff]  }
  0xbf   : > { %2404 = vmatprep.subr.bf16.mxu1 %v10963_v46  ;;  %v2640_v46 = vshrl.u32 %v2515_v34, 16 }
  0xc1   : > { %2354 = vmatpush1.bf16.msra.mxu0 %v10958_v47  ;;  %v2643_v47 = vshll.u32 %v2515_v34, 16  ;;  %v11078_v34 = vld [vmem:[%s15187_s1 + $0x98c] ss:$20 sps:$4 sm:$0xff]  }
  0xc2   : > { %2405 = vmatpush1.bf16.msra.mxu1 %v10961_v48  ;;  %2355 = vmatprep.subr.bf16.mxu0 %v10966_v49  ;;  %v12702_v48 = vsel %vm1916_vm2, %v1917_v59, %v12686_v38  ;;  %v11029_v49 = vld [vmem:[%s15187_s1 + $0x740] ss:$20 sps:$4 sm:$0xff]  }
  0xc3   : > { %2406 = vmatprep.subr.bf16.mxu1 %v10969_v50  ;;  %v11032_v50 = vld [vmem:[%s15187_s1 + $0x874] ss:$20 sps:$4 sm:$0xff]  }
  0xc5   : > { %2356 = vmatpush1.bf16.msra.mxu0 %v10964_v51  ;;  %v11030_v51 = vld [vmem:[%s15187_s1 + $0x870] ss:$20 sps:$4 sm:$0xff]  }
  0xc6   : > { %2407 = vmatpush1.bf16.msra.mxu1 %v10967_v60  ;;  %2357 = vmatprep.subr.bf16.mxu0 %v10972_v52  ;;  %v11033_v60 = vld [vmem:[%s15187_s1 + $0x600] ss:$20 sps:$4 sm:$0xff]   ;;  %v2634_v52 = vrot.slane %v2632_v43, 1 }
  0xc7   : > { %2408 = vmatprep.subr.bf16.mxu1 %v10975_v53  ;;  %v2637_v53 = vrot.slane %v2635_v44, 2  ;;  %v11087_v44 = vld [vmem:[%s15187_s1 + $0x82c] ss:$20 sps:$4 sm:$0xff]  }
  0xc9   : > { %2358 = vmatpush1.bf16.msra.mxu0 %v10970_v54  ;;  %v2642_v54 = vrot.slane %v2640_v46, 1  ;;  %v11082_v46 = vld [vmem:[%s15187_s1 + $0x960] ss:$20 sps:$4 sm:$0xff]  }
  0xca   : > { %2409 = vmatpush1.bf16.msra.mxu1 %v10973_v55  ;;  %2359 = vmatprep.subr.bf16.mxu0 %v10978_v56  ;;  %v2645_v55 = vrot.slane %v2643_v47, 2  ;;  %v11034_v56 = vld [vmem:[%s15187_s1 + $0x718] ss:$20 sps:$4 sm:$0xff]   ;;  %v11085_v47 = vld [vmem:[%s15187_s1 + $0x828] ss:$20 sps:$4 sm:$0xff]  }
  0xcb   : > { %2410 = vmatprep.subr.bf16.mxu1 %v10981_v57  ;;  %v11037_v57 = vld [vmem:[%s15187_s1 + $0x84c] ss:$20 sps:$4 sm:$0xff]  }
  0xcd   : > { %2360 = vmatpush2.bf16.msra.mxu0 %v10976_v58  ;;  %v11035_v58 = vld [vmem:[%s15187_s1 + $0x848] ss:$20 sps:$4 sm:$0xff]  }
  0xce   : > { %2411 = vmatpush2.bf16.msra.mxu1 %v10979_v61  ;;  %2361 = vmatprep.subr.bf16.mxu0 %v10984_v62  ;;  %v2638_v61 = vor.u32 %v2637_v53, %v2634_v52  ;;  %v12729_v62 = vor.u32 %v2645_v55, %v2642_v54  ;;  %v2510_v52 = vld [vmem:[#allocation2 + $0x8] sm:$0x1f] }
  0xcf   : > { %2412 = vmatprep.subr.bf16.mxu1 %v10987_v63  ;;  %v11038_v63 = vld [vmem:[%s15187_s1 + $0x5d8] ss:$20 sps:$4 sm:$0xff]  }
  0xd1   : > { %2362 = vmatpush2.bf16.msra.mxu0 %v10982_v0  ;;  %v11039_v0 = vld [vmem:[%s15187_s1 + $0x6f0] ss:$20 sps:$4 sm:$0xff]  }
  0xd2   : > { %2413 = vmatpush2.bf16.msra.mxu1 %v10985_v1  ;;  %2363 = vmatprep.subr.bf16.mxu0 %v10990_v3  ;;  %v11042_v1 = vld [vmem:[%s15187_s1 + $0x824] ss:$20 sps:$4 sm:$0xff]   ;;  %v11040_v3 = vld [vmem:[%s15187_s1 + $0x820] ss:$20 sps:$4 sm:$0xff]  }
  0xd3   : > { %2414 = vmatprep.subr.bf16.mxu1 %v10993_v4  ;;  %v11043_v4 = vld [vmem:[%s15187_s1 + $0x5b0] ss:$20 sps:$4 sm:$0xff]  }
  0xd5   : > { %2364 = vmatpush2.bf16.msra.mxu0 %v10988_v5  ;;  %v12750_v5 = vsel %vm2613_vm3, %v2638_v61, %v12729_v62  ;;  %v2514_v61 = vpack.c.bf16 %v2510_v52, %v2510_v52  ;;  %v11129_v52 = vld [vmem:[%s15187_s1 + $0x96c] ss:$20 sps:$4 sm:$0xff]  }
  0xd6   : > { %2415 = vmatpush2.bf16.msra.mxu1 %v10991_v6  ;;  %2365 = vmatprep.subr.bf16.mxu0 %v10996_v7  ;;  %v11044_v6 = vld [vmem:[%s15187_s1 + $0x6c8] ss:$20 sps:$4 sm:$0xff]  }
  0xd7   : > { %2416 = vmatprep.subr.bf16.mxu1 %v10999_v8  ;;  %v11047_v7 = vld [vmem:[%s15187_s1 + $0x7fc] ss:$20 sps:$4 sm:$0xff]   ;;  %v11045_v8 = vld [vmem:[%s15187_s1 + $0x7f8] ss:$20 sps:$4 sm:$0xff]  }
  0xd9   : > { %2366 = vmatpush2.bf16.msra.mxu0 %v10994_v9  ;;  %v11048_v9 = vld [vmem:[%s15187_s1 + $0x588] ss:$20 sps:$4 sm:$0xff]  }
  0xda   : > { %2417 = vmatpush2.bf16.msra.mxu1 %v10997_v10  ;;  %2367 = vmatprep.subr.bf16.mxu0 %v11002_v11  ;;  %v11049_v10 = vld [vmem:[%s15187_s1 + $0x6a0] ss:$20 sps:$4 sm:$0xff]   ;;  %v11050_v11 = vld [vmem:[%s15187_s1 + $0x7d0] ss:$20 sps:$4 sm:$0xff]  }
  0xdb   : > { %2418 = vmatprep.subr.bf16.mxu1 %v11005_v12  ;;  %v11053_v12 = vld [vmem:[%s15187_s1 + $0x560] ss:$20 sps:$4 sm:$0xff]  }
  0xdd   : > { %2368 = vmatpush2.bf16.msra.mxu0 %v11000_v13  ;;  %v11054_v13 = vld [vmem:[%s15187_s1 + $0x678] ss:$20 sps:$4 sm:$0xff]  }
  0xde   : > { %2419 = vmatpush2.bf16.msra.mxu1 %v11003_v14  ;;  %2369 = vmatprep.subr.bf16.mxu0 %v11008_v15  ;;  %v11057_v14 = vld [vmem:[%s15187_s1 + $0x7ac] ss:$20 sps:$4 sm:$0xff]   ;;  %v11055_v15 = vld [vmem:[%s15187_s1 + $0x7a8] ss:$20 sps:$4 sm:$0xff]  }
  0xdf   : > { %2420 = vmatprep.subr.bf16.mxu1 %v11011_v16  ;;  %v11058_v16 = vld [vmem:[%s15187_s1 + $0x538] ss:$20 sps:$4 sm:$0xff]  }
  0xe1   : > { %2370 = vmatpush2.bf16.msra.mxu0 %v11006_v17  ;;  %v11059_v17 = vld [vmem:[%s15187_s1 + $0x650] ss:$20 sps:$4 sm:$0xff]  }
  0xe2   : > { %2421 = vmatpush2.bf16.msra.mxu1 %v11009_v18  ;;  %2371 = vmatprep.subr.bf16.mxu0 %v11014_v19  ;;  %v11062_v18 = vld [vmem:[%s15187_s1 + $0x784] ss:$20 sps:$4 sm:$0xff]   ;;  %v11060_v19 = vld [vmem:[%s15187_s1 + $0x780] ss:$20 sps:$4 sm:$0xff]  }
  0xe3   : > { %2422 = vmatprep.subr.bf16.mxu1 %v11017_v20  ;;  %v11063_v20 = vld [vmem:[%s15187_s1 + $0x510] ss:$20 sps:$4 sm:$0xff]  }
  0xe5   : > { %2372 = vmatpush2.bf16.msra.mxu0 %v11012_v23  ;;  %v11064_v23 = vld [vmem:[%s15187_s1 + $0x9d8] ss:$20 sps:$4 sm:$0xff]  }
  0xe6   : > { %2423 = vmatpush2.bf16.msra.mxu1 %v11015_v25  ;;  %2373 = vmatprep.subr.bf16.mxu0 %v11020_v30  ;;  %v11072_v25 = vld [vmem:[%s15187_s1 + $0x9b4] ss:$20 sps:$4 sm:$0xff]   ;;  %v11070_v30 = vld [vmem:[%s15187_s1 + $0x9b0] ss:$20 sps:$4 sm:$0xff]  }
  0xe7   : > { %2424 = vmatprep.subr.bf16.mxu1 %v11023_v31  ;;  %v11073_v31 = vld [vmem:[%s15187_s1 + $0x878] ss:$20 sps:$4 sm:$0xff]  }
  0xe9   : > { %2374 = vmatpush2.bf16.msra.mxu0 %v11018_v35  ;;  %v11081_v35 = vld [vmem:[%s15187_s1 + $0x854] ss:$20 sps:$4 sm:$0xff]  }
  0xea   : > { %2425 = vmatpush2.bf16.msra.mxu1 %v11021_v36  ;;  %10385 = vmatprep.subr.bf16.mxu0 %v11024_v40 }
  0xeb   : > { %3068 = vmatprep.subr.bf16.mxu1 %v11027_v41  ;;  %v11076_v41 = vld [vmem:[%s15187_s1 + $0x988] ss:$20 sps:$4 sm:$0xff]  }
  0xec   : > { %2376 = vmatmul.mubr.bf16.vlgmr.msra.gmra.mxu0 %v12702_v48 }
  0xed   : > { %2427 = vmatmul.mubr.bf16.vlgmr.msra.gmra.mxu1 %v12702_v48  ;;  %10386 = vmatpush3.bf16.msra.mxu0 %v11028_v45 }
  0xee   : > { %3069 = vmatpush1.bf16.msra.mxu1 %v11025_v42  ;;  %10387 = vmatprep.subr.bf16.mxu0 %v11029_v49  ;;  %v11079_v42 = vld [vmem:[%s15187_s1 + $0x850] ss:$20 sps:$4 sm:$0xff]  }
  0xef   : > { %3070 = vmatprep.subr.bf16.mxu1 %v11032_v50  ;;  %2385 = vmatprep.mubr.bf16.mxu0 %v12520_v37  ;;  %v11090_v50 = vld [vmem:[%s15187_s1 + $0x93c] ss:$20 sps:$4 sm:$0xff]  }
  0xf0   : > { %2436 = vmatprep.mubr.bf16.mxu1 %v12520_v37 }
  0xf1   : > { %10388 = vmatpush3.bf16.msra.mxu0 %v11033_v60  ;;  %v2508_v60 = vld [vmem:[#allocation2 + $0x18] sm:$0xf8] }
  0xf2   : > { %3071 = vmatpush1.bf16.msra.mxu1 %v11030_v51  ;;  %10389 = vmatprep.subr.bf16.mxu0 %v11034_v56  ;;  %v11093_v51 = vld [vmem:[%s15187_s1 + $0x804] ss:$20 sps:$4 sm:$0xff]  }
  0xf3   : > { %3072 = vmatprep.subr.bf16.mxu1 %v11037_v57  ;;  %v11088_v56 = vld [vmem:[%s15187_s1 + $0x938] ss:$20 sps:$4 sm:$0xff]   ;;  %v11091_v57 = vld [vmem:[%s15187_s1 + $0x800] ss:$20 sps:$4 sm:$0xff]  }
  0xf4   : > { %2386 = vmatmul.mubr.bf16.gmra.mxu0 %v12686_v38 }
  0xf5   : > { %2437 = vmatmul.mubr.bf16.gmra.mxu1 %v12686_v38  ;;  %10390 = vmatpush3.bf16.msra.mxu0 %v11038_v63  ;;  %v11096_v63 = vld [vmem:[%s15187_s1 + $0x914] ss:$20 sps:$4 sm:$0xff]  }
  0xf6   : > { %3073 = vmatpush1.bf16.msra.mxu1 %v11035_v58  ;;  %10391 = vmatprep.subr.bf16.mxu0 %v11039_v0  ;;  %v2512_v58 = vpack.c.bf16 %v12668_v26, %v2508_v60  ;;  %v11099_v0 = vld [vmem:[%s15187_s1 + $0x7dc] ss:$20 sps:$4 sm:$0xff]   ;;  %v11097_v26 = vld [vmem:[%s15187_s1 + $0x7d8] ss:$20 sps:$4 sm:$0xff]  }
  0xf7   : > { %3074 = vmatprep.subr.bf16.mxu1 %v11042_v1  ;;  %2477 = vmatprep.mubr.bf16.mxu0 %v12529_v39  ;;  %v11052_v39 = vld [vmem:[%s15187_s1 + $0x7d4] ss:$20 sps:$4 sm:$0xff]   ;;  %v11126_v60 = vld [vmem:[%s15187_s1 + $0x858] ss:$20 sps:$4 sm:$0xff]  }
  0xf8   : > { %3100 = vmatprep.mubr.bf16.mxu1 %v12750_v5 }
  0xf9   : > { %10392 = vmatpush3.bf16.msra.mxu0 %v11043_v4  ;;  %v11094_v4 = vld [vmem:[%s15187_s1 + $0x910] ss:$20 sps:$4 sm:$0xff]  }
  0xfa   : > { %3075 = vmatpush1.bf16.msra.mxu1 %v11040_v3  ;;  %10393 = vmatprep.subr.bf16.mxu0 %v11044_v6  ;;  %v2615_v6 = vshrl.u32 %v2512_v58, 16 }
  0xfb   : > { %3076 = vmatprep.subr.bf16.mxu1 %v11047_v7  ;;  %v2618_v7 = vshll.u32 %v2512_v58, 16 }
  0xfd   : > { %10394 = vmatpush3.bf16.msra.mxu0 %v11048_v9  ;;  %v2626_v9 = vshll.u32 %v2514_v61, 16 }
  0xfe   : > { %3077 = vmatpush1.bf16.msra.mxu1 %v11045_v8  ;;  %10395 = vmatprep.subr.bf16.mxu0 %v11049_v10  ;;  %v2623_v8 = vshrl.u32 %v2514_v61, 16  ;;  %v11102_v10 = vld [vmem:[%s15187_s1 + $0x8ec] ss:$20 sps:$4 sm:$0xff]   ;;  %v11134_v61 = vld [vmem:[%s15187_s1 + $0x944] ss:$20 sps:$4 sm:$0xff]  }
  0xff   : > { %3078 = vmatprep.subr.bf16.mxu1 %v11052_v39  ;;  %v11105_v39 = vld [vmem:[%s15187_s1 + $0x7b4] ss:$20 sps:$4 sm:$0xff]  }
 0x101   : > { %10396 = vmatpush3.bf16.msra.mxu0 %v11053_v12  ;;  %v11103_v12 = vld [vmem:[%s15187_s1 + $0x7b0] ss:$20 sps:$4 sm:$0xff]  }
 0x102   : > { %3079 = vmatpush1.bf16.msra.mxu1 %v11050_v11  ;;  %10397 = vmatprep.subr.bf16.mxu0 %v11054_v13  ;;  %v11100_v11 = vld [vmem:[%s15187_s1 + $0x8e8] ss:$20 sps:$4 sm:$0xff]   ;;  %v2617_v13 = vrot.slane %v2615_v6, 1 }
 0x103   : > { %3080 = vmatprep.subr.bf16.mxu1 %v11057_v14  ;;  %v2620_v14 = vrot.slane %v2618_v7, 2  ;;  %v11139_v6 = vld [vmem:[%s15187_s1 + $0x91c] ss:$20 sps:$4 sm:$0xff]   ;;  %v11140_v7 = vld [vmem:[%s15187_s1 + $0x920] ss:$20 sps:$4 sm:$0xff]  }
 0x105   : > { %10398 = vmatpush3.bf16.msra.mxu0 %v11058_v16  ;;  %v2628_v16 = vrot.slane %v2626_v9, 2  ;;  %v11141_v9 = vld [vmem:[%s15187_s1 + $0x7e0] ss:$20 sps:$4 sm:$0xff]  }
 0x106   : > { %3081 = vmatpush1.bf16.msra.mxu1 %v11055_v15  ;;  %10399 = vmatprep.subr.bf16.mxu0 %v11059_v17  ;;  %v2625_v15 = vrot.slane %v2623_v8, 1  ;;  %v11108_v17 = vld [vmem:[%s15187_s1 + $0x8c4] ss:$20 sps:$4 sm:$0xff]  }
 0x107   : > { %3082 = vmatprep.subr.bf16.mxu1 %v11062_v18  ;;  %v11111_v18 = vld [vmem:[%s15187_s1 + $0x78c] ss:$20 sps:$4 sm:$0xff]  }
 0x108   : > { %v11137_v8 = vld [vmem:[%s15187_s1 + $0x918] ss:$20 sps:$4 sm:$0xff]  }
 0x109   : > { %10400 = vmatpush3.bf16.msra.mxu0 %v11063_v20  ;;  %v11109_v20 = vld [vmem:[%s15187_s1 + $0x788] ss:$20 sps:$4 sm:$0xff]  }
 0x10a   : > { %3083 = vmatpush1.bf16.msra.mxu1 %v11060_v19  ;;  %3119 = vmatprep.subr.bf16.mxu0 %v11069_v22  ;;  %v11106_v19 = vld [vmem:[%s15187_s1 + $0x8c0] ss:$20 sps:$4 sm:$0xff]   ;;  %v12927_v22 = vor.u32 %v2628_v16, %v2625_v15  ;;  %v11147_v15 = vld [vmem:[%s15187_s1 + $0x8c8] ss:$20 sps:$4 sm:$0xff]   ;;  %v11151_v16 = vld [vmem:[%s15187_s1 + $0x790] ss:$20 sps:$4 sm:$0xff]  }
 0x10b   : > { %3084 = vmatprep.subr.bf16.mxu1 %v11066_v21  ;;  %v2621_v21 = vor.u32 %v2620_v14, %v2617_v13  ;;  %v11149_v13 = vld [vmem:[%s15187_s1 + $0x8cc] ss:$20 sps:$4 sm:$0xff]   ;;  %v11150_v14 = vld [vmem:[%s15187_s1 + $0x8d0] ss:$20 sps:$4 sm:$0xff]  }
 0x10c   : > { %v12820_v28 = vpop.f32.mrf.mxu0  ;;  %2478 = vmatmul.mubr.bf16.vlgmr.msra.gmra.mxu0 %v12702_v48 }
 0x10d   : > { %v12823_v29 = vpop.f32.mrf.mxu1  ;;  %3120 = vmatpush1.bf16.msra.mxu0 %v11067_v24  ;;  %2485 = vmatprep.mubr.bf16.mxu0 %v12520_v37  ;;  %v11084_v37 = vld [vmem:[%s15187_s1 + $0x964] ss:$20 sps:$4 sm:$0xff]   ;;  %v11115_v24 = vld [vmem:[%s15187_s1 + $0x9e8] ss:$20 sps:$4 sm:$0xff]  }
 0x10e   : > { %3085 = vmatpush2.bf16.msra.mxu1 %v11064_v23  ;;  %v12831_v33 = vpop.f32.mrf.mxu0  ;;  %3121 = vmatprep.subr.bf16.mxu0 %v11075_v27  ;;  %v11114_v23 = vld [vmem:[%s15187_s1 + $0x9e4] ss:$20 sps:$4 sm:$0xff]   ;;  %v11112_v27 = vld [vmem:[%s15187_s1 + $0x9e0] ss:$20 sps:$4 sm:$0xff]  }
 0x10f   : > { %3086 = vmatprep.subr.bf16.mxu1 %v11072_v25  ;;  %v12839_v36 = vpop.f32.mrf.mxu1  ;;  %v12937_v25 = vsel %vm2613_vm3, %v2621_v21, %v12927_v22  ;;  %v3234_v21 = vld [vmem:[#allocation2 + $0x20] sm:$0xf0] }
 0x110   : > { %v12842_v59 = vpop.f32.mrf.mxu0 }
 0x111   : > { %v12844_v40 = vpop.f32.mrf.mxu1  ;;  %3122 = vmatpush1.bf16.msra.mxu0 %v11073_v31  ;;  %v11119_v31 = vld [vmem:[%s15187_s1 + $0x9bc] ss:$20 sps:$4 sm:$0xff]  }
 0x112   : > { %3087 = vmatpush2.bf16.msra.mxu1 %v11070_v30  ;;  %v12852_v43 = vpop.f32.mrf.mxu0  ;;  %3123 = vmatprep.subr.bf16.mxu0 %v11081_v35  ;;  %v11116_v30 = vld [vmem:[%s15187_s1 + $0x8a8] ss:$20 sps:$4 sm:$0xff]   ;;  %v11117_v35 = vld [vmem:[%s15187_s1 + $0x9b8] ss:$20 sps:$4 sm:$0xff]  }
 0x113   : > { %3088 = vmatprep.subr.bf16.mxu1 %v11078_v34  ;;  %v12860_v45 = vpop.f32.mrf.mxu1  ;;  %v11120_v34 = vld [vmem:[%s15187_s1 + $0x9c0] ss:$20 sps:$4 sm:$0xff]  }
 0x114   : > { %2486 = vmatmul.mubr.bf16.gmra.mxu0 %v12686_v38  ;;  %v12869_v48 = vpop.f32.mrf.mxu0 }
 0x115   : > { %v12871_v49 = vpop.f32.mrf.mxu1  ;;  %3124 = vmatpush1.bf16.msra.mxu0 %v11079_v42  ;;  %3151 = vmatprep.mubr.bf16.mxu0 %v12750_v5  ;;  %v11121_v42 = vld [vmem:[%s15187_s1 + $0x880] ss:$20 sps:$4 sm:$0xff]  }
 0x116   : > { %3089 = vmatpush2.bf16.msra.mxu1 %v11076_v41  ;;  %3125 = vmatprep.subr.bf16.mxu0 %v11087_v44  ;;  %v12879_v38 = vpop.f32.mrf.mxu0 }
 0x117   : > { %3090 = vmatprep.subr.bf16.mxu1 %v11084_v37  ;;  %v12881_v53 = vpop.f32.mrf.mxu1  ;;  %v11124_v37 = vld [vmem:[%s15187_s1 + $0x994] ss:$20 sps:$4 sm:$0xff]  }
 0x118   : > { %v1139_v54 = vpop.f32.mrf.mxu0 }
 0x119   : > { %v1190_v55 = vpop.f32.mrf.mxu1  ;;  %3126 = vmatpush1.bf16.msra.mxu0 %v11085_v47 }
 0x11a   : > { %3091 = vmatpush2.bf16.msra.mxu1 %v11082_v46  ;;  %3127 = vmatprep.subr.bf16.mxu0 %v11093_v51  ;;  %v1140_v1 = vpop.f32.mrf.mxu0  ;;  %v11125_v46 = vld [vmem:[%s15187_s1 + $0x998] ss:$20 sps:$4 sm:$0xff]   ;;  %v11130_v55 = vld [vmem:[%s15187_s1 + $0x970] ss:$20 sps:$4 sm:$0xff]  }
 0x11b   : > { %3092 = vmatprep.subr.bf16.mxu1 %v11090_v50  ;;  %v1191_v3 = vpop.f32.mrf.mxu1  ;;  %v11122_v50 = vld [vmem:[%s15187_s1 + $0x990] ss:$20 sps:$4 sm:$0xff]   ;;  %v11132_v1 = vld [vmem:[%s15187_s1 + $0x940] ss:$20 sps:$4 sm:$0xff]  }
 0x11d   : > { %3128 = vmatpush1.bf16.msra.mxu0 %v11091_v57  ;;  %v11131_v57 = vld [vmem:[%s15187_s1 + $0x830] ss:$20 sps:$4 sm:$0xff]  }
 0x11e   : > { %3093 = vmatpush2.bf16.msra.mxu1 %v11088_v56  ;;  %3129 = vmatprep.subr.bf16.mxu0 %v11099_v0  ;;  %v11127_v56 = vld [vmem:[%s15187_s1 + $0x968] ss:$20 sps:$4 sm:$0xff]  }
 0x11f   : > { %3094 = vmatprep.subr.bf16.mxu1 %v11096_v63  ;;  %v11135_v63 = vld [vmem:[%s15187_s1 + $0x948] ss:$20 sps:$4 sm:$0xff]  }
 0x121   : > { %3130 = vmatpush1.bf16.msra.mxu0 %v11097_v26 }
 0x122   : > { %3095 = vmatpush2.bf16.msra.mxu1 %v11094_v4  ;;  %3131 = vmatprep.subr.bf16.mxu0 %v11105_v39  ;;  %v11136_v4 = vld [vmem:[%s15187_s1 + $0x808] ss:$20 sps:$4 sm:$0xff]   ;;  %v11145_v39 = vld [vmem:[%s15187_s1 + $0x8f8] ss:$20 sps:$4 sm:$0xff]  }
 0x123   : > { %3096 = vmatprep.subr.bf16.mxu1 %v11102_v10  ;;  %v11144_v10 = vld [vmem:[%s15187_s1 + $0x8f4] ss:$20 sps:$4 sm:$0xff]  }
 0x125   : > { %3132 = vmatpush1.bf16.msra.mxu0 %v11103_v12  ;;  %v11146_v12 = vld [vmem:[%s15187_s1 + $0x7b8] ss:$20 sps:$4 sm:$0xff]  }
 0x126   : > { %3097 = vmatpush2.bf16.msra.mxu1 %v11100_v11  ;;  %3133 = vmatprep.subr.bf16.mxu0 %v11111_v18  ;;  %v11142_v11 = vld [vmem:[%s15187_s1 + $0x8f0] ss:$20 sps:$4 sm:$0xff]  }
 0x127   : > { %3098 = vmatprep.subr.bf16.mxu1 %v11108_v17  ;;  %v11154_v17 = vld [vmem:[%s15187_s1 + $0xb1c] ss:$20 sps:$4 sm:$0xff]   ;;  %v11157_v18 = vld [vmem:[%s15187_s1 + $0xb24] ss:$20 sps:$4 sm:$0xff]  }
 0x129   : > { %3134 = vmatpush1.bf16.msra.mxu0 %v11109_v20  ;;  %v11155_v20 = vld [vmem:[%s15187_s1 + $0xb20] ss:$20 sps:$4 sm:$0xff]  }
 0x12a   : > { %3099 = vmatpush2.bf16.msra.mxu1 %v11106_v19  ;;  %3135 = vmatprep.subr.bf16.mxu0 %v11114_v23  ;;  %v11152_v19 = vld [vmem:[%s15187_s1 + $0xb18] ss:$20 sps:$4 sm:$0xff]   ;;  %v3236_v23 = vld [vmem:[#allocation2] sm:$0x3f] }
 0x12b   : > { %10413 = vmatprep.subr.bf16.mxu1 %v11115_v24  ;;  %v11160_v24 = vld [vmem:[%s15187_s1 + $0xaf4] ss:$20 sps:$4 sm:$0xff]  }
 0x12c   : > { %v10345_v41 = vpop.f32.mrf.mxu0 }
 0x12d   : > { %3101 = vmatmul.mubr.bf16.vlgmr.msra.gmra.mxu1 %v12937_v25  ;;  %3136 = vmatpush2.bf16.msra.mxu0 %v11112_v27  ;;  %v11163_v27 = vld [vmem:[%s15187_s1 + $0xafc] ss:$20 sps:$4 sm:$0xff]  }
 0x12e   : > { %10414 = vmatpush3.bf16.msra.mxu1 %v11116_v30  ;;  %v10346_v44 = vpop.f32.mrf.mxu0  ;;  %3137 = vmatprep.subr.bf16.mxu0 %v11119_v31  ;;  %v11158_v30 = vld [vmem:[%s15187_s1 + $0xaf0] ss:$20 sps:$4 sm:$0xff]   ;;  %v11161_v31 = vld [vmem:[%s15187_s1 + $0xaf8] ss:$20 sps:$4 sm:$0xff]  }
 0x12f   : > { %10415 = vmatprep.subr.bf16.mxu1 %v11120_v34  ;;  %v12964_v47 = vadd.f32 %v10346_v44, %v10345_v41  ;;  %3110 = vmatprep.mubr.bf16.mxu1 %v12729_v62  ;;  %v11169_v41 = vld [vmem:[%s15187_s1 + $0xad4] ss:$20 sps:$4 sm:$0xff]  }
 0x130   : > { %v12970_v51 = vpop.f32.mrf.mxu0 }
 0x131   : > { %3138 = vmatpush2.bf16.msra.mxu0 %v11117_v35  ;;  %v11166_v35 = vld [vmem:[%s15187_s1 + $0xacc] ss:$20 sps:$4 sm:$0xff]  }
 0x132   : > { %10416 = vmatpush3.bf16.msra.mxu1 %v11121_v42  ;;  %v12978_v54 = vpop.f32.mrf.mxu0  ;;  %3139 = vmatprep.subr.bf16.mxu0 %v11124_v37  ;;  %v3238_v42 = vpack.c.bf16 %v12677_v32, %v3234_v21  ;;  %v3240_v37 = vpack.c.bf16 %v3236_v23, %v3236_v23  ;;  %v11164_v32 = vld [vmem:[%s15187_s1 + $0xac8] ss:$20 sps:$4 sm:$0xff]  }
 0x133   : > { %10417 = vmatprep.subr.bf16.mxu1 %v11125_v46  ;;  %v11208_v21 = vld [vmem:[%s15187_s1 + $0xc34] ss:$20 sps:$4 sm:$0xff]   ;;  %v11211_v23 = vld [vmem:[%s15187_s1 + $0xc3c] ss:$20 sps:$4 sm:$0xff]  }
 0x134   : > { %v10351_v58 = vpop.f32.mrf.mxu0 }
 0x135   : > { %3111 = vmatmul.mubr.bf16.gmra.mxu1 %v12927_v22  ;;  %3140 = vmatpush2.bf16.msra.mxu0 %v11122_v50 }
 0x136   : > { %10418 = vmatpush3.bf16.msra.mxu1 %v11126_v60  ;;  %3141 = vmatprep.subr.bf16.mxu0 %v11129_v52  ;;  %v10352_v0 = vpop.f32.mrf.mxu0  ;;  %v11172_v60 = vld [vmem:[%s15187_s1 + $0xaa4] ss:$20 sps:$4 sm:$0xff]   ;;  %v3346_v52 = vrot.slane %v3238_v42, 2 }
 0x137   : > { %10419 = vmatprep.subr.bf16.mxu1 %v11130_v55  ;;  %3202 = vmatprep.mubr.bf16.mxu1 %v12750_v5  ;;  %v13000_v3 = vadd.f32 %v10352_v0, %v10351_v58  ;;  %v11173_v58 = vld [vmem:[%s15187_s1 + $0xaa8] ss:$20 sps:$4 sm:$0xff]  }
 0x138   : > { %v10354_v26 = vpop.f32.mrf.mxu0 }
 0x139   : > { %3142 = vmatpush2.bf16.msra.mxu0 %v11127_v56  ;;  %v11176_v26 = vld [vmem:[%s15187_s1 + $0xa78] ss:$20 sps:$4 sm:$0xff]  }
 0x13a   : > { %10420 = vmatpush3.bf16.msra.mxu1 %v11131_v57  ;;  %3143 = vmatprep.subr.bf16.mxu0 %v11134_v61  ;;  %v10355_v5 = vpop.f32.mrf.mxu0  ;;  %v11170_v57 = vld [vmem:[%s15187_s1 + $0xaa0] ss:$20 sps:$4 sm:$0xff]  }
 0x13b   : > { %10421 = vmatprep.subr.bf16.mxu1 %v11135_v63  ;;  %v11181_v63 = vld [vmem:[%s15187_s1 + $0xa84] ss:$20 sps:$4 sm:$0xff]  }
 0x13d   : > { %3144 = vmatpush2.bf16.msra.mxu0 %v11132_v1 }
 0x13e   : > { %10422 = vmatpush3.bf16.msra.mxu1 %v11136_v4  ;;  %3145 = vmatprep.subr.bf16.mxu0 %v11139_v6  ;;  %v11179_v6 = vld [vmem:[%s15187_s1 + $0xa80] ss:$20 sps:$4 sm:$0xff]  }
 0x13f   : > { %10423 = vmatprep.subr.bf16.mxu1 %v11140_v7 }
 0x141   : > { %3146 = vmatpush2.bf16.msra.mxu0 %v11137_v8  ;;  %v11182_v8 = vld [vmem:[%s15187_s1 + $0xa50] ss:$20 sps:$4 sm:$0xff]  }
 0x142   : > { %10424 = vmatpush3.bf16.msra.mxu1 %v11141_v9  ;;  %3147 = vmatprep.subr.bf16.mxu0 %v11144_v10  ;;  %v11185_v9 = vld [vmem:[%s15187_s1 + $0xa58] ss:$20 sps:$4 sm:$0xff]  }
 0x143   : > { %10425 = vmatprep.subr.bf16.mxu1 %v11145_v39  ;;  %v11190_v10 = vld [vmem:[%s15187_s1 + $0xa2c] ss:$20 sps:$4 sm:$0xff]   ;;  %v11193_v39 = vld [vmem:[%s15187_s1 + $0xa34] ss:$20 sps:$4 sm:$0xff]  }
 0x145   : > { %3148 = vmatpush2.bf16.msra.mxu0 %v11142_v11  ;;  %v11188_v11 = vld [vmem:[%s15187_s1 + $0xa28] ss:$20 sps:$4 sm:$0xff]  }
 0x146   : > { %10426 = vmatpush3.bf16.msra.mxu1 %v11146_v12  ;;  %3149 = vmatprep.subr.bf16.mxu0 %v11149_v13  ;;  %v11191_v12 = vld [vmem:[%s15187_s1 + $0xa30] ss:$20 sps:$4 sm:$0xff]  }
 0x147   : > { %10427 = vmatprep.subr.bf16.mxu1 %v11150_v14  ;;  %v11196_v13 = vld [vmem:[%s15187_s1 + $0xa04] ss:$20 sps:$4 sm:$0xff]   ;;  %v11199_v14 = vld [vmem:[%s15187_s1 + $0xa0c] ss:$20 sps:$4 sm:$0xff]  }
 0x149   : > { %3150 = vmatpush2.bf16.msra.mxu0 %v11147_v15  ;;  %v11194_v15 = vld [vmem:[%s15187_s1 + $0xa00] ss:$20 sps:$4 sm:$0xff]  }
 0x14a   : > { %10428 = vmatpush3.bf16.msra.mxu1 %v11151_v16  ;;  %3769 = vmatprep.subr.bf16.mxu0 %v11154_v17  ;;  %v11197_v16 = vld [vmem:[%s15187_s1 + $0xa08] ss:$20 sps:$4 sm:$0xff]  }
 0x14b   : > { %3820 = vmatprep.subr.bf16.mxu1 %v11157_v18  ;;  %v11202_v17 = vld [vmem:[%s15187_s1 + $0xc5c] ss:$20 sps:$4 sm:$0xff]   ;;  %v11205_v18 = vld [vmem:[%s15187_s1 + $0xc64] ss:$20 sps:$4 sm:$0xff]  }
 0x14c   : > { %3152 = vmatmul.mubr.bf16.vlgmr.msra.gmra.mxu0 %v12937_v25 }
 0x14d   : > { %v1691_v34 = vpop.f32.mrf.mxu1  ;;  %3203 = vmatmul.mubr.bf16.vlgmr.msra.gmra.mxu1 %v12937_v25  ;;  %3770 = vmatpush1.bf16.msra.mxu0 %v11152_v19  ;;  %v11200_v19 = vld [vmem:[%s15187_s1 + $0xc58] ss:$20 sps:$4 sm:$0xff]  }
 0x14e   : > { %v13075_v44 = vadd.f32 %v1691_v34, %v12820_v28  ;;  %3821 = vmatpush1.bf16.msra.mxu1 %v11155_v20  ;;  %3771 = vmatprep.subr.bf16.mxu0 %v11160_v24  ;;  %v11167_v28 = vld [vmem:[%s15187_s1 + $0xad0] ss:$20 sps:$4 sm:$0xff]   ;;  %v11203_v20 = vld [vmem:[%s15187_s1 + $0xc60] ss:$20 sps:$4 sm:$0xff]  }
 0x14f   : > { %v1693_v46 = vpop.f32.mrf.mxu1  ;;  %3822 = vmatprep.subr.bf16.mxu1 %v11163_v27  ;;  %3161 = vmatprep.mubr.bf16.mxu0 %v12729_v62  ;;  %v11206_v24 = vld [vmem:[%s15187_s1 + $0xc30] ss:$20 sps:$4 sm:$0xff]   ;;  %v11209_v27 = vld [vmem:[%s15187_s1 + $0xc38] ss:$20 sps:$4 sm:$0xff]  }
 0x150   : > { %v13078_v25 = vadd.f32 %v1693_v46, %v12831_v33  ;;  %3210 = vmatprep.mubr.bf16.mxu1 %v12729_v62  ;;  %v11175_v33 = vld [vmem:[%s15187_s1 + $0xaac] ss:$20 sps:$4 sm:$0xff]   ;;  %v13094_v62 = vrot.slane %v3240_v37, 2  ;;  %v11212_v46 = vld [vmem:[%s15187_s1 + $0xc08] ss:$20 sps:$4 sm:$0xff]  }
 0x151   : > { %v1695_v50 = vpop.f32.mrf.mxu1  ;;  %3772 = vmatpush1.bf16.msra.mxu0 %v11158_v30  ;;  %v11214_v34 = vld [vmem:[%s15187_s1 + $0xc0c] ss:$20 sps:$4 sm:$0xff]  }
 0x152   : > { %v13097_v55 = vadd.f32 %v1695_v50, %v12842_v59  ;;  %3823 = vmatpush1.bf16.msra.mxu1 %v11161_v31  ;;  %3773 = vmatprep.subr.bf16.mxu0 %v11166_v35  ;;  %v11178_v59 = vld [vmem:[%s15187_s1 + $0xa7c] ss:$20 sps:$4 sm:$0xff]   ;;  %v13117_v0 = vsel %vm3342_vm4, %v3346_v52, %v13094_v62  ;;  %v11217_v35 = vld [vmem:[%s15187_s1 + $0xc14] ss:$20 sps:$4 sm:$0xff]  }
 0x153   : > { %v13099_v56 = vpop.f32.mrf.mxu1  ;;  %3824 = vmatprep.subr.bf16.mxu1 %v11169_v41 }
 0x154   : > { %3162 = vmatmul.mubr.bf16.gmra.mxu0 %v12927_v22 }
 0x155   : > { %v1701_v61 = vpop.f32.mrf.mxu1  ;;  %3211 = vmatmul.mubr.bf16.gmra.mxu1 %v12927_v22  ;;  %3774 = vmatpush1.bf16.msra.mxu0 %v11164_v32  ;;  %v11215_v32 = vld [vmem:[%s15187_s1 + $0xc10] ss:$20 sps:$4 sm:$0xff]  }
 0x156   : > { %v13120_v1 = vadd.f32 %v1701_v61, %v12869_v48  ;;  %3825 = vmatpush1.bf16.msra.mxu1 %v11167_v28  ;;  %3775 = vmatprep.subr.bf16.mxu0 %v11172_v60  ;;  %v11184_v48 = vld [vmem:[%s15187_s1 + $0xa54] ss:$20 sps:$4 sm:$0xff]   ;;  %v11220_v60 = vld [vmem:[%s15187_s1 + $0xbe4] ss:$20 sps:$4 sm:$0xff]   ;;  %v10350_v61 = vadd.f32 %v12978_v54, %v12970_v51 }
 0x157   : > { %v1703_v4 = vpop.f32.mrf.mxu1  ;;  %3826 = vmatprep.subr.bf16.mxu1 %v11175_v33  ;;  %3801 = vmatprep.mubr.bf16.mxu0 %v13117_v0  ;;  %v11223_v33 = vld [vmem:[%s15187_s1 + $0xbec] ss:$20 sps:$4 sm:$0xff]   ;;  %v11229_v51 = vld [vmem:[%s15187_s1 + $0xbc4] ss:$20 sps:$4 sm:$0xff]  }
 0x158   : > { %v13123_v22 = vadd.f32 %v1703_v4, %v12879_v38  ;;  %3852 = vmatprep.mubr.bf16.mxu1 %v13117_v0  ;;  %v11187_v38 = vld [vmem:[%s15187_s1 + $0xa5c] ss:$20 sps:$4 sm:$0xff]  }
 0x159   : > { %v1705_v7 = vpop.f32.mrf.mxu1  ;;  %3776 = vmatpush1.bf16.msra.mxu0 %v11170_v57 }
 0x15a   : > { %3827 = vmatpush1.bf16.msra.mxu1 %v11173_v58  ;;  %3777 = vmatprep.subr.bf16.mxu0 %v11178_v59 }
 0x15b   : > { %3828 = vmatprep.subr.bf16.mxu1 %v11181_v63  ;;  %v1706_v5 = vpop.f32.mrf.mxu1  ;;  %v11218_v63 = vld [vmem:[%s15187_s1 + $0xbe0] ss:$20 sps:$4 sm:$0xff]  }
 0x15c   : > { %v11224_v5 = vld [vmem:[%s15187_s1 + $0xbb8] ss:$20 sps:$4 sm:$0xff]  }
 0x15d   : > { %3778 = vmatpush1.bf16.msra.mxu0 %v11176_v26 }
 0x15e   : > { %3829 = vmatpush1.bf16.msra.mxu1 %v11179_v6  ;;  %3779 = vmatprep.subr.bf16.mxu0 %v11184_v48  ;;  %v11226_v6 = vld [vmem:[%s15187_s1 + $0xbbc] ss:$20 sps:$4 sm:$0xff]  }
 0x15f   : > { %3830 = vmatprep.subr.bf16.mxu1 %v11187_v38 }
 0x161   : > { %3780 = vmatpush1.bf16.msra.mxu0 %v11182_v8  ;;  %v11227_v8 = vld [vmem:[%s15187_s1 + $0xbc0] ss:$20 sps:$4 sm:$0xff]  }
 0x162   : > { %3831 = vmatpush1.bf16.msra.mxu1 %v11185_v9  ;;  %3781 = vmatprep.subr.bf16.mxu0 %v11190_v10  ;;  %v11232_v9 = vld [vmem:[%s15187_s1 + $0xb94] ss:$20 sps:$4 sm:$0xff]   ;;  %v11235_v10 = vld [vmem:[%s15187_s1 + $0xb9c] ss:$20 sps:$4 sm:$0xff]  }
 0x163   : > { %3832 = vmatprep.subr.bf16.mxu1 %v11193_v39 }
 0x165   : > { %3782 = vmatpush1.bf16.msra.mxu0 %v11188_v11 }
 0x166   : > { %3833 = vmatpush1.bf16.msra.mxu1 %v11191_v12  ;;  %3783 = vmatprep.subr.bf16.mxu0 %v11196_v13 }
 0x167   : > { %3834 = vmatprep.subr.bf16.mxu1 %v11199_v14 }
 0x169   : > { %3784 = vmatpush1.bf16.msra.mxu0 %v11194_v15  ;;  %v11230_v15 = vld [vmem:[%s15187_s1 + $0xb90] ss:$20 sps:$4 sm:$0xff]  }
 0x16a   : > { %3835 = vmatpush1.bf16.msra.mxu1 %v11197_v16  ;;  %3785 = vmatprep.subr.bf16.mxu0 %v11202_v17  ;;  %v11233_v16 = vld [vmem:[%s15187_s1 + $0xb98] ss:$20 sps:$4 sm:$0xff]   ;;  %v3233_v17 = vld [vmem:[#allocation2 + $0x18] sm:$0xf0] }
 0x16b   : > { %3836 = vmatprep.subr.bf16.mxu1 %v11205_v18  ;;  %v11241_v18 = vld [vmem:[%s15187_s1 + $0xb74] ss:$20 sps:$4 sm:$0xff]  }
 0x16c   : > { %v13193_v30 = vpop.f32.mrf.mxu0 }
 0x16d   : > { %v10373_v31 = vpop.f32.mrf.mxu1  ;;  %3786 = vmatpush2.bf16.msra.mxu0 %v11200_v19  ;;  %v3235_v19 = vld [vmem:[#allocation2 + $0x8] sm:$0x3f] }
 0x16e   : > { %3837 = vmatpush2.bf16.msra.mxu1 %v11203_v20  ;;  %v13201_v41 = vpop.f32.mrf.mxu0  ;;  %3787 = vmatprep.subr.bf16.mxu0 %v11208_v21  ;;  %v11236_v20 = vld [vmem:[%s15187_s1 + $0xb68] ss:$20 sps:$4 sm:$0xff]   ;;  %v11239_v21 = vld [vmem:[%s15187_s1 + $0xb70] ss:$20 sps:$4 sm:$0xff]  }
 0x16f   : > { %v10374_v42 = vpop.f32.mrf.mxu1  ;;  %3838 = vmatprep.subr.bf16.mxu1 %v11211_v23  ;;  %v11244_v23 = vld [vmem:[%s15187_s1 + $0xb44] ss:$20 sps:$4 sm:$0xff]  }
 0x170   : > { %v10375_v37 = vadd.f32 %v10374_v42, %v10373_v31  ;;  %v13209_v28 = vpop.f32.mrf.mxu0  ;;  %v11245_v42 = vld [vmem:[%s15187_s1 + $0xb48] ss:$20 sps:$4 sm:$0xff]  }
 0x171   : > { %v10376_v50 = vpop.f32.mrf.mxu1  ;;  %3788 = vmatpush2.bf16.msra.mxu0 %v11206_v24  ;;  %v11247_v24 = vld [vmem:[%s15187_s1 + $0xb4c] ss:$20 sps:$4 sm:$0xff]  }
 0x172   : > { %v13218_v52 = vadd.f32 %v10375_v37, %v12964_v47  ;;  %3839 = vmatpush2.bf16.msra.mxu1 %v11209_v27  ;;  %v13220_v57 = vpop.f32.mrf.mxu0  ;;  %3789 = vmatprep.subr.bf16.mxu0 %v11214_v34  ;;  %v11221_v47 = vld [vmem:[%s15187_s1 + $0xbe8] ss:$20 sps:$4 sm:$0xff]   ;;  %v3239_v34 = vpack.c.bf16 %v3235_v19, %v3235_v19 }
 0x173   : > { %v10377_v58 = vpop.f32.mrf.mxu1  ;;  %3840 = vmatprep.subr.bf16.mxu1 %v11217_v35  ;;  %v11860_v27 = vld [vmem:[#allocation2 + $0x28] sm:$0xff]  ;;  %v11242_v35 = vld [vmem:[%s15187_s1 + $0xb40] ss:$20 sps:$4 sm:$0xff]  }
 0x174   : > { %v10378_v59 = vadd.f32 %v10377_v58, %v10376_v50  ;;  %v13230_v4 = vpop.f32.mrf.mxu0  ;;  %v3237_v31 = vpack.c.bf16 %v11860_v27, %v3233_v17  ;;  %v11249_v50 = vld [vmem:[%s15187_s1 + $0xb28] ss:$20 sps:$4 sm:$0xff]   ;;  %v11251_v58 = vld [vmem:[%s15187_s1 + $0xb00] ss:$20 sps:$4 sm:$0xff]   ;;  %v11290_v17 = vld [vmem:[%s15189_s3 + $0x3ac] ss:$12 sps:$4 sm:$0xff]  }
 0x175   : > { %v10379_v26 = vpop.f32.mrf.mxu1  ;;  %3790 = vmatpush2.bf16.msra.mxu0 %v11212_v46  ;;  %v11248_v46 = vld [vmem:[%s15187_s1 + $0xc68] ss:$20 sps:$4 sm:$0xff]  }
 0x176   : > { %v13238_v54 = vadd.f32 %v10378_v59, %v10350_v61  ;;  %3841 = vmatpush2.bf16.msra.mxu1 %v11215_v32  ;;  %v13240_v48 = vpop.f32.mrf.mxu0  ;;  %3791 = vmatprep.subr.bf16.mxu0 %v11220_v60  ;;  %v3343_v37 = vrot.slane %v3237_v31, 2  ;;  %v13290_v32 = vrot.slane %v3239_v34, 2  ;;  %v11250_v60 = vld [vmem:[%s15187_s1 + $0xc40] ss:$20 sps:$4 sm:$0xff]   ;;  %v11252_v61 = vld [vmem:[%s15187_s1 + $0xc18] ss:$20 sps:$4 sm:$0xff]  }
 0x177   : > { %v10380_v38 = vpop.f32.mrf.mxu1  ;;  %3842 = vmatprep.subr.bf16.mxu1 %v11223_v33  ;;  %v11253_v59 = vld [vmem:[%s15187_s1 + $0xad8] ss:$20 sps:$4 sm:$0xff]   ;;  %v11267_v19 = vld [vmem:[%s15189_s3 + $0x588] ss:$12 sps:$4 sm:$0xff]   ;;  %v11273_v27 = vld [vmem:[%s15189_s3 + $0x570] ss:$12 sps:$4 sm:$0xff]  }
 0x178   : > { %v10381_v7 = vadd.f32 %v10380_v38, %v10379_v26  ;;  %v1756_v39 = vpop.f32.mrf.mxu0  ;;  %v13300_v33 = vsel %vm3342_vm4, %v3343_v37, %v13290_v32  ;;  %v11256_v26 = vld [vmem:[%s15187_s1 + $0xbc8] ss:$20 sps:$4 sm:$0xff]   ;;  %v11266_v38 = vld [vmem:[%s15189_s3 + $0x40c] ss:$12 sps:$4 sm:$0xff]  }
 0x179   : > { %v10382_v11 = vpop.f32.mrf.mxu1  ;;  %3792 = vmatpush2.bf16.msra.mxu0 %v11218_v63  ;;  %v11254_v63 = vld [vmem:[%s15187_s1 + $0xbf0] ss:$20 sps:$4 sm:$0xff]   ;;  %v11302_v31 = vld [vmem:[%s15189_s3 + $0x37c] ss:$12 sps:$4 sm:$0xff]  }
 0x17a   : > { %v13255_v12 = vadd.f32 %v10381_v7, %v13000_v3  ;;  %3843 = vmatpush2.bf16.msra.mxu1 %v11221_v47  ;;  %3793 = vmatprep.subr.bf16.mxu0 %v11226_v6  ;;  %v1757_v13 = vpop.f32.mrf.mxu0  ;;  %v11238_v3 = vld [vmem:[%s15187_s1 + $0xb6c] ss:$20 sps:$4 sm:$0xff]   ;;  %v11255_v47 = vld [vmem:[%s15187_s1 + $0xab0] ss:$20 sps:$4 sm:$0xff]   ;;  %v11257_v6 = vld [vmem:[%s15187_s1 + $0xa88] ss:$20 sps:$4 sm:$0xff]  }
 0x17b   : > { %3844 = vmatprep.subr.bf16.mxu1 %v11229_v51  ;;  %v10383_v14 = vpop.f32.mrf.mxu1  ;;  %v11264_v51 = vld [vmem:[%s15189_s3 + $0x408] ss:$12 sps:$4 sm:$0xff]   ;;  %v11276_v39 = vld [vmem:[%s15189_s3 + $0x3d8] ss:$12 sps:$4 sm:$0xff]  }
 0x17c   : > { %v11258_v7 = vld [vmem:[%s15187_s1 + $0xba0] ss:$20 sps:$4 sm:$0xff]   ;;  %v11261_v11 = vld [vmem:[%s15187_s1 + $0xa38] ss:$20 sps:$4 sm:$0xff]   ;;  %v11284_v13 = vld [vmem:[%s15189_s3 + $0x3c4] ss:$12 sps:$4 sm:$0xff]  }
 0x17d   : > { %3794 = vmatpush2.bf16.msra.mxu0 %v11224_v5  ;;  %v11270_v5 = vld [vmem:[%s15189_s3 + $0x3f0] ss:$12 sps:$4 sm:$0xff]  }
 0x17e   : > { %3845 = vmatpush2.bf16.msra.mxu1 %v11227_v8  ;;  %3795 = vmatprep.subr.bf16.mxu0 %v11232_v9  ;;  %v11259_v8 = vld [vmem:[%s15187_s1 + $0xa60] ss:$20 sps:$4 sm:$0xff]   ;;  %v11278_v9 = vld [vmem:[%s15189_s3 + $0x3dc] ss:$12 sps:$4 sm:$0xff]   ;;  %v11262_v14 = vld [vmem:[%s15187_s1 + $0xb50] ss:$20 sps:$4 sm:$0xff]  }
 0x17f   : > { %3846 = vmatprep.subr.bf16.mxu1 %v11235_v10  ;;  %v11260_v10 = vld [vmem:[%s15187_s1 + $0xb78] ss:$20 sps:$4 sm:$0xff]  }
 0x181   : > { %3796 = vmatpush2.bf16.msra.mxu0 %v11230_v15  ;;  %v11263_v15 = vld [vmem:[%s15187_s1 + $0xa10] ss:$20 sps:$4 sm:$0xff]  }
 0x182   : > { %3847 = vmatpush2.bf16.msra.mxu1 %v11233_v16  ;;  %3797 = vmatprep.subr.bf16.mxu0 %v11238_v3  ;;  %v11282_v16 = vld [vmem:[%s15189_s3 + $0x3c0] ss:$12 sps:$4 sm:$0xff]  }
 0x183   : > { %3848 = vmatprep.subr.bf16.mxu1 %v11241_v18  ;;  %v11269_v3 = vld [vmem:[%s15189_s3 + $0x58c] ss:$12 sps:$4 sm:$0xff]   ;;  %v11288_v18 = vld [vmem:[%s15189_s3 + $0x3a8] ss:$12 sps:$4 sm:$0xff]  }
 0x185   : > { %3798 = vmatpush2.bf16.msra.mxu0 %v11236_v20  ;;  %v11275_v20 = vld [vmem:[%s15189_s3 + $0x574] ss:$12 sps:$4 sm:$0xff]  }
 0x186   : > { %3849 = vmatpush2.bf16.msra.mxu1 %v11239_v21  ;;  %3799 = vmatprep.subr.bf16.mxu0 %v11244_v23  ;;  %v11296_v21 = vld [vmem:[%s15189_s3 + $0x394] ss:$12 sps:$4 sm:$0xff]   ;;  %v11294_v23 = vld [vmem:[%s15189_s3 + $0x390] ss:$12 sps:$4 sm:$0xff]  }
 0x187   : > { %3850 = vmatprep.subr.bf16.mxu1 %v11247_v24  ;;  %v1743_v24 = vadd.f32 %v13193_v30, %v12823_v29  ;;  %v1745_v29 = vadd.f32 %v13201_v41, %v12839_v36  ;;  %v11308_v41 = vld [vmem:[%s15189_s3 + $0x364] ss:$12 sps:$4 sm:$0xff]  }
 0x189   : > { %3800 = vmatpush2.bf16.msra.mxu0 %v11242_v35 }
 0x18a   : > { %3851 = vmatpush2.bf16.msra.mxu1 %v11245_v42  ;;  %10441 = vmatprep.subr.bf16.mxu0 %v11248_v46  ;;  %v11281_v42 = vld [vmem:[%s15189_s3 + $0x55c] ss:$12 sps:$4 sm:$0xff]  }
 0x18b   : > { %5074 = vmatprep.subr.bf16.mxu1 %v11266_v38  ;;  %v11293_v38 = vld [vmem:[%s15189_s3 + $0x52c] ss:$12 sps:$4 sm:$0xff]  }
 0x18c   : > { %3802 = vmatmul.mubr.bf16.vlgmr.msra.gmra.mxu0 %v13300_v33 }
 0x18d   : > { %3853 = vmatmul.mubr.bf16.vlgmr.msra.gmra.mxu1 %v13300_v33  ;;  %10442 = vmatpush3.bf16.msra.mxu0 %v11249_v50 }
 0x18e   : > { %3811 = vmatprep.mubr.bf16.mxu0 %v13094_v62  ;;  %10443 = vmatprep.subr.bf16.mxu0 %v11250_v60  ;;  %v11300_v60 = vld [vmem:[%s15189_s3 + $0x378] ss:$12 sps:$4 sm:$0xff]  }
 0x18f   : > { %3862 = vmatprep.mubr.bf16.mxu1 %v13094_v62  ;;  %5075 = vmatpush1.bf16.msra.mxu1 %v11264_v51 }
 0x191   : > { %10444 = vmatpush3.bf16.msra.mxu0 %v11251_v58 }
 0x192   : > { %10445 = vmatprep.subr.bf16.mxu0 %v11252_v61 }
 0x194   : > { %3812 = vmatmul.mubr.bf16.gmra.mxu0 %v13290_v32 }
 0x195   : > { %3863 = vmatmul.mubr.bf16.gmra.mxu1 %v13290_v32  ;;  %10446 = vmatpush3.bf16.msra.mxu0 %v11253_v59  ;;  %v11287_v59 = vld [vmem:[%s15189_s3 + $0x544] ss:$12 sps:$4 sm:$0xff]  }
 0x196   : > { %3903 = vmatprep.mubr.bf16.mxu0 %v13117_v0  ;;  %10447 = vmatprep.subr.bf16.mxu0 %v11254_v63  ;;  %v11272_v0 = vld [vmem:[%s15189_s3 + $0x3f4] ss:$12 sps:$4 sm:$0xff]  }
 0x197   : > { %5076 = vmatprep.subr.bf16.mxu1 %v11272_v0 }
 0x198   : > { %5077 = vmatpush1.bf16.msra.mxu1 %v11270_v5 }
 0x199   : > { %10448 = vmatpush3.bf16.msra.mxu0 %v11255_v47  ;;  %5078 = vmatprep.subr.bf16.mxu1 %v11278_v9  ;;  %v11306_v47 = vld [vmem:[%s15189_s3 + $0x360] ss:$12 sps:$4 sm:$0xff]   ;;  %v11291_v9 = vld [vmem:[%s15189_s3 + $0x528] ss:$12 sps:$4 sm:$0xff]  }
 0x19a   : > { %10449 = vmatprep.subr.bf16.mxu0 %v11256_v26  ;;  %v1753_v26 = vadd.f32 %v13230_v4, %v12871_v49 }
 0x19c   : > { %5079 = vmatpush1.bf16.msra.mxu1 %v11276_v39 }
 0x19d   : > { %10450 = vmatpush3.bf16.msra.mxu0 %v11257_v6  ;;  %5080 = vmatprep.subr.bf16.mxu1 %v11284_v13  ;;  %v11303_v13 = vld [vmem:[%s15189_s3 + $0x4f8] ss:$12 sps:$4 sm:$0xff]  }
 0x19e   : > { %10451 = vmatprep.subr.bf16.mxu0 %v11258_v7  ;;  %v1755_v7 = vadd.f32 %v13240_v48, %v12881_v53 }
 0x1a0   : > { %5081 = vmatpush1.bf16.msra.mxu1 %v11282_v16  ;;  %v11314_v16 = vld [vmem:[%s15189_s3 + $0x4cc] ss:$12 sps:$4 sm:$0xff]  }
 0x1a1   : > { %10452 = vmatpush3.bf16.msra.mxu0 %v11259_v8  ;;  %5082 = vmatprep.subr.bf16.mxu1 %v11290_v17 }
 0x1a2   : > { %10453 = vmatprep.subr.bf16.mxu0 %v11260_v10 }
 0x1a4   : > { %5083 = vmatpush1.bf16.msra.mxu1 %v11288_v18  ;;  %v11317_v18 = vld [vmem:[%s15189_s3 + $0x64c] ss:$12 sps:$4 sm:$0xff]  }
 0x1a5   : > { %10454 = vmatpush3.bf16.msra.mxu0 %v11261_v11  ;;  %5084 = vmatprep.subr.bf16.mxu1 %v11296_v21  ;;  %v11305_v11 = vld [vmem:[%s15189_s3 + $0x4fc] ss:$12 sps:$4 sm:$0xff]  }
 0x1a6   : > { %10455 = vmatprep.subr.bf16.mxu0 %v11262_v14  ;;  %v11311_v14 = vld [vmem:[%s15189_s3 + $0x4e4] ss:$12 sps:$4 sm:$0xff]  }
 0x1a8   : > { %5085 = vmatpush1.bf16.msra.mxu1 %v11294_v23  ;;  %v3936_v23 = vlaneseq }
 0x1a9   : > { %10456 = vmatpush3.bf16.msra.mxu0 %v11263_v15  ;;  %5086 = vmatprep.subr.bf16.mxu1 %v11302_v31  ;;  %v11309_v15 = vld [vmem:[%s15189_s3 + $0x4e0] ss:$12 sps:$4 sm:$0xff]  }
 0x1aa   : > { %5125 = vmatprep.subr.bf16.mxu0 %v11269_v3  ;;  %v11312_v3 = vld [vmem:[%s15189_s3 + $0x4c8] ss:$12 sps:$4 sm:$0xff]   ;;  %vm3995_vm5 = vcmp.lt.s32.totalorder %v3936_v23, 576  ;;  %vm7373_vm6 = vcmp.lt.s32.totalorder %v3936_v23, 288 }
 0x1ab   : > { %3998 = vst.msk [vmem:[#allocation3] ss:$8 sm:$0x10] %vm3995_vm5, %v11873_v2  ;;  %4000 = vst.msk [vmem:[#allocation3 + $0x53] ss:$8 sm:$0xf] %vm3995_vm5, %v11873_v2 }
 0x1ac   : > { %v2377_v34 = vpop.f32.mrf.mxu0  ;;  %3904 = vmatmul.mubr.bf16.vlgmr.msra.gmra.mxu0 %v13300_v33  ;;  %v1747_v33 = vadd.f32 %v13209_v28, %v12844_v40  ;;  %5087 = vmatpush1.bf16.msra.mxu1 %v11300_v60  ;;  %4001 = vst.msk [vmem:[#allocation3 + $0x53] ss:$8 sm:$0x10] %vm3995_vm5, %v11873_v2  ;;  %3997 = vst.msk [vmem:[#allocation3] ss:$8 sm:$0xf] %vm3995_vm5, %v11873_v2 }
 0x1ad   : > { %v2428_v35 = vpop.f32.mrf.mxu1  ;;  %v13408_v30 = vadd.f32 %v2377_v34, %v13075_v44  ;;  %3911 = vmatprep.mubr.bf16.mxu0 %v13094_v62  ;;  %5126 = vmatpush1.bf16.msra.mxu0 %v11267_v19  ;;  %v11279_v62 = vld [vmem:[%s15189_s3 + $0x558] ss:$12 sps:$4 sm:$0xff]   ;;  %v11315_v19 = vld [vmem:[%s15189_s3 + $0x648] ss:$12 sps:$4 sm:$0xff]   ;;  %v11318_v34 = vld [vmem:[%s15189_s3 + $0x4b0] ss:$12 sps:$4 sm:$0xff]  }
 0x1ae   : > { %v13410_v37 = vadd.f32 %v2428_v35, %v1743_v24  ;;  %v2379_v46 = vpop.f32.mrf.mxu0  ;;  %5127 = vmatprep.subr.bf16.mxu0 %v11275_v20  ;;  %5088 = vmatprep.subr.bf16.mxu1 %v11308_v41  ;;  %v11323_v35 = vld [vmem:[%s15189_s3 + $0x634] ss:$12 sps:$4 sm:$0xff]   ;;  %7375 = vst.msk [vmem:[#allocation4] ss:$8 sm:$0x7] %vm7373_vm6, %v11873_v2 }
 0x1af   : > { %v2430_v50 = vpop.f32.mrf.mxu1  ;;  %v13419_v36 = vadd.f32 %v2379_v46, %v13078_v25  ;;  %7378 = vst.msk [vmem:[#allocation4 + $0x33] ss:$8 sm:$0x7] %vm7373_vm6, %v11873_v2  ;;  %v11327_v2 = vld [vmem:[%s15189_s3 + $0x618] ss:$12 sps:$4 sm:$0xff]  }
 0x1b0   : > { %v13421_v44 = vadd.f32 %v2430_v50, %v1745_v29  ;;  %v2381_v58 = vpop.f32.mrf.mxu0  ;;  %5089 = vmatpush1.bf16.msra.mxu1 %v11306_v47  ;;  %v11326_v50 = vld [vmem:[%s15189_s3 + $0x49c] ss:$12 sps:$4 sm:$0xff]   ;;  %v11330_v47 = vld [vmem:[%s15189_s3 + $0x480] ss:$12 sps:$4 sm:$0xff]  }
 0x1b1   : > { %v2432_v61 = vpop.f32.mrf.mxu1  ;;  %v13433_v40 = vadd.f32 %v2381_v58, %v13097_v55  ;;  %5128 = vmatpush1.bf16.msra.mxu0 %v11273_v27  ;;  %v11285_v55 = vld [vmem:[%s15189_s3 + $0x540] ss:$12 sps:$4 sm:$0xff]   ;;  %5090 = vmatprep.subr.bf16.mxu1 %v11314_v16  ;;  %v11360_v16 = vld [vmem:[%s15189_s3 + $0x4d0] ss:$12 sps:$4 sm:$0xff]  }
 0x1b2   : > { %v13435_v25 = vadd.f32 %v2432_v61, %v1747_v33  ;;  %v13437_v28 = vpop.f32.mrf.mxu0  ;;  %5129 = vmatprep.subr.bf16.mxu0 %v11281_v42  ;;  %v11320_v27 = vld [vmem:[%s15189_s3 + $0x4b4] ss:$12 sps:$4 sm:$0xff]   ;;  %v11324_v33 = vld [vmem:[%s15189_s3 + $0x498] ss:$12 sps:$4 sm:$0xff]  }
 0x1b3   : > { %v13439_v63 = vpop.f32.mrf.mxu1 }
 0x1b4   : > { %v2387_v6 = vpop.f32.mrf.mxu0  ;;  %3912 = vmatmul.mubr.bf16.gmra.mxu0 %v13290_v32  ;;  %5091 = vmatpush2.bf16.msra.mxu1 %v11312_v3 }
 0x1b5   : > { %v2438_v51 = vpop.f32.mrf.mxu1  ;;  %v13456_v0 = vadd.f32 %v2387_v6, %v13120_v1  ;;  %5130 = vmatpush1.bf16.msra.mxu0 %v11279_v62  ;;  %v11299_v1 = vld [vmem:[%s15189_s3 + $0x514] ss:$12 sps:$4 sm:$0xff]   ;;  %5092 = vmatprep.subr.bf16.mxu1 %v11320_v27  ;;  %v11329_v62 = vld [vmem:[%s15189_s3 + $0x61c] ss:$12 sps:$4 sm:$0xff]  }
 0x1b6   : > { %v13458_v49 = vadd.f32 %v2438_v51, %v1753_v26  ;;  %v2389_v4 = vpop.f32.mrf.mxu0  ;;  %5131 = vmatprep.subr.bf16.mxu0 %v11287_v59  ;;  %v11335_v26 = vld [vmem:[%s15189_s3 + $0x604] ss:$12 sps:$4 sm:$0xff]   ;;  %v11333_v6 = vld [vmem:[%s15189_s3 + $0x600] ss:$12 sps:$4 sm:$0xff]   ;;  %v11336_v51 = vld [vmem:[%s15189_s3 + $0x468] ss:$12 sps:$4 sm:$0xff]  }
 0x1b7   : > { %v2440_v5 = vpop.f32.mrf.mxu1  ;;  %v13461_v32 = vadd.f32 %v2389_v4, %v13123_v22  ;;  %v11297_v22 = vld [vmem:[%s15189_s3 + $0x510] ss:$12 sps:$4 sm:$0xff]  }
 0x1b8   : > { %v13463_v8 = vadd.f32 %v2440_v5, %v1755_v7  ;;  %v2391_v53 = vpop.f32.mrf.mxu0  ;;  %5093 = vmatpush2.bf16.msra.mxu1 %v11318_v34  ;;  %v11339_v7 = vld [vmem:[%s15189_s3 + $0x5e8] ss:$12 sps:$4 sm:$0xff]   ;;  %v11342_v4 = vld [vmem:[%s15189_s3 + $0x450] ss:$12 sps:$4 sm:$0xff]  }
 0x1b9   : > { %v2442_v48 = vpop.f32.mrf.mxu1  ;;  %5132 = vmatpush1.bf16.msra.mxu0 %v11285_v55  ;;  %5094 = vmatprep.subr.bf16.mxu1 %v11326_v50  ;;  %v11344_v5 = vld [vmem:[%s15189_s3 + $0x454] ss:$12 sps:$4 sm:$0xff]  }
 0x1ba   : > { %v2392_v10 = vpop.f32.mrf.mxu0  ;;  %5133 = vmatprep.subr.bf16.mxu0 %v11293_v38  ;;  %v11341_v38 = vld [vmem:[%s15189_s3 + $0x5ec] ss:$12 sps:$4 sm:$0xff]   ;;  %v11347_v53 = vld [vmem:[%s15189_s3 + $0x5d4] ss:$12 sps:$4 sm:$0xff]   ;;  %v11350_v48 = vld [vmem:[%s15189_s3 + $0x43c] ss:$12 sps:$4 sm:$0xff]  }
 0x1bb   : > { %v2443_v39 = vpop.f32.mrf.mxu1  ;;  %v11348_v10 = vld [vmem:[%s15189_s3 + $0x438] ss:$12 sps:$4 sm:$0xff]  }
 0x1bc   : > { %5095 = vmatpush2.bf16.msra.mxu1 %v11324_v33  ;;  %v11351_v39 = vld [vmem:[%s15189_s3 + $0x5b8] ss:$12 sps:$4 sm:$0xff]  }
 0x1bd   : > { %5134 = vmatpush1.bf16.msra.mxu0 %v11291_v9  ;;  %v11345_v9 = vld [vmem:[%s15189_s3 + $0x5d0] ss:$12 sps:$4 sm:$0xff]  }
 0x1be   : > { %5135 = vmatprep.subr.bf16.mxu0 %v11299_v1  ;;  %v11353_v1 = vld [vmem:[%s15189_s3 + $0x5bc] ss:$12 sps:$4 sm:$0xff]  }
 0x1c1   : > { %5136 = vmatpush1.bf16.msra.mxu0 %v11297_v22  ;;  %v11356_v22 = vld [vmem:[%s15189_s3 + $0x424] ss:$12 sps:$4 sm:$0xff]  }
 0x1c2   : > { %5137 = vmatprep.subr.bf16.mxu0 %v11305_v11  ;;  %v11359_v11 = vld [vmem:[%s15189_s3 + $0x5a4] ss:$12 sps:$4 sm:$0xff]  }
 0x1c5   : > { %5138 = vmatpush1.bf16.msra.mxu0 %v11303_v13  ;;  %v11354_v13 = vld [vmem:[%s15189_s3 + $0x420] ss:$12 sps:$4 sm:$0xff]  }
 0x1c6   : > { %5139 = vmatprep.subr.bf16.mxu0 %v11311_v14  ;;  %v11357_v14 = vld [vmem:[%s15189_s3 + $0x5a0] ss:$12 sps:$4 sm:$0xff]  }
 0x1c9   : > { %5140 = vmatpush1.bf16.msra.mxu0 %v11309_v15 }
 0x1ca   : > { %5141 = vmatprep.subr.bf16.mxu0 %v11317_v18 }
 0x1cc   : > { %v10401_v17 = vpop.f32.mrf.mxu0 }
 0x1cd   : > { %5142 = vmatpush2.bf16.msra.mxu0 %v11315_v19 }
 0x1ce   : > { %v10402_v20 = vpop.f32.mrf.mxu0  ;;  %5143 = vmatprep.subr.bf16.mxu0 %v11323_v35 }
 0x1cf   : > { %v10403_v21 = vadd.f32 %v10402_v20, %v10401_v17 }
 0x1d0   : > { %v10404_v24 = vpop.f32.mrf.mxu0 }
 0x1d1   : > { %v13502_v31 = vadd.f32 %v10403_v21, %v13218_v52  ;;  %v11321_v52 = vld [vmem:[%s15189_s3 + $0x630] ss:$12 sps:$4 sm:$0xff]  }
 0x1d2   : > { %v10405_v42 = vpop.f32.mrf.mxu0  ;;  %5144 = vmatpush2.bf16.msra.mxu0 %v11321_v52 }
 0x1d3   : > { %v10406_v29 = vadd.f32 %v10405_v42, %v10404_v24  ;;  %5145 = vmatprep.subr.bf16.mxu0 %v11329_v62 }
 0x1d4   : > { %v10407_v46 = vpop.f32.mrf.mxu0 }
 0x1d5   : > { %v13525_v60 = vadd.f32 %v10406_v29, %v13238_v54  ;;  %v11332_v54 = vld [vmem:[%s15189_s3 + $0x484] ss:$12 sps:$4 sm:$0xff]  }
 0x1d6   : > { %v10408_v41 = vpop.f32.mrf.mxu0  ;;  %5146 = vmatpush2.bf16.msra.mxu0 %v11327_v2  ;;  %5096 = vmatprep.subr.bf16.mxu1 %v11332_v54 }
 0x1d7   : > { %v10409_v58 = vadd.f32 %v10408_v41, %v10407_v46  ;;  %5097 = vmatpush2.bf16.msra.mxu1 %v11330_v47  ;;  %5147 = vmatprep.subr.bf16.mxu0 %v11335_v26 }
 0x1d8   : > { %v10410_v61 = vpop.f32.mrf.mxu0 }
 0x1d9   : > { %v13540_v59 = vadd.f32 %v10409_v58, %v13255_v12  ;;  %v11338_v12 = vld [vmem:[%s15189_s3 + $0x46c] ss:$12 sps:$4 sm:$0xff]  }
 0x1da   : > { %v10411_v55 = vpop.f32.mrf.mxu0  ;;  %5148 = vmatpush2.bf16.msra.mxu0 %v11333_v6  ;;  %5098 = vmatprep.subr.bf16.mxu1 %v11338_v12 }
 0x1db   : > { %5099 = vmatpush2.bf16.msra.mxu1 %v11336_v51  ;;  %5149 = vmatprep.subr.bf16.mxu0 %v11341_v38 }
 0x1dc   : > { %5100 = vmatprep.subr.bf16.mxu1 %v11344_v5  ;;  %v13637_v5 = vld [vmem:[%s15188_s2] sm:$0x1f] }
 0x1de   : > { %5150 = vmatpush2.bf16.msra.mxu0 %v11339_v7  ;;  %v13628_v7 = vshrl.u32 %v3936_v23, 7 }
 0x1df   : > { %5151 = vmatprep.subr.bf16.mxu0 %v11347_v53  ;;  %5101 = vmatpush2.bf16.msra.mxu1 %v11342_v4 }
 0x1e0   : > { %5102 = vmatprep.subr.bf16.mxu1 %v11350_v48  ;;  %v13631_v4 = vsub.s32 0, %v13628_v7 }
 0x1e2   : > { %5152 = vmatpush2.bf16.msra.mxu0 %v11345_v9  ;;  %v13640_v9 = vsub.s32 1, %v13628_v7  ;;  %v13647_v23 = vrot.slane %v13637_v5, %v13631_v4 }
 0x1e3   : > { %5153 = vmatprep.subr.bf16.mxu0 %v11353_v1  ;;  %5103 = vmatpush2.bf16.msra.mxu1 %v11348_v10  ;;  %v1698_v1 = vadd.f32 %v13099_v56, %v12852_v43  ;;  %v1749_v10 = vadd.f32 %v13220_v57, %v12860_v45 }
 0x1e4   : > { %5104 = vmatprep.subr.bf16.mxu1 %v11356_v22 }
 0x1e5   : > { %v2501_v43 = vadd.f32 %v13439_v63, %v1749_v10 }
 0x1e6   : > { %5154 = vmatpush2.bf16.msra.mxu0 %v11351_v39 }
 0x1e7   : > { %5155 = vmatprep.subr.bf16.mxu0 %v11359_v11  ;;  %5105 = vmatpush2.bf16.msra.mxu1 %v11354_v13 }
 0x1e8   : > { %10469 = vmatprep.subr.bf16.mxu1 %v11360_v16  ;;  %v2499_v16 = vadd.f32 %v13437_v28, %v1698_v1 }
 0x1ea   : > { %5156 = vmatpush2.bf16.msra.mxu0 %v11357_v14 }
 0x1ed   : > { %v3102_v15 = vpop.f32.mrf.mxu1 }
 0x1ee   : > { %v3218_v17 = vadd.f32 %v3102_v15, %v13408_v30  ;;  %v11371_v30 = vld [vmem:[%s15189_s3 + $0x6ac] ss:$12 sps:$4 sm:$0xff]  }
 0x1ef   : > { %v3104_v3 = vpop.f32.mrf.mxu1  ;;  %5184 = vmatprep.subr.bf16.mxu0 %v11371_v30 }
 0x1f0   : > { %v3219_v18 = vadd.f32 %v3104_v3, %v13419_v36 }
 0x1f1   : > { %v3106_v19 = vpop.f32.mrf.mxu1 }
 0x1f2   : > { %v13605_v20 = vadd.f32 %v3106_v19, %v13433_v40 }
 0x1f3   : > { %v3108_v21 = vpop.f32.mrf.mxu1 }
 0x1f4   : > { %v3224_v19 = vadd.f32 %v3108_v21, %v2499_v16 }
 0x1f5   : > { %v3112_v24 = vpop.f32.mrf.mxu1 }
 0x1f6   : > { %v13608_v27 = vadd.f32 %v3112_v24, %v13456_v0 }
 0x1f7   : > { %v3114_v34 = vpop.f32.mrf.mxu1 }
 0x1f8   : > { %v13611_v35 = vadd.f32 %v3114_v34, %v13461_v32 }
 0x1f9   : > { %v3116_v42 = vpop.f32.mrf.mxu1 }
 0x1fb   : > { %v3117_v52 = vpop.f32.mrf.mxu1 }
 0x20c   : > { %v3153_v36 = vpop.f32.mrf.mxu0 }
 0x20d   : > { %v10429_v29 = vpop.f32.mrf.mxu1  ;;  %v3220_v53 = vadd.f32 %v3153_v36, %v13410_v37  ;;  %v13660_v37 = vrot.slane %v13637_v5, %v13640_v9 }
 0x20e   : > { %v3155_v40 = vpop.f32.mrf.mxu0 }
 0x20f   : > { %v10430_v46 = vpop.f32.mrf.mxu1  ;;  %v3221_v11 = vadd.f32 %v3155_v40, %v13421_v44 }
 0x210   : > { %v10431_v50 = vadd.f32 %v10430_v46, %v10429_v29  ;;  %v3157_v33 = vpop.f32.mrf.mxu0 }
 0x211   : > { %v10432_v62 = vpop.f32.mrf.mxu1  ;;  %v3225_v28 = vadd.f32 %v3157_v33, %v13435_v25 }
 0x212   : > { %v13617_v0 = vadd.f32 %v10431_v50, %v13502_v31  ;;  %v3159_v41 = vpop.f32.mrf.mxu0 }
 0x213   : > { %v10433_v32 = vpop.f32.mrf.mxu1  ;;  %v3226_v24 = vadd.f32 %v3159_v41, %v2501_v43 }
 0x214   : > { %v10434_v2 = vadd.f32 %v10433_v32, %v10432_v62  ;;  %v3163_v58 = vpop.f32.mrf.mxu0 }
 0x215   : > { %v10435_v61 = vpop.f32.mrf.mxu1  ;;  %v3230_v29 = vadd.f32 %v3163_v58, %v13458_v49 }
 0x216   : > { %v13620_v54 = vadd.f32 %v10434_v2, %v13525_v60  ;;  %v13622_v47 = vpop.f32.mrf.mxu0  ;;  %v3946_v60 = vsub.s32 2, %v13628_v7 }
 0x217   : > { %v10436_v26 = vpop.f32.mrf.mxu1 }
 0x218   : > { %v10437_v55 = vadd.f32 %v10436_v26, %v10435_v61  ;;  %v3167_v6 = vpop.f32.mrf.mxu0  ;;  %v13652_v48 = vrot.slane %v13637_v5, %v3946_v60 }
 0x219   : > { %v10438_v12 = vpop.f32.mrf.mxu1 }
 0x21a   : > { %v13625_v51 = vadd.f32 %v10437_v55, %v13540_v59  ;;  %v3168_v31 = vpop.f32.mrf.mxu0  ;;  %v3950_v59 = vsub.s32 3, %v13628_v7  ;;  %v3231_v55 = vadd.f32 %v13622_v47, %v13463_v8 }
 0x21b   : > { %v10439_v38 = vpop.f32.mrf.mxu1 }
 0x21c   : > { %v13664_v15 = vrot.slane %v13637_v5, %v3950_v59 }
 0x24c   : > { %v3803_v39 = vpop.f32.mrf.mxu0 }
 0x24d   : > { %v3854_v22 = vpop.f32.mrf.mxu1  ;;  %v3919_v13 = vadd.f32 %v3803_v39, %v3218_v17 }
 0x24e   : > { %v3921_v14 = vadd.f32 %v3854_v22, %v3220_v53  ;;  %v3805_v45 = vpop.f32.mrf.mxu0 }
 0x24f   : > { %v3856_v56 = vpop.f32.mrf.mxu1  ;;  %v3961_v57 = vadd.f32 %v13647_v23, %v3919_v13  ;;  %v3920_v17 = vadd.f32 %v3805_v45, %v3219_v18 }
 0x250   : > { %v3963_v44 = vadd.f32 %v13652_v48, %v3921_v14  ;;  %v3922_v3 = vadd.f32 %v3856_v56, %v3221_v11  ;;  %v3807_v63 = vpop.f32.mrf.mxu0 }
 0x251   : > { %v3858_v34 = vpop.f32.mrf.mxu1  ;;  %3976 = vst [vmem:[%s13671_s20] sm:$0xff] %v3961_v57  ;;  %v4018_v42 = vrot.slane %v3961_v57, 7  ;;  %v3962_v30 = vadd.f32 %v13660_v37, %v3920_v17  ;;  %v3924_v18 = vadd.f32 %v3807_v63, %v13605_v20 }
 0x252   : > { %3978 = vst [vmem:[%s13671_s20 + $0x10] sm:$0xff] %v3963_v44  ;;  %v4020_v52 = vrot.slane %v3963_v44, 7  ;;  %v3964_v36 = vadd.f32 %v13664_v15, %v3922_v3  ;;  %v3926_v21 = vadd.f32 %v3858_v34, %v3225_v28  ;;  %v3809_v40 = vpop.f32.mrf.mxu0 }
 0x253   : > { %v3860_v25 = vpop.f32.mrf.mxu1  ;;  %4058 = vst [vmem:[#allocation3] sm:$0xfe] %v4018_v42  ;;  %3977 = vst [vmem:[%s13671_s20 + $0x8] sm:$0xff] %v3962_v30  ;;  %v4019_v46 = vrot.slane %v3962_v30, 7  ;;  %v3925_v33 = vadd.f32 %v3809_v40, %v3224_v19  ;;  %v3966_v41 = vadd.f32 %v13647_v23, %v3924_v18 }
 0x254   : > { %4060 = vst [vmem:[#allocation3 + $0x10] sm:$0xfe] %v4020_v52  ;;  %3979 = vst [vmem:[%s13671_s20 + $0x18] sm:$0xff] %v3964_v36  ;;  %v4021_v50 = vrot.slane %v3964_v36, 7  ;;  %v3927_v62 = vadd.f32 %v3860_v25, %v3226_v24  ;;  %v3968_v49 = vadd.f32 %v13652_v48, %v3926_v21  ;;  %v3813_v20 = vpop.f32.mrf.mxu0 }
 0x255   : > { %v3864_v32 = vpop.f32.mrf.mxu1  ;;  %4059 = vst [vmem:[#allocation3 + $0x8] sm:$0xfe] %v4019_v46  ;;  %v3967_v2 = vadd.f32 %v13660_v37, %v3925_v33  ;;  %v3929_v61 = vadd.f32 %v3813_v20, %v13608_v27  ;;  %3982 = vst [vmem:[%s13671_s20 + $0x28] sm:$0xff] %v3966_v41  ;;  %v4023_v6 = vrot.slane %v3966_v41, 7 }
 0x256   : > { %4061 = vst [vmem:[#allocation3 + $0x18] sm:$0xfe] %v4021_v50  ;;  %v3969_v58 = vadd.f32 %v13664_v15, %v3927_v62  ;;  %v3931_v26 = vadd.f32 %v3864_v32, %v3230_v29  ;;  %3984 = vst [vmem:[%s13671_s20 + $0x38] sm:$0xff] %v3968_v49  ;;  %v4027_v12 = vrot.slane %v3968_v49, 7  ;;  %v3815_v31 = vpop.f32.mrf.mxu0 }
 0x257   : > { %v3866_v38 = vpop.f32.mrf.mxu1  ;;  %3983 = vst [vmem:[%s13671_s20 + $0x30] sm:$0xff] %v3967_v2  ;;  %v4025_v59 = vrot.slane %v3967_v2, 7  ;;  %v3971_v1 = vadd.f32 %v13647_v23, %v3929_v61  ;;  %v13698_v10 = vsel %vm4017_vm7, %v4018_v42, %v4023_v6  ;;  %v3930_v47 = vadd.f32 %v3815_v31, %v13611_v35 }
 0x258   : > { %3985 = vst [vmem:[%s13671_s20 + $0x40] sm:$0xff] %v3969_v58  ;;  %v4029_v53 = vrot.slane %v3969_v58, 7  ;;  %v3973_v27 = vadd.f32 %v13652_v48, %v3931_v26  ;;  %v13701_v8 = vsel %vm4017_vm7, %v4020_v52, %v4027_v12  ;;  %v3932_v39 = vadd.f32 %v3866_v38, %v3231_v55  ;;  %v3817_v22 = vpop.f32.mrf.mxu0  ;;  %4064 = vst [vmem:[#allocation3 + $0x28] sm:$0xff] %v13698_v10 }
 0x259   : > { %v3868_v11 = vpop.f32.mrf.mxu1  ;;  %4066 = vst [vmem:[#allocation3 + $0x38] sm:$0xff] %v13701_v8  ;;  %v13707_v23 = vsel %vm4017_vm7, %v4019_v46, %v4025_v59  ;;  %3987 = vst [vmem:[%s13671_s20 + $0x50] sm:$0x3] %v3971_v1  ;;  %v4033_v13 = vrot.slane %v3971_v1, 7  ;;  %v3972_v35 = vadd.f32 %v13660_v37, %v3930_v47  ;;  %v3954_v58 = vsub.s32 4, %v13628_v7 }
 0x25a   : > { %v13710_v48 = vsel %vm4017_vm7, %v4021_v50, %v4029_v53  ;;  %3989 = vst [vmem:[%s13671_s20 + $0x60] sm:$0x3] %v3973_v27  ;;  %v4037_v14 = vrot.slane %v3973_v27, 7  ;;  %4065 = vst [vmem:[#allocation3 + $0x30] sm:$0xff] %v13707_v23  ;;  %v3974_v16 = vadd.f32 %v13664_v15, %v3932_v39  ;;  %v3818_v43 = vpop.f32.mrf.mxu0  ;;  %v4244_v24 = vld [vmem:[#allocation3] sm:$0xfe] }
 0x25b   : > { %v3869_v45 = vpop.f32.mrf.mxu1  ;;  %v4034_v56 = vsel %vm4017_vm7, %v4023_v6, %v4033_v13  ;;  %3988 = vst [vmem:[%s13671_s20 + $0x58] sm:$0x3] %v3972_v35  ;;  %v4035_v44 = vrot.slane %v3972_v35, 7  ;;  %v4246_v15 = vld [vmem:[#allocation3 + $0x10] sm:$0xfe]  ;;  %v4254_v42 = vpack.c.bf16 %v13698_v10, %v4244_v24 }
 0x25c   : > { %v4038_v57 = vsel %vm4017_vm7, %v4027_v12, %v4037_v14  ;;  %4069 = vst [vmem:[#allocation3 + $0x50] sm:$0x7] %v4034_v56  ;;  %3990 = vst [vmem:[%s13671_s20 + $0x68] sm:$0x3] %v3974_v16  ;;  %v4039_v17 = vrot.slane %v3974_v16, 7  ;;  %v4256_v52 = vpack.c.bf16 %v13701_v8, %v4246_v15  ;;  %v3955_v15 = vrot.slane %v13637_v5, %v3954_v58 }
 0x25d   : > { %4071 = vst [vmem:[#allocation3 + $0x60] sm:$0x7] %v4038_v57  ;;  %v4245_v3 = vld [vmem:[#allocation3 + $0x8] sm:$0xfe]  ;;  %v4247_v19 = vld [vmem:[#allocation3 + $0x18] sm:$0xfe]  ;;  %v4036_v63 = vsel %vm4017_vm7, %v4025_v59, %v4035_v44 }
 0x25e   : > { %v4255_v28 = vpack.c.bf16 %v13707_v23, %v4245_v3  ;;  %v4257_v37 = vpack.c.bf16 %v13710_v48, %v4247_v19  ;;  %v4040_v34 = vsel %vm4017_vm7, %v4029_v53, %v4039_v17  ;;  %4070 = vst [vmem:[#allocation3 + $0x58] sm:$0x7] %v4036_v63  ;;  %v4412_v40 = vshll.u32 %v4254_v42, 16  ;;  %v11361_v43 = vld [vmem:[%s15189_s3 + $0x410] ss:$12 sps:$4 sm:$0xff]  }
 0x25f   : > { %4072 = vst [vmem:[#allocation3 + $0x68] sm:$0x7] %v4040_v34  ;;  %v4436_v46 = vshll.u32 %v4256_v52, 16  ;;  %v4410_v38 = vshrl.u32 %v4254_v42, 16  ;;  %v4434_v59 = vshrl.u32 %v4256_v52, 16 }
 0x260   : > { %v4424_v30 = vshll.u32 %v4255_v28, 16  ;;  %v4448_v36 = vshll.u32 %v4257_v37, 16  ;;  %v4422_v61 = vshrl.u32 %v4255_v28, 16  ;;  %v4446_v26 = vshrl.u32 %v4257_v37, 16  ;;  %v11362_v17 = vld [vmem:[%s15189_s3 + $0x4b8] ss:$12 sps:$4 sm:$0xff]  }
 0x261   : > { %v4414_v55 = vrot.slane %v4412_v40, 1  ;;  %v4438_v6 = vrot.slane %v4436_v46, 1  ;;  %v11369_v37 = vld [vmem:[%s15189_s3 + $0x6a8] ss:$12 sps:$4 sm:$0xff]   ;;  %v11363_v42 = vld [vmem:[%s15189_s3 + $0x3f8] ss:$12 sps:$4 sm:$0xff]  }
 0x262   : > { %v4426_v50 = vrot.slane %v4424_v30, 1  ;;  %v4450_v33 = vrot.slane %v4448_v36, 1  ;;  %v11376_v63 = vld [vmem:[%s15189_s3 + $0x694] ss:$12 sps:$4 sm:$0xff]   ;;  %v11374_v36 = vld [vmem:[%s15189_s3 + $0x690] ss:$12 sps:$4 sm:$0xff]  }
 0x263   : > { %v4249_v29 = vld [vmem:[#allocation3 + $0x50] sm:$0x7]  ;;  %v4415_v35 = vor.u32 %v4414_v55, %v4410_v38  ;;  %v4439_v16 = vor.u32 %v4438_v6, %v4434_v59  ;;  %v11386_v58 = vld [vmem:[%s15189_s3 + $0x664] ss:$12 sps:$4 sm:$0xff]   ;;  %v11874_v59 = vmov 0  }
 0x264   : > { %v4251_v18 = vld [vmem:[#allocation3 + $0x60] sm:$0x7]  ;;  %v13727_v21 = vpack.c.bf16 %v4249_v29, %v4249_v29  ;;  %v4427_v53 = vor.u32 %v4426_v50, %v4422_v61  ;;  %v4451_v1 = vor.u32 %v4450_v33, %v4446_v26  ;;  %v11364_v5 = vld [vmem:[%s15189_s3 + $0x4a0] ss:$12 sps:$4 sm:$0xff]   ;;  %v11367_v26 = vld [vmem:[%s15189_s3 + $0x3c8] ss:$12 sps:$4 sm:$0xff]  }
 0x265   : > { %v13729_v25 = vpack.c.bf16 %v4251_v18, %v4251_v18  ;;  %v4250_v62 = vld [vmem:[#allocation3 + $0x58] sm:$0x7]  ;;  %v11365_v50 = vld [vmem:[%s15189_s3 + $0x3e0] ss:$12 sps:$4 sm:$0xff]  }
 0x266   : > { %v4252_v41 = vld [vmem:[#allocation3 + $0x68] sm:$0x7]  ;;  %v4417_v49 = vshll.u32 %v13727_v21, 16  ;;  %v4260_v32 = vpack.c.bf16 %v4250_v62, %v4250_v62  ;;  %v4469_v40 = vshrl.u32 %v13727_v21, 16  ;;  %v11366_v21 = vld [vmem:[%s15189_s3 + $0x488] ss:$12 sps:$4 sm:$0xff]  }
 0x267   : > { %v4441_v20 = vshll.u32 %v13729_v25, 16  ;;  %v4262_v2 = vpack.c.bf16 %v4252_v41, %v4252_v41  ;;  %v11384_v38 = vld [vmem:[%s15189_s3 + $0x660] ss:$12 sps:$4 sm:$0xff]  }
 0x268   : > { %v4429_v12 = vshll.u32 %v4260_v32, 16  ;;  %v4419_v27 = vrot.slane %v4417_v49, 1  ;;  %v4472_v11 = vshrl.u32 %v4260_v32, 16 }
 0x269   : > { %v4453_v31 = vshll.u32 %v4262_v2, 16  ;;  %v4443_v47 = vrot.slane %v4441_v20, 1  ;;  %v4478_v13 = vshrl.u32 %v4262_v2, 16 }
 0x26a   : > { %v4431_v39 = vrot.slane %v4429_v12, 1  ;;  %v13750_v19 = vsel %vm640_vm1, %v4415_v35, %v4419_v27  ;;  %v13784_v41 = vor.u32 %v4469_v40, %v4419_v27  ;;  %v11368_v12 = vld [vmem:[%s15189_s3 + $0x470] ss:$12 sps:$4 sm:$0xff]   ;;  %v11393_v40 = vld [vmem:[%s15189_s3 + $0x578] ss:$12 sps:$4 sm:$0xff]  }
 0x26b   : > { %v4455_v22 = vrot.slane %v4453_v31, 1  ;;  %v13753_v28 = vsel %vm640_vm1, %v4439_v16, %v4443_v47  ;;  %v11372_v27 = vld [vmem:[%s15189_s3 + $0x3b0] ss:$12 sps:$4 sm:$0xff]   ;;  %v11382_v16 = vld [vmem:[%s15189_s3 + $0x380] ss:$12 sps:$4 sm:$0xff]  }
 0x26c   : > { %v10457_v14 = vpop.f32.mrf.mxu0  ;;  %v4432_v45 = vsel %vm640_vm1, %v4427_v53, %v4431_v39  ;;  %v13741_v57 = vor.u32 %v4472_v11, %v4431_v39  ;;  %v11373_v39 = vld [vmem:[%s15189_s3 + $0x458] ss:$12 sps:$4 sm:$0xff]  }
 0x26d   : > { %v13739_v56 = vsel %vm640_vm1, %v4451_v1, %v4455_v22  ;;  %v13743_v44 = vor.u32 %v4478_v13, %v4455_v22  ;;  %5106 = vmatprep.mubr.bf16.mxu1 %v4432_v45  ;;  %v11389_v1 = vld [vmem:[%s15189_s3 + $0x650] ss:$12 sps:$4 sm:$0xff]   ;;  %v11377_v11 = vld [vmem:[%s15189_s3 + $0x398] ss:$12 sps:$4 sm:$0xff]   ;;  %v11378_v13 = vld [vmem:[%s15189_s3 + $0x440] ss:$12 sps:$4 sm:$0xff]  }
 0x26e   : > { %5157 = vmatprep.mubr.bf16.mxu0 %v13739_v56  ;;  %v10458_v3 = vpop.f32.mrf.mxu0  ;;  %5107 = vmatmul.mubr.bf16.vlgmr.msra.gmra.mxu1 %v13750_v19 }
 0x26f   : > { %v10459_v24 = vadd.f32 %v10458_v3, %v10457_v14  ;;  %5158 = vmatmul.mubr.bf16.vlgmr.msra.gmra.mxu0 %v13753_v28  ;;  %10470 = vmatpush3.bf16.msra.mxu1 %v11361_v43 }
 0x270   : > { %5116 = vmatprep.mubr.bf16.mxu1 %v13741_v57  ;;  %v10460_v34 = vpop.f32.mrf.mxu0  ;;  %5167 = vmatprep.mubr.bf16.mxu0 %v13743_v44 }
 0x271   : > { %v3923_v52 = vadd.f32 %v10459_v24, %v13617_v0  ;;  %10471 = vmatprep.subr.bf16.mxu1 %v11362_v17  ;;  %5185 = vmatpush1.bf16.msra.mxu0 %v11369_v37  ;;  %v4475_v0 = vshrl.u32 %v13729_v25, 16  ;;  %v11381_v25 = vld [vmem:[%s15189_s3 + $0x67c] ss:$12 sps:$4 sm:$0xff]  }
 0x272   : > { %v10461_v30 = vpop.f32.mrf.mxu0  ;;  %5186 = vmatprep.subr.bf16.mxu0 %v11376_v63  ;;  %v11387_v37 = vld [vmem:[%s15189_s3 + $0x368] ss:$12 sps:$4 sm:$0xff]   ;;  %v11388_v63 = vld [vmem:[%s15189_s3 + $0x6b0] ss:$12 sps:$4 sm:$0xff]  }
 0x273   : > { %v3965_v29 = vadd.f32 %v3955_v15, %v3923_v52  ;;  %v10462_v18 = vadd.f32 %v10461_v30, %v10460_v34  ;;  %10472 = vmatpush3.bf16.msra.mxu1 %v11363_v42  ;;  %v13786_v49 = vor.u32 %v4475_v0, %v4443_v47  ;;  %v11390_v30 = vld [vmem:[%s15189_s3 + $0x590] ss:$12 sps:$4 sm:$0xff]   ;;  %v11394_v0 = vld [vmem:[%s15189_s3 + $0x680] ss:$12 sps:$4 sm:$0xff]  }
 0x274   : > { %v10463_v46 = vpop.f32.mrf.mxu0  ;;  %10473 = vmatprep.subr.bf16.mxu1 %v11364_v5 }
 0x275   : > { %3981 = vst.msk [vmem:[%s13671_s20 + $0x20] sm:$0xff] %vm3980_vm8, %v3965_v29  ;;  %v4022_v33 = vrot.slane %v3965_v29, 7  ;;  %v3928_v62 = vadd.f32 %v10462_v18, %v13620_v54  ;;  %5187 = vmatpush1.bf16.msra.mxu0 %v11374_v36  ;;  %v11379_v54 = vld [vmem:[%s15189_s3 + $0x678] ss:$12 sps:$4 sm:$0xff]  }
 0x276   : > { %v10464_v20 = vpop.f32.mrf.mxu0  ;;  %5117 = vmatmul.mubr.bf16.gmra.mxu1 %v13784_v41  ;;  %5188 = vmatprep.subr.bf16.mxu0 %v11381_v25  ;;  %v11391_v36 = vld [vmem:[%s15189_s3 + $0x698] ss:$12 sps:$4 sm:$0xff]  }
 0x277   : > { %4063 = vst.msk [vmem:[#allocation3 + $0x20] sm:$0xfe] %vm4062_vm9, %v4022_v33  ;;  %v3970_v32 = vadd.f32 %v3955_v15, %v3928_v62  ;;  %v10465_v2 = vadd.f32 %v10464_v20, %v10463_v46  ;;  %5168 = vmatmul.mubr.bf16.gmra.mxu0 %v13786_v49  ;;  %10474 = vmatpush3.bf16.msra.mxu1 %v11365_v50  ;;  %v11392_v18 = vld [vmem:[%s15189_s3 + $0x638] ss:$12 sps:$4 sm:$0xff]   ;;  %v11396_v50 = vld [vmem:[%s15189_s3 + $0x560] ss:$12 sps:$4 sm:$0xff]  }
 0x278   : > { %5259 = vmatprep.mubr.bf16.mxu1 %v4432_v45  ;;  %v10466_v61 = vpop.f32.mrf.mxu0  ;;  %10475 = vmatprep.subr.bf16.mxu1 %v11366_v21  ;;  %v11383_v45 = vld [vmem:[%s15189_s3 + $0x428] ss:$12 sps:$4 sm:$0xff]   ;;  %v11402_v25 = vld [vmem:[%s15189_s3 + $0x22c] ss:$12 sps:$4 sm:$0xff]  }
 0x279   : > { %3986 = vst.msk [vmem:[%s13671_s20 + $0x48] sm:$0xff] %vm3980_vm8, %v3970_v32  ;;  %v4031_v55 = vrot.slane %v3970_v32, 7  ;;  %v3933_v6 = vadd.f32 %v10465_v2, %v13625_v51  ;;  %5189 = vmatpush1.bf16.msra.mxu0 %v11379_v54  ;;  %5208 = vmatprep.mubr.bf16.mxu0 %v11874_v59  ;;  %v11398_v62 = vld [vmem:[%s15189_s3 + $0x608] ss:$12 sps:$4 sm:$0xff]   ;;  %v11404_v54 = vld [vmem:[%s15189_s3 + $0x530] ss:$12 sps:$4 sm:$0xff]  }
 0x27a   : > { %v10467_v31 = vpop.f32.mrf.mxu0  ;;  %5190 = vmatprep.subr.bf16.mxu0 %v11386_v58  ;;  %v11399_v21 = vld [vmem:[%s15189_s3 + $0x548] ss:$12 sps:$4 sm:$0xff]   ;;  %v11408_v58 = vld [vmem:[%s15189_s3 + $0x5d8] ss:$12 sps:$4 sm:$0xff]   ;;  %v11405_v61 = vld [vmem:[%s15189_s3 + $0x210] ss:$12 sps:$4 sm:$0xff]  }
 0x27b   : > { %v4032_v53 = vsel %vm4017_vm7, %v4022_v33, %v4031_v55  ;;  %v3975_v51 = vadd.f32 %v3955_v15, %v3933_v6  ;;  %10476 = vmatpush3.bf16.msra.mxu1 %v11367_v26  ;;  %v11397_v33 = vld [vmem:[%s15189_s3 + $0x668] ss:$12 sps:$4 sm:$0xff]   ;;  %v11409_v26 = vld [vmem:[%s15189_s3 + $0x518] ss:$12 sps:$4 sm:$0xff]   ;;  %v11413_v6 = vld [vmem:[%s15189_s3 + $0x5c0] ss:$12 sps:$4 sm:$0xff]  }
 0x27c   : > { %4068 = vst.msk [vmem:[#allocation3 + $0x48] sm:$0xff] %vm3980_vm8, %v4032_v53  ;;  %10477 = vmatprep.subr.bf16.mxu1 %v11368_v12  ;;  %v4078_v20 = vld [vmem:[#allocation3 + $0x18] sm:$0xff]  ;;  %v11407_v32 = vld [vmem:[%s15189_s3 + $0x214] ss:$12 sps:$4 sm:$0xff]   ;;  %v11410_v12 = vld [vmem:[%s15189_s3 + $0x1f8] ss:$12 sps:$4 sm:$0xff]  }
 0x27d   : > { %3992 = vst.msk [vmem:[%s13671_s20 + $0x70] sm:$0x3] %vm3991_vm10, %v3975_v51  ;;  %v4041_v47 = vrot.slane %v3975_v51, 7  ;;  %5191 = vmatpush1.bf16.msra.mxu0 %v11384_v38  ;;  %v13904_v2 = vpack.c.bf16 %v13710_v48, %v4078_v20  ;;  %v11414_v31 = vld [vmem:[%s15189_s3 + $0x500] ss:$12 sps:$4 sm:$0xff]   ;;  %s14852_s20 = scalar_lea.vmem %s15194_s8, %s10692_s23 }
 0x27e   : > { %10497 = vmatprep.subr.bf16.mxu0 %v11389_v1  ;;  %v4248_v35 = vld [vmem:[#allocation3 + $0x20] sm:$0xfe]  ;;  %v11415_v51 = vld [vmem:[%s15189_s3 + $0x1e0] ss:$12 sps:$4 sm:$0xff]  }
 0x27f   : > { %v4042_v22 = vsel %vm4017_vm7, %v4031_v55, %v4041_v47  ;;  %10478 = vmatpush3.bf16.msra.mxu1 %v11372_v27  ;;  %v11412_v55 = vld [vmem:[%s15189_s3 + $0x1fc] ss:$12 sps:$4 sm:$0xff]   ;;  %v11417_v38 = vld [vmem:[%s15189_s3 + $0x1e4] ss:$12 sps:$4 sm:$0xff]   ;;  %v11422_v27 = vld [vmem:[%s15189_s3 + $0x1cc] ss:$12 sps:$4 sm:$0xff]  }
 0x280   : > { %4074 = vst.msk [vmem:[#allocation3 + $0x70] sm:$0x7] %vm4073_vm11, %v4042_v22  ;;  %10479 = vmatprep.subr.bf16.mxu1 %v11373_v39  ;;  %v11418_v53 = vld [vmem:[%s15189_s3 + $0x5a8] ss:$12 sps:$4 sm:$0xff]   ;;  %v11425_v47 = vld [vmem:[%s15189_s3 + $0xac] ss:$12 sps:$4 sm:$0xff]  }
 0x281   : > { %v11419_v1 = vld [vmem:[%s15189_s3 + $0x4e8] ss:$12 sps:$4 sm:$0xff]  }
 0x282   : > { %v11420_v39 = vld [vmem:[%s15189_s3 + $0x1c8] ss:$12 sps:$4 sm:$0xff]  }
 0x283   : > { %v13834_v14 = vld [vmem:[#allocation3 + $0x48] sm:$0xff]  ;;  %10480 = vmatpush3.bf16.msra.mxu1 %v11377_v11  ;;  %v11423_v22 = vld [vmem:[%s15189_s3 + $0xa8] ss:$12 sps:$4 sm:$0xff]  }
 0x284   : > { %v4258_v43 = vpack.c.bf16 %v13834_v14, %v4248_v35  ;;  %10481 = vmatprep.subr.bf16.mxu1 %v11378_v13  ;;  %v11428_v11 = vld [vmem:[%s15189_s3 + $0x1b4] ss:$12 sps:$4 sm:$0xff]   ;;  %v11426_v35 = vld [vmem:[%s15189_s3 + $0x1b0] ss:$12 sps:$4 sm:$0xff]  }
 0x285   : > { %v11431_v13 = vld [vmem:[%s15189_s3 + $0x94] ss:$12 sps:$4 sm:$0xff]  }
 0x286   : > { %v4460_v17 = vshll.u32 %v4258_v43, 16  ;;  %v4458_v34 = vshrl.u32 %v4258_v43, 16  ;;  %v11434_v43 = vld [vmem:[%s15189_s3 + $0x19c] ss:$12 sps:$4 sm:$0xff]   ;;  %v11479_v20 = vld [vmem:[%s15189_s3 + $0x154] ss:$12 sps:$4 sm:$0xff]  }
 0x287   : > { %v4253_v3 = vld [vmem:[#allocation3 + $0x70] sm:$0x7]  ;;  %10482 = vmatpush3.bf16.msra.mxu1 %v11382_v16  ;;  %v11429_v16 = vld [vmem:[%s15189_s3 + $0x90] ss:$12 sps:$4 sm:$0xff]  }
 0x288   : > { %v4263_v24 = vpack.c.bf16 %v4253_v3, %v4253_v3  ;;  %v4462_v15 = vrot.slane %v4460_v17, 1  ;;  %10483 = vmatprep.subr.bf16.mxu1 %v11383_v45  ;;  %v4076_v45 = vld [vmem:[#allocation3 + $0x8] sm:$0xff]  ;;  %v11440_v3 = vld [vmem:[%s15189_s3 + $0x184] ss:$12 sps:$4 sm:$0xff]  }
 0x289   : > { %v11435_v17 = vld [vmem:[%s15189_s3 + $0x78] ss:$12 sps:$4 sm:$0xff]  }
 0x28a   : > { %v4465_v42 = vshll.u32 %v4263_v24, 16  ;;  %v4463_v52 = vor.u32 %v4462_v15, %v4458_v34  ;;  %v4481_v46 = vshrl.u32 %v4263_v24, 16  ;;  %v13986_v24 = vpack.c.bf16 %v13707_v23, %v4076_v45  ;;  %v11438_v15 = vld [vmem:[%s15189_s3 + $0x180] ss:$12 sps:$4 sm:$0xff]  }
 0x28b   : > { %10484 = vmatpush3.bf16.msra.mxu1 %v11387_v37  ;;  %v11443_v37 = vld [vmem:[%s15189_s3 + $0x64] ss:$12 sps:$4 sm:$0xff]   ;;  %v11446_v34 = vld [vmem:[%s15189_s3 + $0x2ec] ss:$12 sps:$4 sm:$0xff]  }
 0x28c   : > { %v4467_v5 = vrot.slane %v4465_v42, 1  ;;  %10655 = vmatprep.subr.bf16.mxu1 %v11388_v63  ;;  %v11449_v23 = vld [vmem:[%s15189_s3 + $0x4c] ss:$12 sps:$4 sm:$0xff]   ;;  %v11447_v42 = vld [vmem:[%s15189_s3 + $0x48] ss:$12 sps:$4 sm:$0xff]  }
 0x28e   : > { %v4468_v29 = vsel %vm640_vm1, %v4463_v52, %v4467_v5  ;;  %5260 = vmatmul.mubr.bf16.vlgmr.msra.gmra.mxu1 %v13750_v19  ;;  %v11395_v19 = vld [vmem:[%s15189_s3 + $0x620] ss:$12 sps:$4 sm:$0xff]  }
 0x28f   : > { %9768 = vmatmul.mubr.msk.bf16.vlgmr.msra.gmra.mxu0 %vm3980_vm8, %v4468_v29  ;;  %5267 = vmatprep.mubr.bf16.mxu1 %v13741_v57  ;;  %v4483_v57 = vor.u32 %v4481_v46, %v4467_v5  ;;  %v11452_v52 = vld [vmem:[%s15189_s3 + $0x2d4] ss:$12 sps:$4 sm:$0xff]   ;;  %v11467_v46 = vld [vmem:[%s15189_s3 + $0x4] ss:$12 sps:$4 sm:$0xff]  }
 0x290   : > { %10656 = vmatpush3.bf16.msra.mxu1 %v11388_v63  ;;  %10498 = vmatpush3.bf16.msra.mxu0 %v11390_v30  ;;  %v11441_v63 = vld [vmem:[%s15189_s3 + $0x60] ss:$12 sps:$4 sm:$0xff]   ;;  %v11450_v30 = vld [vmem:[%s15189_s3 + $0x2d0] ss:$12 sps:$4 sm:$0xff]  }
 0x291   : > { %10657 = vmatprep.subr.bf16.mxu1 %v11391_v36  ;;  %10499 = vmatprep.subr.bf16.mxu0 %v11392_v18  ;;  %v11455_v5 = vld [vmem:[%s15189_s3 + $0x34] ss:$12 sps:$4 sm:$0xff]   ;;  %v11461_v18 = vld [vmem:[%s15189_s3 + $0x1c] ss:$12 sps:$4 sm:$0xff]  }
 0x292   : > { %5218 = vmatprep.mubr.bf16.mxu0 %v11874_v59 }
 0x294   : > { %10658 = vmatpush3.bf16.msra.mxu1 %v11391_v36  ;;  %10500 = vmatpush3.bf16.msra.mxu0 %v11393_v40  ;;  %v11453_v36 = vld [vmem:[%s15189_s3 + $0x30] ss:$12 sps:$4 sm:$0xff]   ;;  %v11456_v40 = vld [vmem:[%s15189_s3 + $0x2b8] ss:$12 sps:$4 sm:$0xff]  }
 0x295   : > { %10659 = vmatprep.subr.bf16.mxu1 %v11394_v0  ;;  %10501 = vmatprep.subr.bf16.mxu0 %v11395_v19  ;;  %v11464_v19 = vld [vmem:[%s15189_s3 + $0x2a4] ss:$12 sps:$4 sm:$0xff]  }
 0x296   : > { %5268 = vmatmul.mubr.bf16.gmra.mxu1 %v13784_v41  ;;  %v11403_v41 = vld [vmem:[%s15189_s3 + $0x5f0] ss:$12 sps:$4 sm:$0xff]  }
 0x297   : > { %9769 = vmatmul.mubr.msk.bf16.gmra.mxu0 %vm3980_vm8, %v4483_v57  ;;  %10663 = vmatprep.mubr.msk.bf16.mxu1 %vm3980_vm8, %v4468_v29  ;;  %v11458_v29 = vld [vmem:[%s15189_s3 + $0x2bc] ss:$12 sps:$4 sm:$0xff]  }
 0x298   : > { %10660 = vmatpush3.bf16.msra.mxu1 %v11394_v0  ;;  %10502 = vmatpush3.bf16.msra.mxu0 %v11396_v50  ;;  %v11459_v0 = vld [vmem:[%s15189_s3 + $0x18] ss:$12 sps:$4 sm:$0xff]   ;;  %v11465_v50 = vld [vmem:[%s15189_s3] ss:$12 sps:$4 sm:$0xff]  }
 0x299   : > { %5307 = vmatprep.mubr.bf16.mxu0 %v13739_v56  ;;  %10661 = vmatprep.subr.bf16.mxu1 %v11397_v33  ;;  %v11400_v56 = vld [vmem:[%s15189_s3 + $0x228] ss:$12 sps:$4 sm:$0xff]  }
 0x29a   : > { %10503 = vmatprep.subr.bf16.mxu0 %v11398_v62  ;;  %v11473_v62 = vld [vmem:[%s15189_s3 + $0x16c] ss:$12 sps:$4 sm:$0xff]  }
 0x29c   : > { %10662 = vmatpush3.bf16.msra.mxu1 %v11397_v33  ;;  %10504 = vmatpush3.bf16.msra.mxu0 %v11399_v21  ;;  %v11470_v33 = vld [vmem:[%s15189_s3 + $0x28c] ss:$12 sps:$4 sm:$0xff]   ;;  %v11468_v21 = vld [vmem:[%s15189_s3 + $0x288] ss:$12 sps:$4 sm:$0xff]  }
 0x29d   : > { %6004 = vmatprep.subr.bf16.mxu1 %v11402_v25  ;;  %10505 = vmatprep.subr.bf16.mxu0 %v11403_v41  ;;  %v11471_v25 = vld [vmem:[%s15189_s3 + $0x168] ss:$12 sps:$4 sm:$0xff]  }
 0x29e   : > { %v11476_v41 = vld [vmem:[%s15189_s3 + $0x274] ss:$12 sps:$4 sm:$0xff]  }
 0x29f   : > { %10664 = vmatmul.mubr.msk.bf16.vlgmr.msra.gmra.mxu1 %vm3980_vm8, %v4483_v57  ;;  %v11462_v57 = vld [vmem:[%s15189_s3 + $0x2a0] ss:$12 sps:$4 sm:$0xff]  }
 0x2a0   : > { %6005 = vmatpush1.bf16.msra.mxu1 %v11400_v56  ;;  %6036 = vmatprep.mubr.bf16.mxu1 %v13904_v2  ;;  %v11474_v56 = vld [vmem:[%s15189_s3 + $0x270] ss:$12 sps:$4 sm:$0xff]  }
 0x2a1   : > { %10506 = vmatpush3.bf16.msra.mxu0 %v11404_v54  ;;  %6006 = vmatprep.subr.bf16.mxu1 %v11407_v32  ;;  %v11477_v54 = vld [vmem:[%s15189_s3 + $0x150] ss:$12 sps:$4 sm:$0xff]  }
 0x2a2   : > { %10507 = vmatprep.subr.bf16.mxu0 %v11408_v58  ;;  %v11482_v32 = vld [vmem:[%s15189_s3 + $0x25c] ss:$12 sps:$4 sm:$0xff]  }
 0x2a3   : > { %v11485_v58 = vld [vmem:[%s15189_s3 + $0x13c] ss:$12 sps:$4 sm:$0xff]  }
 0x2a4   : > { %6007 = vmatpush1.bf16.msra.mxu1 %v11405_v61  ;;  %v11480_v61 = vld [vmem:[%s15189_s3 + $0x258] ss:$12 sps:$4 sm:$0xff]  }
 0x2a5   : > { %10508 = vmatpush3.bf16.msra.mxu0 %v11409_v26  ;;  %6008 = vmatprep.subr.bf16.mxu1 %v11412_v55  ;;  %v11483_v26 = vld [vmem:[%s15189_s3 + $0x138] ss:$12 sps:$4 sm:$0xff]  }
 0x2a6   : > { %10509 = vmatprep.subr.bf16.mxu0 %v11413_v6  ;;  %v11488_v55 = vld [vmem:[%s15189_s3 + $0x244] ss:$12 sps:$4 sm:$0xff]  }
 0x2a7   : > { %v11491_v6 = vld [vmem:[%s15189_s3 + $0x124] ss:$12 sps:$4 sm:$0xff]  }
 0x2a8   : > { %6009 = vmatpush1.bf16.msra.mxu1 %v11410_v12  ;;  %v11486_v12 = vld [vmem:[%s15189_s3 + $0x240] ss:$12 sps:$4 sm:$0xff]  }
 0x2a9   : > { %10510 = vmatpush3.bf16.msra.mxu0 %v11414_v31  ;;  %6010 = vmatprep.subr.bf16.mxu1 %v11417_v38  ;;  %v11489_v31 = vld [vmem:[%s15189_s3 + $0x120] ss:$12 sps:$4 sm:$0xff]   ;;  %v11492_v38 = vld [vmem:[%s15189_s3 + $0x170] ss:$12 sps:$4 sm:$0xff]  }
 0x2aa   : > { %10511 = vmatprep.subr.bf16.mxu0 %v11418_v53  ;;  %v4077_v53 = vld [vmem:[#allocation3 + $0x10] sm:$0xff] }
 0x2ac   : > { %6011 = vmatpush1.bf16.msra.mxu1 %v11415_v51  ;;  %v11495_v51 = vld [vmem:[%s15189_s3 + $0x10c] ss:$12 sps:$4 sm:$0xff]  }
 0x2ad   : > { %10512 = vmatpush3.bf16.msra.mxu0 %v11419_v1  ;;  %6012 = vmatprep.subr.bf16.mxu1 %v11422_v27  ;;  %v4088_v1 = vld [vmem:[#allocation3 + $0x68] sm:$0x3]  ;;  %v11496_v27 = vld [vmem:[%s15189_s3 + $0xb0] ss:$12 sps:$4 sm:$0xff]  }
 0x2ae   : > { %5953 = vmatprep.subr.bf16.mxu0 %v11425_v47  ;;  %v14102_v47 = vpack.c.bf16 %v13701_v8, %v4077_v53  ;;  %v11501_v8 = vld [vmem:[%s15189_s3 + $0x98] ss:$12 sps:$4 sm:$0xff]   ;;  %v11541_v53 = vld [vmem:[%s15189_s3 + $0x308] ss:$12 sps:$4 sm:$0xff]  }
 0x2b0   : > { %5308 = vmatmul.mubr.bf16.vlgmr.msra.gmra.mxu0 %v13753_v28  ;;  %6013 = vmatpush1.bf16.msra.mxu1 %v11420_v39  ;;  %v11437_v28 = vld [vmem:[%s15189_s3 + $0x7c] ss:$12 sps:$4 sm:$0xff]  }
 0x2b1   : > { %5315 = vmatprep.mubr.bf16.mxu0 %v13743_v44  ;;  %5954 = vmatpush1.bf16.msra.mxu0 %v11423_v22  ;;  %v11432_v44 = vld [vmem:[%s15189_s3 + $0x198] ss:$12 sps:$4 sm:$0xff]   ;;  %v11493_v39 = vld [vmem:[%s15189_s3 + $0x108] ss:$12 sps:$4 sm:$0xff]  }
 0x2b2   : > { %6014 = vmatprep.subr.bf16.mxu1 %v11428_v11  ;;  %5955 = vmatprep.subr.bf16.mxu0 %v11431_v13  ;;  %v11497_v22 = vld [vmem:[%s15189_s3 + $0x158] ss:$12 sps:$4 sm:$0xff]   ;;  %v14110_v11 = vpack.c.bf16 %v4088_v1, %v4088_v1  ;;  %v11500_v13 = vld [vmem:[%s15189_s3 + $0xf4] ss:$12 sps:$4 sm:$0xff]   ;;  %v6253_v1 = vld [vmem:[#allocation3 + $0x18] sm:$0xfc] }
 0x2b4   : > { %6015 = vmatpush1.bf16.msra.mxu1 %v11426_v35  ;;  %v11498_v35 = vld [vmem:[%s15189_s3 + $0xf0] ss:$12 sps:$4 sm:$0xff]  }
 0x2b5   : > { %5956 = vmatpush1.bf16.msra.mxu0 %v11429_v16  ;;  %6016 = vmatprep.subr.bf16.mxu1 %v11434_v43  ;;  %v11502_v16 = vld [vmem:[%s15189_s3 + $0x140] ss:$12 sps:$4 sm:$0xff]   ;;  %v4087_v43 = vld [vmem:[#allocation3 + $0x60] sm:$0x3] }
 0x2b6   : > { %5957 = vmatprep.subr.bf16.mxu0 %v11437_v28  ;;  %v11505_v28 = vld [vmem:[%s15189_s3 + $0xdc] ss:$12 sps:$4 sm:$0xff]   ;;  %v14132_v45 = vpack.c.bf16 %v4087_v43, %v4087_v43 }
 0x2b7   : > { %v11548_v43 = vld [vmem:[%s15189_s3 + $0x1d0] ss:$12 sps:$4 sm:$0xff]  }
 0x2b8   : > { %5316 = vmatmul.mubr.bf16.gmra.mxu0 %v13786_v49  ;;  %6017 = vmatpush1.bf16.msra.mxu1 %v11432_v44  ;;  %v11444_v49 = vld [vmem:[%s15189_s3 + $0x2e8] ss:$12 sps:$4 sm:$0xff]   ;;  %v11506_v44 = vld [vmem:[%s15189_s3 + $0x80] ss:$12 sps:$4 sm:$0xff]  }
 0x2b9   : > { %5958 = vmatpush1.bf16.msra.mxu0 %v11435_v17  ;;  %5985 = vmatprep.mubr.bf16.mxu0 %v13986_v24  ;;  %v11503_v17 = vld [vmem:[%s15189_s3 + $0xd8] ss:$12 sps:$4 sm:$0xff]  }
 0x2ba   : > { %6018 = vmatprep.subr.bf16.mxu1 %v11440_v3  ;;  %5959 = vmatprep.subr.bf16.mxu0 %v11443_v37  ;;  %v11507_v3 = vld [vmem:[%s15189_s3 + $0x128] ss:$12 sps:$4 sm:$0xff]   ;;  %v11510_v37 = vld [vmem:[%s15189_s3 + $0xc4] ss:$12 sps:$4 sm:$0xff]  }
 0x2bc   : > { %6019 = vmatpush1.bf16.msra.mxu1 %v11438_v15  ;;  %v11511_v15 = vld [vmem:[%s15189_s3 + $0x68] ss:$12 sps:$4 sm:$0xff]  }
 0x2bd   : > { %5960 = vmatpush1.bf16.msra.mxu0 %v11441_v63  ;;  %6020 = vmatprep.subr.bf16.mxu1 %v11446_v34  ;;  %v11508_v63 = vld [vmem:[%s15189_s3 + $0xc0] ss:$12 sps:$4 sm:$0xff]   ;;  %v11512_v34 = vld [vmem:[%s15189_s3 + $0x110] ss:$12 sps:$4 sm:$0xff]  }
 0x2be   : > { %5961 = vmatprep.subr.bf16.mxu0 %v11449_v23  ;;  %v11515_v23 = vld [vmem:[%s15189_s3 + $0x34c] ss:$12 sps:$4 sm:$0xff]  }
 0x2c0   : > { %6021 = vmatpush2.bf16.msra.mxu1 %v11444_v49  ;;  %v11516_v49 = vld [vmem:[%s15189_s3 + $0x50] ss:$12 sps:$4 sm:$0xff]  }
 0x2c1   : > { %5962 = vmatpush1.bf16.msra.mxu0 %v11447_v42  ;;  %6022 = vmatprep.subr.bf16.mxu1 %v11452_v52  ;;  %v4086_v42 = vld [vmem:[#allocation3 + $0x58] sm:$0x3] }
 0x2c2   : > { %5963 = vmatprep.subr.bf16.mxu0 %v11455_v5  ;;  %v11513_v52 = vld [vmem:[%s15189_s3 + $0x348] ss:$12 sps:$4 sm:$0xff]  }
 0x2c4   : > { %6023 = vmatpush2.bf16.msra.mxu1 %v11450_v30  ;;  %v11517_v30 = vld [vmem:[%s15189_s3 + $0xf8] ss:$12 sps:$4 sm:$0xff]  }
 0x2c5   : > { %5964 = vmatpush1.bf16.msra.mxu0 %v11453_v36  ;;  %6024 = vmatprep.subr.bf16.mxu1 %v11458_v29  ;;  %v11520_v36 = vld [vmem:[%s15189_s3 + $0x334] ss:$12 sps:$4 sm:$0xff]   ;;  %v4096_v29 = vpack.c.bf16 %v4086_v42, %v4086_v42 }
 0x2c6   : > { %5965 = vmatprep.subr.bf16.mxu0 %v11461_v18  ;;  %v11521_v18 = vld [vmem:[%s15189_s3 + $0x38] ss:$12 sps:$4 sm:$0xff]   ;;  %v11563_v42 = vld [vmem:[%s15189_s3 + $0x188] ss:$12 sps:$4 sm:$0xff]  }
 0x2c8   : > { %6025 = vmatpush2.bf16.msra.mxu1 %v11456_v40  ;;  %v11522_v40 = vld [vmem:[%s15189_s3 + $0xe0] ss:$12 sps:$4 sm:$0xff]  }
 0x2c9   : > { %5966 = vmatpush1.bf16.msra.mxu0 %v11459_v0  ;;  %6026 = vmatprep.subr.bf16.mxu1 %v11464_v19  ;;  %v11525_v0 = vld [vmem:[%s15189_s3 + $0x31c] ss:$12 sps:$4 sm:$0xff]   ;;  %v4085_v19 = vld [vmem:[#allocation3 + $0x50] sm:$0x3] }
 0x2ca   : > { %5967 = vmatprep.subr.bf16.mxu0 %v11467_v46  ;;  %v11526_v46 = vld [vmem:[%s15189_s3 + $0x20] ss:$12 sps:$4 sm:$0xff]  }
 0x2cc   : > { %6027 = vmatpush2.bf16.msra.mxu1 %v11462_v57  ;;  %v11523_v57 = vld [vmem:[%s15189_s3 + $0x318] ss:$12 sps:$4 sm:$0xff]  }
 0x2cd   : > { %5968 = vmatpush1.bf16.msra.mxu0 %v11465_v50  ;;  %6028 = vmatprep.subr.bf16.mxu1 %v11470_v33  ;;  %v11527_v50 = vld [vmem:[%s15189_s3 + $0xc8] ss:$12 sps:$4 sm:$0xff]   ;;  %v4095_v33 = vpack.c.bf16 %v4085_v19, %v4085_v19 }
 0x2ce   : > { %5969 = vmatprep.subr.bf16.mxu0 %v11473_v62  ;;  %v11530_v62 = vld [vmem:[%s15189_s3 + $0x304] ss:$12 sps:$4 sm:$0xff]  }
 0x2d0   : > { %6029 = vmatpush2.bf16.msra.mxu1 %v11468_v21  ;;  %v11531_v21 = vld [vmem:[%s15189_s3 + $0x8] ss:$12 sps:$4 sm:$0xff]  }
 0x2d1   : > { %5970 = vmatpush2.bf16.msra.mxu0 %v11471_v25  ;;  %6030 = vmatprep.subr.bf16.mxu1 %v11476_v41  ;;  %v11528_v25 = vld [vmem:[%s15189_s3 + $0x300] ss:$12 sps:$4 sm:$0xff]   ;;  %v11532_v41 = vld [vmem:[%s15189_s3 + $0x350] ss:$12 sps:$4 sm:$0xff]  }
 0x2d2   : > { %5971 = vmatprep.subr.bf16.mxu0 %v11479_v20  ;;  %v11533_v20 = vld [vmem:[%s15189_s3 + $0x2f0] ss:$12 sps:$4 sm:$0xff]  }
 0x2d4   : > { %6031 = vmatpush2.bf16.msra.mxu1 %v11474_v56  ;;  %v4079_v56 = vld [vmem:[#allocation3 + $0x20] sm:$0xff] }
 0x2d5   : > { %5972 = vmatpush2.bf16.msra.mxu0 %v11477_v54  ;;  %6032 = vmatprep.subr.bf16.mxu1 %v11482_v32  ;;  %v11534_v54 = vld [vmem:[%s15189_s3 + $0x230] ss:$12 sps:$4 sm:$0xff]   ;;  %v4094_v32 = vpack.c.bf16 %v13834_v14, %v4079_v56  ;;  %v11538_v14 = vld [vmem:[%s15189_s3 + $0x320] ss:$12 sps:$4 sm:$0xff]  }
 0x2d6   : > { %5973 = vmatprep.subr.bf16.mxu0 %v11485_v58  ;;  %v11535_v58 = vld [vmem:[%s15189_s3 + $0x338] ss:$12 sps:$4 sm:$0xff]  }
 0x2d8   : > { %6033 = vmatpush2.bf16.msra.mxu1 %v11480_v61  ;;  %v11536_v61 = vld [vmem:[%s15189_s3 + $0x2d8] ss:$12 sps:$4 sm:$0xff]  }
 0x2d9   : > { %5974 = vmatpush2.bf16.msra.mxu0 %v11483_v26  ;;  %6034 = vmatprep.subr.bf16.mxu1 %v11488_v55  ;;  %v11537_v26 = vld [vmem:[%s15189_s3 + $0x218] ss:$12 sps:$4 sm:$0xff]   ;;  %v11539_v55 = vld [vmem:[%s15189_s3 + $0x2c0] ss:$12 sps:$4 sm:$0xff]  }
 0x2da   : > { %5975 = vmatprep.subr.bf16.mxu0 %v11491_v6  ;;  %v4089_v6 = vld [vmem:[#allocation3 + $0x70] sm:$0x3] }
 0x2dc   : > { %6035 = vmatpush2.bf16.msra.mxu1 %v11486_v12  ;;  %v11540_v12 = vld [vmem:[%s15189_s3 + $0x200] ss:$12 sps:$4 sm:$0xff]  }
 0x2dd   : > { %5976 = vmatpush2.bf16.msra.mxu0 %v11489_v31  ;;  %10531 = vmatprep.subr.bf16.mxu1 %v11492_v38  ;;  %v6258_v31 = vld [vmem:[#allocation3 + $0x68] sm:$0xf]  ;;  %v4099_v38 = vpack.c.bf16 %v4089_v6, %v4089_v6 }
 0x2de   : > { %5977 = vmatprep.subr.bf16.mxu0 %v11495_v51  ;;  %v11542_v51 = vld [vmem:[%s15189_s3 + $0x2a8] ss:$12 sps:$4 sm:$0xff]  }
 0x2df   : > { %6037 = vmatmul.mubr.bf16.vlgmr.msra.gmra.mxu1 %v14102_v47 }
 0x2e0   : > { %6046 = vmatprep.mubr.bf16.mxu1 %v14110_v11  ;;  %10532 = vmatpush3.bf16.msra.mxu1 %v11496_v27  ;;  %v6268_v27 = vpack.c.bf16 %v6258_v31, %v6258_v31 }
 0x2e1   : > { %5978 = vmatpush2.bf16.msra.mxu0 %v11493_v39  ;;  %10533 = vmatprep.subr.bf16.mxu1 %v11497_v22  ;;  %v11543_v39 = vld [vmem:[%s15189_s3 + $0x1e8] ss:$12 sps:$4 sm:$0xff]   ;;  %v11546_v22 = vld [vmem:[%s15189_s3 + $0x8ec] ss:$12 sps:$4 sm:$0xff]  }
 0x2e2   : > { %5979 = vmatprep.subr.bf16.mxu0 %v11500_v13  ;;  %v11547_v13 = vld [vmem:[%s15189_s3 + $0x290] ss:$12 sps:$4 sm:$0xff]  }
 0x2e4   : > { %10534 = vmatpush3.bf16.msra.mxu1 %v11501_v8  ;;  %v6263_v8 = vpack.c.bf16 %v13710_v48, %v6253_v1  ;;  %v11551_v48 = vld [vmem:[%s15189_s3 + $0x8d4] ss:$12 sps:$4 sm:$0xff]  }
 0x2e5   : > { %5980 = vmatpush2.bf16.msra.mxu0 %v11498_v35  ;;  %10535 = vmatprep.subr.bf16.mxu1 %v11502_v16  ;;  %v14250_v35 = vrot.slane %v6268_v27, 1  ;;  %v11597_v27 = vld [vmem:[%s15189_s3 + $0x6f0] ss:$12 sps:$4 sm:$0xff]  }
 0x2e6   : > { %5981 = vmatprep.subr.bf16.mxu0 %v11505_v28  ;;  %v6434_v16 = vrot.slane %v6263_v8, 1  ;;  %v11552_v28 = vld [vmem:[%s15189_s3 + $0x278] ss:$12 sps:$4 sm:$0xff]   ;;  %v11605_v8 = vld [vmem:[%s15189_s3 + $0x6dc] ss:$12 sps:$4 sm:$0xff]  }
 0x2e7   : > { %6047 = vmatmul.mubr.bf16.gmra.mxu1 %v14132_v45 }
 0x2e8   : > { %10536 = vmatpush3.bf16.msra.mxu1 %v11506_v44  ;;  %6138 = vmatprep.mubr.bf16.mxu1 %v13986_v24  ;;  %v4075_v24 = vld [vmem:[#allocation3] sm:$0xff]  ;;  %v14267_v44 = vsel %vm1916_vm2, %v6434_v16, %v14250_v35 }
 0x2e9   : > { %5982 = vmatpush2.bf16.msra.mxu0 %v11503_v17  ;;  %10537 = vmatprep.subr.bf16.mxu1 %v11507_v3  ;;  %v4090_v5 = vpack.c.bf16 %v13698_v10, %v4075_v24  ;;  %v11518_v10 = vld [vmem:[%s15189_s3 + $0x330] ss:$12 sps:$4 sm:$0xff]   ;;  %v11553_v3 = vld [vmem:[%s15189_s3 + $0x1b8] ss:$12 sps:$4 sm:$0xff]   ;;  %v11562_v24 = vld [vmem:[%s15189_s3 + $0x248] ss:$12 sps:$4 sm:$0xff]  }
 0x2ea   : > { %5983 = vmatprep.subr.bf16.mxu0 %v11510_v37  ;;  %v11549_v17 = vld [vmem:[%s15189_s3 + $0x8d0] ss:$12 sps:$4 sm:$0xff]  }
 0x2eb   : > { %v11556_v37 = vld [vmem:[%s15189_s3 + $0x8bc] ss:$12 sps:$4 sm:$0xff]  }
 0x2ec   : > { %10538 = vmatpush3.bf16.msra.mxu1 %v11511_v15  ;;  %v11557_v15 = vld [vmem:[%s15189_s3 + $0x260] ss:$12 sps:$4 sm:$0xff]  }
 0x2ed   : > { %5984 = vmatpush2.bf16.msra.mxu0 %v11508_v63  ;;  %10539 = vmatprep.subr.bf16.mxu1 %v11512_v34  ;;  %v11554_v63 = vld [vmem:[%s15189_s3 + $0x8b8] ss:$12 sps:$4 sm:$0xff]   ;;  %v11558_v34 = vld [vmem:[%s15189_s3 + $0x1a0] ss:$12 sps:$4 sm:$0xff]  }
 0x2ee   : > { %6063 = vmatprep.subr.bf16.mxu0 %v11515_v23  ;;  %v11561_v23 = vld [vmem:[%s15189_s3 + $0x8a4] ss:$12 sps:$4 sm:$0xff]  }
 0x2f0   : > { %5986 = vmatmul.mubr.bf16.vlgmr.msra.gmra.mxu0 %v4090_v5  ;;  %10540 = vmatpush3.bf16.msra.mxu1 %v11516_v49  ;;  %v11559_v49 = vld [vmem:[%s15189_s3 + $0x8a0] ss:$12 sps:$4 sm:$0xff]  }
 0x2f1   : > { %5995 = vmatprep.mubr.bf16.mxu0 %v4096_v29  ;;  %6064 = vmatpush1.bf16.msra.mxu0 %v11513_v52  ;;  %v11566_v52 = vld [vmem:[%s15189_s3 + $0x88c] ss:$12 sps:$4 sm:$0xff]  }
 0x2f2   : > { %10541 = vmatprep.subr.bf16.mxu1 %v11517_v30  ;;  %6065 = vmatprep.subr.bf16.mxu0 %v11520_v36  ;;  %v11564_v30 = vld [vmem:[%s15189_s3 + $0x888] ss:$12 sps:$4 sm:$0xff]  }
 0x2f3   : > { %v11567_v36 = vld [vmem:[%s15189_s3 + $0x768] ss:$12 sps:$4 sm:$0xff]  }
 0x2f4   : > { %10542 = vmatpush3.bf16.msra.mxu1 %v11521_v18  ;;  %v11572_v18 = vld [vmem:[%s15189_s3 + $0x874] ss:$12 sps:$4 sm:$0xff]  }
 0x2f5   : > { %6066 = vmatpush1.bf16.msra.mxu0 %v11518_v10  ;;  %10543 = vmatprep.subr.bf16.mxu1 %v11522_v40  ;;  %v11575_v10 = vld [vmem:[%s15189_s3 + $0x754] ss:$12 sps:$4 sm:$0xff]   ;;  %v6251_v40 = vld [vmem:[#allocation3 + $0x8] sm:$0xfc] }
 0x2f6   : > { %6067 = vmatprep.subr.bf16.mxu0 %v11525_v0  ;;  %v11570_v0 = vld [vmem:[%s15189_s3 + $0x870] ss:$12 sps:$4 sm:$0xff]  }
 0x2f8   : > { %5996 = vmatmul.mubr.bf16.gmra.mxu0 %v4095_v33  ;;  %10544 = vmatpush3.bf16.msra.mxu1 %v11526_v46  ;;  %v11573_v46 = vld [vmem:[%s15189_s3 + $0x750] ss:$12 sps:$4 sm:$0xff]  }
 0x2f9   : > { %6068 = vmatpush1.bf16.msra.mxu0 %v11523_v57  ;;  %10545 = vmatprep.subr.bf16.mxu1 %v11527_v50  ;;  %v11578_v57 = vld [vmem:[%s15189_s3 + $0x85c] ss:$12 sps:$4 sm:$0xff]   ;;  %v11861_v50 = vld [vmem:[#allocation3 + $0x30] sm:$0xff] }
 0x2fa   : > { %6069 = vmatprep.subr.bf16.mxu0 %v11530_v62  ;;  %6087 = vmatprep.mubr.bf16.mxu0 %v11874_v59 }
 0x2fc   : > { %10546 = vmatpush3.bf16.msra.mxu1 %v11531_v21  ;;  %v11579_v21 = vld [vmem:[%s15189_s3 + $0x738] ss:$12 sps:$4 sm:$0xff]  }
 0x2fd   : > { %6070 = vmatpush1.bf16.msra.mxu0 %v11528_v25  ;;  %10667 = vmatprep.subr.bf16.mxu1 %v11532_v41 }
 0x2fe   : > { %10559 = vmatprep.subr.bf16.mxu0 %v11533_v20  ;;  %v11587_v20 = vld [vmem:[%s15189_s3 + $0x724] ss:$12 sps:$4 sm:$0xff]  }
 0x2ff   : > { %6139 = vmatmul.mubr.bf16.vlgmr.msra.gmra.mxu1 %v4090_v5  ;;  %v11569_v5 = vld [vmem:[%s15189_s3 + $0x76c] ss:$12 sps:$4 sm:$0xff]  }
 0x300   : > { %9880 = vmatmul.mubr.msk.bf16.vlgmr.msra.gmra.mxu0 %vm3980_vm8, %v4094_v32  ;;  %6146 = vmatprep.mubr.bf16.mxu1 %v4096_v29  ;;  %v6256_v29 = vld [vmem:[#allocation3 + $0x58] sm:$0xf] }
 0x301   : > { %10668 = vmatpush3.bf16.msra.mxu1 %v11532_v41  ;;  %10560 = vmatpush3.bf16.msra.mxu0 %v11534_v54  ;;  %v6266_v19 = vpack.c.bf16 %v6256_v29, %v6256_v29  ;;  %v11584_v41 = vld [vmem:[%s15189_s3 + $0x844] ss:$12 sps:$4 sm:$0xff]   ;;  %v11582_v54 = vld [vmem:[%s15189_s3 + $0x840] ss:$12 sps:$4 sm:$0xff]  }
 0x302   : > { %10669 = vmatprep.subr.bf16.mxu1 %v11535_v58  ;;  %10561 = vmatprep.subr.bf16.mxu0 %v11536_v61  ;;  %v11588_v61 = vld [vmem:[%s15189_s3 + $0x9a8] ss:$12 sps:$4 sm:$0xff]   ;;  %v11617_v29 = vld [vmem:[%s15189_s3 + $0x82c] ss:$12 sps:$4 sm:$0xff]  }
 0x303   : > { %6097 = vmatprep.mubr.bf16.mxu0 %v11874_v59  ;;  %v14335_v62 = vrot.slane %v6266_v19, 1  ;;  %v11620_v19 = vld [vmem:[%s15189_s3 + $0x934] ss:$12 sps:$4 sm:$0xff]  }
 0x305   : > { %10670 = vmatpush3.bf16.msra.mxu1 %v11535_v58  ;;  %10562 = vmatpush3.bf16.msra.mxu0 %v11537_v26  ;;  %v11593_v58 = vld [vmem:[%s15189_s3 + $0x70c] ss:$12 sps:$4 sm:$0xff]   ;;  %v11591_v26 = vld [vmem:[%s15189_s3 + $0x708] ss:$12 sps:$4 sm:$0xff]  }
 0x306   : > { %10671 = vmatprep.subr.bf16.mxu1 %v11538_v14  ;;  %10563 = vmatprep.subr.bf16.mxu0 %v11539_v55 }
 0x307   : > { %6147 = vmatmul.mubr.bf16.gmra.mxu1 %v4095_v33  ;;  %v6261_v33 = vpack.c.bf16 %v11861_v50, %v6251_v40  ;;  %v11612_v40 = vld [vmem:[%s15189_s3 + $0x948] ss:$12 sps:$4 sm:$0xff]  }
 0x308   : > { %9881 = vmatmul.mubr.msk.bf16.gmra.mxu0 %vm3980_vm8, %v4099_v38  ;;  %10675 = vmatprep.mubr.msk.bf16.mxu1 %vm3980_vm8, %v4094_v32  ;;  %v11585_v32 = vld [vmem:[%s15189_s3 + $0x720] ss:$12 sps:$4 sm:$0xff]   ;;  %v11626_v50 = vld [vmem:[%s15189_s3 + $0x91c] ss:$12 sps:$4 sm:$0xff]  }
 0x309   : > { %10672 = vmatpush3.bf16.msra.mxu1 %v11538_v14  ;;  %10564 = vmatpush3.bf16.msra.mxu0 %v11540_v12  ;;  %v6428_v25 = vrot.slane %v6261_v33, 1  ;;  %v11596_v14 = vld [vmem:[%s15189_s3 + $0x994] ss:$12 sps:$4 sm:$0xff]   ;;  %v11629_v33 = vld [vmem:[%s15189_s3 + $0x7fc] ss:$12 sps:$4 sm:$0xff]  }
 0x30a   : > { %6186 = vmatprep.mubr.bf16.mxu0 %v13904_v2  ;;  %10673 = vmatprep.subr.bf16.mxu1 %v11541_v53  ;;  %v11544_v2 = vld [vmem:[%s15189_s3 + $0x8e8] ss:$12 sps:$4 sm:$0xff]  }
 0x30b   : > { %10565 = vmatprep.subr.bf16.mxu0 %v11542_v51  ;;  %v14349_v56 = vsel %vm1916_vm2, %v6428_v25, %v14335_v62  ;;  %v11599_v12 = vld [vmem:[%s15189_s3 + $0x6f4] ss:$12 sps:$4 sm:$0xff]   ;;  %v11594_v51 = vld [vmem:[%s15189_s3 + $0x990] ss:$12 sps:$4 sm:$0xff]   ;;  %v11627_v25 = vld [vmem:[%s15189_s3 + $0x7f8] ss:$12 sps:$4 sm:$0xff]  }
 0x30d   : > { %10674 = vmatpush3.bf16.msra.mxu1 %v11541_v53  ;;  %10566 = vmatpush3.bf16.msra.mxu0 %v11543_v39  ;;  %v11602_v39 = vld [vmem:[%s15189_s3 + $0x97c] ss:$12 sps:$4 sm:$0xff]  }
 0x30e   : > { %7081 = vmatprep.subr.bf16.mxu1 %v11546_v22  ;;  %10567 = vmatprep.subr.bf16.mxu0 %v11547_v13 }
 0x310   : > { %10676 = vmatmul.mubr.msk.bf16.vlgmr.msra.gmra.mxu1 %vm3980_vm8, %v4099_v38 }
 0x311   : > { %7082 = vmatpush1.bf16.msra.mxu1 %v11544_v2  ;;  %7113 = vmatprep.mubr.bf16.mxu1 %v14267_v44 }
 0x312   : > { %10568 = vmatpush3.bf16.msra.mxu0 %v11548_v43  ;;  %7083 = vmatprep.subr.bf16.mxu1 %v11551_v48  ;;  %v11600_v48 = vld [vmem:[%s15189_s3 + $0x978] ss:$12 sps:$4 sm:$0xff]  }
 0x313   : > { %10569 = vmatprep.subr.bf16.mxu0 %v11552_v28 }
 0x315   : > { %7084 = vmatpush1.bf16.msra.mxu1 %v11549_v17  ;;  %v11603_v17 = vld [vmem:[%s15189_s3 + $0x6d8] ss:$12 sps:$4 sm:$0xff]  }
 0x316   : > { %10570 = vmatpush3.bf16.msra.mxu0 %v11553_v3  ;;  %7085 = vmatprep.subr.bf16.mxu1 %v11556_v37  ;;  %v11608_v3 = vld [vmem:[%s15189_s3 + $0x964] ss:$12 sps:$4 sm:$0xff]  }
 0x317   : > { %10571 = vmatprep.subr.bf16.mxu0 %v11557_v15 }
 0x319   : > { %7086 = vmatpush1.bf16.msra.mxu1 %v11554_v63  ;;  %v11611_v63 = vld [vmem:[%s15189_s3 + $0x6c4] ss:$12 sps:$4 sm:$0xff]  }
 0x31a   : > { %10572 = vmatpush3.bf16.msra.mxu0 %v11558_v34  ;;  %7087 = vmatprep.subr.bf16.mxu1 %v11561_v23 }
 0x31b   : > { %10573 = vmatprep.subr.bf16.mxu0 %v11562_v24 }
 0x31d   : > { %7088 = vmatpush1.bf16.msra.mxu1 %v11559_v49  ;;  %v11606_v49 = vld [vmem:[%s15189_s3 + $0x960] ss:$12 sps:$4 sm:$0xff]  }
 0x31e   : > { %10574 = vmatpush3.bf16.msra.mxu0 %v11563_v42  ;;  %7089 = vmatprep.subr.bf16.mxu1 %v11566_v52  ;;  %v11609_v52 = vld [vmem:[%s15189_s3 + $0x6c0] ss:$12 sps:$4 sm:$0xff]  }
 0x31f   : > { %7030 = vmatprep.subr.bf16.mxu0 %v11569_v5  ;;  %v11614_v5 = vld [vmem:[%s15189_s3 + $0x94c] ss:$12 sps:$4 sm:$0xff]  }
 0x321   : > { %6187 = vmatmul.mubr.bf16.vlgmr.msra.gmra.mxu0 %v14102_v47  ;;  %7090 = vmatpush1.bf16.msra.mxu1 %v11564_v30  ;;  %v11581_v47 = vld [vmem:[%s15189_s3 + $0x73c] ss:$12 sps:$4 sm:$0xff]  }
 0x322   : > { %6194 = vmatprep.mubr.bf16.mxu0 %v14110_v11  ;;  %7031 = vmatpush1.bf16.msra.mxu0 %v11567_v36  ;;  %v11576_v11 = vld [vmem:[%s15189_s3 + $0x858] ss:$12 sps:$4 sm:$0xff]  }
 0x323   : > { %7091 = vmatprep.subr.bf16.mxu1 %v11572_v18  ;;  %7032 = vmatprep.subr.bf16.mxu0 %v11575_v10 }
 0x325   : > { %7092 = vmatpush1.bf16.msra.mxu1 %v11570_v0  ;;  %v11615_v0 = vld [vmem:[%s15189_s3 + $0x828] ss:$12 sps:$4 sm:$0xff]  }
 0x326   : > { %7033 = vmatpush1.bf16.msra.mxu0 %v11573_v46  ;;  %7093 = vmatprep.subr.bf16.mxu1 %v11578_v57  ;;  %v11623_v46 = vld [vmem:[%s15189_s3 + $0x814] ss:$12 sps:$4 sm:$0xff]   ;;  %v11618_v57 = vld [vmem:[%s15189_s3 + $0x930] ss:$12 sps:$4 sm:$0xff]  }
 0x327   : > { %7034 = vmatprep.subr.bf16.mxu0 %v11581_v47  ;;  %v11621_v47 = vld [vmem:[%s15189_s3 + $0x810] ss:$12 sps:$4 sm:$0xff]  }
 0x329   : > { %6195 = vmatmul.mubr.bf16.gmra.mxu0 %v14132_v45  ;;  %7094 = vmatpush1.bf16.msra.mxu1 %v11576_v11  ;;  %v11590_v45 = vld [vmem:[%s15189_s3 + $0x9ac] ss:$12 sps:$4 sm:$0xff]   ;;  %v6257_v11 = vld [vmem:[#allocation3 + $0x60] sm:$0xf] }
 0x32a   : > { %7035 = vmatpush1.bf16.msra.mxu0 %v11579_v21  ;;  %7062 = vmatprep.mubr.bf16.mxu0 %v14349_v56  ;;  %v11624_v21 = vld [vmem:[%s15189_s3 + $0x918] ss:$12 sps:$4 sm:$0xff]  }
 0x32b   : > { %7095 = vmatprep.subr.bf16.mxu1 %v11584_v41  ;;  %7036 = vmatprep.subr.bf16.mxu0 %v11587_v20  ;;  %v11632_v41 = vld [vmem:[%s15189_s3 + $0x904] ss:$12 sps:$4 sm:$0xff]  }
 0x32c   : > { %v6252_v20 = vld [vmem:[#allocation3 + $0x10] sm:$0xfc] }
 0x32d   : > { %7096 = vmatpush1.bf16.msra.mxu1 %v11582_v54  ;;  %v11635_v54 = vld [vmem:[%s15189_s3 + $0x7e4] ss:$12 sps:$4 sm:$0xff]  }
 0x32e   : > { %7037 = vmatpush1.bf16.msra.mxu0 %v11585_v32  ;;  %7097 = vmatprep.subr.bf16.mxu1 %v11590_v45  ;;  %v5108_v55 = vpop.f32.mrf.mxu1  ;;  %v6267_v32 = vpack.c.bf16 %v6257_v11, %v6257_v11  ;;  %v11630_v45 = vld [vmem:[%s15189_s3 + $0x900] ss:$12 sps:$4 sm:$0xff]   ;;  %v11863_v11 = vld [vmem:[#allocation3 + $0x28] sm:$0xff] }
 0x32f   : > { %v5159_v6 = vpop.f32.mrf.mxu0  ;;  %7038 = vmatprep.subr.bf16.mxu0 %v11593_v58  ;;  %v11862_v58 = vld [vmem:[#allocation3 + $0x38] sm:$0xff] }
 0x330   : > { %v14376_v31 = vadd.f32 %v5159_v6, %v5108_v55  ;;  %v5110_v38 = vpop.f32.mrf.mxu1  ;;  %v14469_v55 = vrot.slane %v6267_v32, 1  ;;  %v11639_v6 = vld [vmem:[%s15189_s3 + $0x7cc] ss:$12 sps:$4 sm:$0xff]  }
 0x331   : > { %7098 = vmatpush2.bf16.msra.mxu1 %v11588_v61  ;;  %v5161_v53 = vpop.f32.mrf.mxu0  ;;  %v6262_v61 = vpack.c.bf16 %v11862_v58, %v6252_v20  ;;  %v11659_v20 = vld [vmem:[%s15189_s3 + $0xa0c] ss:$12 sps:$4 sm:$0xff]  }
 0x332   : > { %7039 = vmatpush1.bf16.msra.mxu0 %v11591_v26  ;;  %v14381_v1 = vadd.f32 %v5161_v53, %v5110_v38  ;;  %7099 = vmatprep.subr.bf16.mxu1 %v11596_v14  ;;  %v5112_v22 = vpop.f32.mrf.mxu1  ;;  %v11633_v26 = vld [vmem:[%s15189_s3 + $0x7e0] ss:$12 sps:$4 sm:$0xff]   ;;  %v11636_v14 = vld [vmem:[%s15189_s3 + $0x830] ss:$12 sps:$4 sm:$0xff]   ;;  %v11637_v53 = vld [vmem:[%s15189_s3 + $0x7c8] ss:$12 sps:$4 sm:$0xff]  }
 0x333   : > { %v5163_v13 = vpop.f32.mrf.mxu0  ;;  %7040 = vmatprep.subr.bf16.mxu0 %v11599_v12  ;;  %v6431_v12 = vrot.slane %v6262_v61, 1  ;;  %v11640_v38 = vld [vmem:[%s15189_s3 + $0x770] ss:$12 sps:$4 sm:$0xff]   ;;  %v11657_v61 = vld [vmem:[%s15189_s3 + $0xa08] ss:$12 sps:$4 sm:$0xff]  }
 0x334   : > { %v14392_v2 = vadd.f32 %v5163_v13, %v5112_v22  ;;  %v5114_v16 = vpop.f32.mrf.mxu1  ;;  %v11644_v13 = vld [vmem:[%s15189_s3 + $0x7b4] ss:$12 sps:$4 sm:$0xff]  }
 0x335   : > { %7100 = vmatpush2.bf16.msra.mxu1 %v11594_v51  ;;  %v5165_v43 = vpop.f32.mrf.mxu0  ;;  %v11641_v51 = vld [vmem:[%s15189_s3 + $0x818] ss:$12 sps:$4 sm:$0xff]  }
 0x336   : > { %7041 = vmatpush1.bf16.msra.mxu0 %v11597_v27  ;;  %v14397_v28 = vadd.f32 %v5165_v43, %v5114_v16  ;;  %7101 = vmatprep.subr.bf16.mxu1 %v11602_v39  ;;  %v5118_v37 = vpop.f32.mrf.mxu1  ;;  %v14485_v39 = vsel %vm1916_vm2, %v6431_v12, %v14469_v55 }
 0x337   : > { %v5169_v15 = vpop.f32.mrf.mxu0  ;;  %7042 = vmatprep.subr.bf16.mxu0 %v11605_v8 }
 0x338   : > { %v14408_v34 = vadd.f32 %v5169_v15, %v5118_v37  ;;  %v5120_v23 = vpop.f32.mrf.mxu1  ;;  %v11646_v37 = vld [vmem:[%s15189_s3 + $0x800] ss:$12 sps:$4 sm:$0xff]  }
 0x339   : > { %7102 = vmatpush2.bf16.msra.mxu1 %v11600_v48  ;;  %v5171_v24 = vpop.f32.mrf.mxu0  ;;  %v11645_v48 = vld [vmem:[%s15189_s3 + $0x758] ss:$12 sps:$4 sm:$0xff]  }
 0x33a   : > { %7043 = vmatpush1.bf16.msra.mxu0 %v11603_v17  ;;  %v14413_v42 = vadd.f32 %v5171_v24, %v5120_v23  ;;  %7103 = vmatprep.subr.bf16.mxu1 %v11608_v3  ;;  %v5122_v30 = vpop.f32.mrf.mxu1  ;;  %v11649_v23 = vld [vmem:[%s15189_s3 + $0x79c] ss:$12 sps:$4 sm:$0xff]  }
 0x33b   : > { %v5173_v36 = vpop.f32.mrf.mxu0  ;;  %7044 = vmatprep.subr.bf16.mxu0 %v11611_v63 }
 0x33c   : > { %v5123_v18 = vpop.f32.mrf.mxu1 }
 0x33d   : > { %7104 = vmatpush2.bf16.msra.mxu1 %v11606_v49  ;;  %v5174_v10 = vpop.f32.mrf.mxu0 }
 0x33e   : > { %7045 = vmatpush1.bf16.msra.mxu0 %v11609_v52  ;;  %7105 = vmatprep.subr.bf16.mxu1 %v11614_v5  ;;  %v11650_v52 = vld [vmem:[%s15189_s3 + $0x740] ss:$12 sps:$4 sm:$0xff]  }
 0x33f   : > { %7046 = vmatprep.subr.bf16.mxu0 %v11617_v29  ;;  %v6255_v5 = vld [vmem:[#allocation3 + $0x50] sm:$0xf]  ;;  %v11651_v29 = vld [vmem:[%s15189_s3 + $0x7e8] ss:$12 sps:$4 sm:$0xff]  }
 0x341   : > { %7106 = vmatpush2.bf16.msra.mxu1 %v11612_v40  ;;  %v11654_v40 = vld [vmem:[%s15189_s3 + $0x784] ss:$12 sps:$4 sm:$0xff]  }
 0x342   : > { %7047 = vmatpush2.bf16.msra.mxu0 %v11615_v0  ;;  %7107 = vmatprep.subr.bf16.mxu1 %v11620_v19  ;;  %v6250_v0 = vld [vmem:[#allocation3] sm:$0xfc]  ;;  %v6265_v19 = vpack.c.bf16 %v6255_v5, %v6255_v5 }
 0x343   : > { %7048 = vmatprep.subr.bf16.mxu0 %v11623_v46 }
 0x345   : > { %7108 = vmatpush2.bf16.msra.mxu1 %v11618_v57 }
 0x346   : > { %7049 = vmatpush2.bf16.msra.mxu0 %v11621_v47  ;;  %7109 = vmatprep.subr.bf16.mxu1 %v11626_v50  ;;  %v11655_v47 = vld [vmem:[%s15189_s3 + $0x728] ss:$12 sps:$4 sm:$0xff]  }
 0x347   : > { %7050 = vmatprep.subr.bf16.mxu0 %v11629_v33 }
 0x349   : > { %7110 = vmatpush2.bf16.msra.mxu1 %v11624_v21  ;;  %v6260_v21 = vpack.c.bf16 %v11863_v11, %v6250_v0  ;;  %v11680_v0 = vld [vmem:[%s15189_s3 + $0x998] ss:$12 sps:$4 sm:$0xff]   ;;  %v11683_v11 = vld [vmem:[%s15189_s3 + $0x980] ss:$12 sps:$4 sm:$0xff]  }
 0x34a   : > { %7051 = vmatpush2.bf16.msra.mxu0 %v11627_v25  ;;  %7111 = vmatprep.subr.bf16.mxu1 %v11632_v41 }
 0x34b   : > { %7052 = vmatprep.subr.bf16.mxu0 %v11635_v54  ;;  %v6425_v58 = vrot.slane %v6260_v21, 1 }
 0x34d   : > { %7112 = vmatpush2.bf16.msra.mxu1 %v11630_v45  ;;  %v11660_v45 = vld [vmem:[%s15189_s3 + $0x710] ss:$12 sps:$4 sm:$0xff]  }
 0x34e   : > { %7053 = vmatpush2.bf16.msra.mxu0 %v11633_v26  ;;  %10593 = vmatprep.subr.bf16.mxu1 %v11636_v14  ;;  %v10485_v27 = vpop.f32.mrf.mxu1  ;;  %v11661_v14 = vld [vmem:[%s15189_s3 + $0x7b8] ss:$12 sps:$4 sm:$0xff]  }
 0x34f   : > { %7054 = vmatprep.subr.bf16.mxu0 %v11639_v6  ;;  %v5210_v22 = vpop.f32.mrf.mxu0  ;;  %v11664_v6 = vld [vmem:[%s15189_s3 + $0x9f4] ss:$12 sps:$4 sm:$0xff]  }
 0x350   : > { %7114 = vmatmul.mubr.bf16.vlgmr.msra.gmra.mxu1 %v14485_v39  ;;  %v14492_v8 = vadd.f32 %v5210_v22, %v14376_v31  ;;  %v10486_v16 = vpop.f32.mrf.mxu1  ;;  %v11642_v31 = vld [vmem:[%s15189_s3 + $0x7b0] ss:$12 sps:$4 sm:$0xff]  }
 0x351   : > { %7123 = vmatprep.mubr.bf16.mxu1 %v14250_v35  ;;  %10594 = vmatpush3.bf16.msra.mxu1 %v11640_v38  ;;  %v5212_v43 = vpop.f32.mrf.mxu0  ;;  %v14498_v17 = vadd.f32 %v10486_v16, %v10485_v27  ;;  %v11666_v27 = vld [vmem:[%s15189_s3 + $0x7a0] ss:$12 sps:$4 sm:$0xff]  }
 0x352   : > { %7055 = vmatpush2.bf16.msra.mxu0 %v11637_v53  ;;  %v14501_v3 = vadd.f32 %v5212_v43, %v14381_v1  ;;  %10595 = vmatprep.subr.bf16.mxu1 %v11641_v51  ;;  %v10488_v15 = vpop.f32.mrf.mxu1  ;;  %v11665_v53 = vld [vmem:[%s15189_s3 + $0x6f8] ss:$12 sps:$4 sm:$0xff]   ;;  %v11662_v51 = vld [vmem:[%s15189_s3 + $0x9f0] ss:$12 sps:$4 sm:$0xff]   ;;  %v11670_v16 = vld [vmem:[%s15189_s3 + $0x6e0] ss:$12 sps:$4 sm:$0xff]  }
 0x353   : > { %7056 = vmatprep.subr.bf16.mxu0 %v11644_v13  ;;  %v5214_v63 = vpop.f32.mrf.mxu0  ;;  %v11669_v13 = vld [vmem:[%s15189_s3 + $0x9dc] ss:$12 sps:$4 sm:$0xff]   ;;  %v6259_v43 = vld [vmem:[#allocation3 + $0x70] sm:$0xf] }
 0x354   : > { %v14513_v24 = vadd.f32 %v5214_v63, %v14392_v2  ;;  %v10489_v1 = vpop.f32.mrf.mxu1  ;;  %v11647_v2 = vld [vmem:[%s15189_s3 + $0x798] ss:$12 sps:$4 sm:$0xff]   ;;  %v11675_v63 = vld [vmem:[%s15189_s3 + $0x6c8] ss:$12 sps:$4 sm:$0xff]  }
 0x355   : > { %10596 = vmatpush3.bf16.msra.mxu1 %v11645_v48  ;;  %v5216_v49 = vpop.f32.mrf.mxu0  ;;  %v14518_v30 = vadd.f32 %v10489_v1, %v10488_v15  ;;  %v11667_v48 = vld [vmem:[%s15189_s3 + $0x9d8] ss:$12 sps:$4 sm:$0xff]   ;;  %v6269_v15 = vpack.c.bf16 %v6259_v43, %v6259_v43  ;;  %v11672_v1 = vld [vmem:[%s15189_s3 + $0x9c0] ss:$12 sps:$4 sm:$0xff]   ;;  %v11695_v43 = vld [vmem:[%s15189_s3 + $0x848] ss:$12 sps:$4 sm:$0xff]  }
 0x356   : > { %7057 = vmatpush2.bf16.msra.mxu0 %v11642_v31  ;;  %v14521_v36 = vadd.f32 %v5216_v49, %v14397_v28  ;;  %10597 = vmatprep.subr.bf16.mxu1 %v11646_v37  ;;  %v10491_v18 = vpop.f32.mrf.mxu1  ;;  %v11671_v31 = vld [vmem:[%s15189_s3 + $0x788] ss:$12 sps:$4 sm:$0xff]   ;;  %v11674_v37 = vld [vmem:[%s15189_s3 + $0x9c4] ss:$12 sps:$4 sm:$0xff]  }
 0x357   : > { %7058 = vmatprep.subr.bf16.mxu0 %v11649_v23  ;;  %v5220_v10 = vpop.f32.mrf.mxu0  ;;  %v6254_v23 = vld [vmem:[#allocation3 + $0x20] sm:$0xfc] }
 0x358   : > { %7124 = vmatmul.mubr.bf16.gmra.mxu1 %v14469_v55  ;;  %v14534_v28 = vadd.f32 %v5220_v10, %v14408_v34  ;;  %v10492_v46 = vpop.f32.mrf.mxu1  ;;  %v11652_v34 = vld [vmem:[%s15189_s3 + $0x780] ss:$12 sps:$4 sm:$0xff]   ;;  %v11676_v49 = vld [vmem:[%s15189_s3 + $0xa10] ss:$12 sps:$4 sm:$0xff]  }
 0x359   : > { %10598 = vmatpush3.bf16.msra.mxu1 %v11650_v52  ;;  %7215 = vmatprep.mubr.bf16.mxu1 %v14349_v56  ;;  %v5222_v57 = vpop.f32.mrf.mxu0  ;;  %v14540_v50 = vadd.f32 %v10492_v46, %v10491_v18  ;;  %v11656_v56 = vld [vmem:[%s15189_s3 + $0x7d0] ss:$12 sps:$4 sm:$0xff]  }
 0x35a   : > { %7059 = vmatpush2.bf16.msra.mxu0 %v11647_v2  ;;  %v14543_v33 = vadd.f32 %v5222_v57, %v14413_v42  ;;  %10599 = vmatprep.subr.bf16.mxu1 %v11651_v29  ;;  %v10494_v25 = vpop.f32.mrf.mxu1  ;;  %v14554_v42 = vrot.slane %v6265_v19, 1  ;;  %v11864_v52 = vld [vmem:[#allocation3 + $0x48] sm:$0xff]  ;;  %v6438_v29 = vrot.slane %v6269_v15, 1 }
 0x35b   : > { %7060 = vmatprep.subr.bf16.mxu0 %v11654_v40  ;;  %v5224_v41 = vpop.f32.mrf.mxu0  ;;  %v6264_v5 = vpack.c.bf16 %v11864_v52, %v6254_v23  ;;  %v11677_v2 = vld [vmem:[%s15189_s3 + $0x9b0] ss:$12 sps:$4 sm:$0xff]   ;;  %v11679_v40 = vld [vmem:[%s15189_s3 + $0x9f8] ss:$12 sps:$4 sm:$0xff]  }
 0x35c   : > { %v10495_v54 = vpop.f32.mrf.mxu1  ;;  %v6427_v12 = vsel %vm1916_vm2, %v6425_v58, %v14554_v42  ;;  %v11678_v10 = vld [vmem:[%s15189_s3 + $0x8f0] ss:$12 sps:$4 sm:$0xff]   ;;  %v11684_v41 = vld [vmem:[%s15189_s3 + $0x8c0] ss:$12 sps:$4 sm:$0xff]  }
 0x35d   : > { %10600 = vmatpush3.bf16.msra.mxu1 %v11655_v47  ;;  %v5225_v32 = vpop.f32.mrf.mxu0  ;;  %v6437_v18 = vrot.slane %v6264_v5, 1  ;;  %v11681_v47 = vld [vmem:[%s15189_s3 + $0x8d8] ss:$12 sps:$4 sm:$0xff]   ;;  %v11685_v54 = vld [vmem:[%s15189_s3 + $0x9c8] ss:$12 sps:$4 sm:$0xff]  }
 0x35e   : > { %7061 = vmatpush2.bf16.msra.mxu0 %v11652_v34  ;;  %10601 = vmatprep.subr.bf16.mxu1 %v11656_v56  ;;  %v11682_v56 = vld [vmem:[%s15189_s3 + $0x9e0] ss:$12 sps:$4 sm:$0xff]   ;;  %v11704_v15 = vld [vmem:[%s15191_s5 + $0x174] ss:$8 sps:$4 sm:$0xff]   ;;  %v11708_v5 = vld [vmem:[%s15191_s5 + $0x150] ss:$8 sps:$4 sm:$0xff]  }
 0x35f   : > { %v14562_v26 = vpop.f32.mrf.mxu1  ;;  %7140 = vmatprep.subr.bf16.mxu0 %v11659_v20  ;;  %v6439_v46 = vsel %vm1916_vm2, %v6437_v18, %v6438_v29 }
 0x361   : > { %7063 = vmatmul.mubr.bf16.vlgmr.msra.gmra.mxu0 %v6427_v12  ;;  %10602 = vmatpush3.bf16.msra.mxu1 %v11660_v45  ;;  %v14572_v38 = vpop.f32.mrf.mxu1  ;;  %v11686_v45 = vld [vmem:[%s15189_s3 + $0x968] ss:$12 sps:$4 sm:$0xff]  }
 0x362   : > { %7072 = vmatprep.mubr.bf16.mxu0 %v14335_v62  ;;  %7141 = vmatpush1.bf16.msra.mxu0 %v11657_v61 }
 0x363   : > { %v10666_v22 = vpop.f32.mrf.mxu1  ;;  %10603 = vmatprep.subr.bf16.mxu1 %v11661_v14  ;;  %7142 = vmatprep.subr.bf16.mxu0 %v11664_v6  ;;  %v11687_v6 = vld [vmem:[%s15189_s3 + $0x8a8] ss:$12 sps:$4 sm:$0xff]  }
 0x365   : > { %10604 = vmatpush3.bf16.msra.mxu1 %v11665_v53  ;;  %v5360_v61 = vpop.f32.mrf.mxu1 }
 0x366   : > { %7143 = vmatpush1.bf16.msra.mxu0 %v11662_v51  ;;  %10605 = vmatprep.subr.bf16.mxu1 %v11666_v27  ;;  %v11689_v27 = vld [vmem:[%s15189_s3 + $0x890] ss:$12 sps:$4 sm:$0xff]  }
 0x367   : > { %7144 = vmatprep.subr.bf16.mxu0 %v11669_v13  ;;  %v11692_v13 = vld [vmem:[%s15189_s3 + $0x920] ss:$12 sps:$4 sm:$0xff]  }
 0x369   : > { %7073 = vmatmul.mubr.bf16.gmra.mxu0 %v14554_v42  ;;  %10606 = vmatpush3.bf16.msra.mxu1 %v11670_v16  ;;  %v11694_v16 = vld [vmem:[%s15189_s3 + $0x908] ss:$12 sps:$4 sm:$0xff]  }
 0x36a   : > { %7145 = vmatpush1.bf16.msra.mxu0 %v11667_v48  ;;  %10607 = vmatprep.subr.bf16.mxu1 %v11671_v31  ;;  %v11696_v48 = vld [vmem:[%s15191_s5 + $0x190] ss:$8 sps:$4 sm:$0xff]   ;;  %v11698_v31 = vld [vmem:[%s15191_s5 + $0x194] ss:$8 sps:$4 sm:$0xff]  }
 0x36b   : > { %7146 = vmatprep.subr.bf16.mxu0 %v11674_v37  ;;  %7164 = vmatprep.mubr.bf16.mxu0 %v11874_v59  ;;  %v11699_v37 = vld [vmem:[%s15191_s5 + $0x180] ss:$8 sps:$4 sm:$0xff]  }
 0x36d   : > { %10608 = vmatpush3.bf16.msra.mxu1 %v11675_v63 }
 0x36e   : > { %7147 = vmatpush1.bf16.msra.mxu0 %v11672_v1  ;;  %10679 = vmatprep.subr.bf16.mxu1 %v11676_v49  ;;  %v11705_v1 = vld [vmem:[%s15191_s5 + $0x160] ss:$8 sps:$4 sm:$0xff]  }
 0x36f   : > { %10621 = vmatprep.subr.bf16.mxu0 %v11677_v2  ;;  %v11710_v2 = vld [vmem:[%s15191_s5 + $0x154] ss:$8 sps:$4 sm:$0xff]  }
 0x370   : > { %7216 = vmatmul.mubr.bf16.vlgmr.msra.gmra.mxu1 %v6427_v12  ;;  %v10513_v19 = vpop.f32.mrf.mxu0 }
 0x371   : > { %10136 = vmatmul.mubr.msk.bf16.vlgmr.msra.gmra.mxu0 %vm3980_vm8, %v6439_v46  ;;  %7223 = vmatprep.mubr.bf16.mxu1 %v14335_v62 }
 0x372   : > { %10680 = vmatpush3.bf16.msra.mxu1 %v11676_v49  ;;  %10622 = vmatpush3.bf16.msra.mxu0 %v11678_v10  ;;  %v10514_v57 = vpop.f32.mrf.mxu0  ;;  %v11711_v10 = vld [vmem:[%s15191_s5 + $0x140] ss:$8 sps:$4 sm:$0xff]  }
 0x373   : > { %v10515_v34 = vadd.f32 %v10514_v57, %v10513_v19  ;;  %10681 = vmatprep.subr.bf16.mxu1 %v11679_v40  ;;  %10623 = vmatprep.subr.bf16.mxu0 %v11680_v0  ;;  %v11716_v57 = vld [vmem:[%s15191_s5 + $0x134] ss:$8 sps:$4 sm:$0xff]  }
 0x374   : > { %v10516_v21 = vpop.f32.mrf.mxu0  ;;  %7174 = vmatprep.mubr.bf16.mxu0 %v11874_v59 }
 0x375   : > { %v5310_v62 = vadd.f32 %v10515_v34, %v14498_v17 }
 0x376   : > { %10682 = vmatpush3.bf16.msra.mxu1 %v11679_v40  ;;  %10624 = vmatpush3.bf16.msra.mxu0 %v11681_v47  ;;  %v10517_v25 = vpop.f32.mrf.mxu0  ;;  %v11713_v40 = vld [vmem:[%s15191_s5 + $0x144] ss:$8 sps:$4 sm:$0xff]  }
 0x377   : > { %v10518_v20 = vadd.f32 %v10517_v25, %v10516_v21  ;;  %10683 = vmatprep.subr.bf16.mxu1 %v11682_v56  ;;  %10625 = vmatprep.subr.bf16.mxu0 %v11683_v11  ;;  %v14643_v32 = vadd.f32 %v14572_v38, %v5310_v62 }
 0x378   : > { %7224 = vmatmul.mubr.bf16.gmra.mxu1 %v14554_v42  ;;  %v10519_v17 = vpop.f32.mrf.mxu0 }
 0x379   : > { %v5313_v58 = vadd.f32 %v10518_v20, %v14518_v30  ;;  %10137 = vmatmul.mubr.msk.bf16.gmra.mxu0 %vm3980_vm8, %v6438_v29  ;;  %10687 = vmatprep.mubr.msk.bf16.mxu1 %vm3980_vm8, %v6439_v46  ;;  %v11688_v30 = vld [vmem:[%s15189_s3 + $0x950] ss:$12 sps:$4 sm:$0xff]  }
 0x37a   : > { %10684 = vmatpush3.bf16.msra.mxu1 %v11682_v56  ;;  %10626 = vmatpush3.bf16.msra.mxu0 %v11684_v41  ;;  %v10520_v14 = vpop.f32.mrf.mxu0  ;;  %v11714_v46 = vld [vmem:[%s15191_s5 + $0x130] ss:$8 sps:$4 sm:$0xff]  }
 0x37b   : > { %7263 = vmatprep.mubr.bf16.mxu0 %v14267_v44  ;;  %v10521_v42 = vadd.f32 %v10520_v14, %v10519_v17  ;;  %10685 = vmatprep.subr.bf16.mxu1 %v11685_v54  ;;  %v14659_v12 = vadd.f32 %v5360_v61, %v5313_v58  ;;  %v11690_v44 = vld [vmem:[%s15189_s3 + $0x938] ss:$12 sps:$4 sm:$0xff]  }
 0x37c   : > { %v10522_v38 = vpop.f32.mrf.mxu0  ;;  %10627 = vmatprep.subr.bf16.mxu0 %v11686_v45 }
 0x37d   : > { %v5318_v53 = vadd.f32 %v10521_v42, %v14540_v50  ;;  %v11691_v50 = vld [vmem:[%s15189_s3 + $0x878] ss:$12 sps:$4 sm:$0xff]  }
 0x37e   : > { %10686 = vmatpush3.bf16.msra.mxu1 %v11685_v54  ;;  %10628 = vmatpush3.bf16.msra.mxu0 %v11687_v6  ;;  %v10523_v51 = vpop.f32.mrf.mxu0 }
 0x37f   : > { %10629 = vmatprep.subr.bf16.mxu0 %v11688_v30  ;;  %v14669_v22 = vadd.f32 %v14562_v26, %v5318_v53  ;;  %v11693_v26 = vld [vmem:[%s15189_s3 + $0x860] ss:$12 sps:$4 sm:$0xff]   ;;  %v11722_v53 = vld [vmem:[%s15191_s5 + $0x214] ss:$8 sps:$4 sm:$0xff]  }
 0x381   : > { %10688 = vmatmul.mubr.msk.bf16.vlgmr.msra.gmra.mxu1 %vm3980_vm8, %v6438_v29 }
 0x382   : > { %10630 = vmatpush3.bf16.msra.mxu0 %v11689_v27  ;;  %7842 = vmatprep.mubr.bf16.mxu1 %v11874_v59 }
 0x383   : > { %10631 = vmatprep.subr.bf16.mxu0 %v11690_v44 }
 0x386   : > { %10632 = vmatpush3.bf16.msra.mxu0 %v11691_v50 }
 0x387   : > { %10633 = vmatprep.subr.bf16.mxu0 %v11692_v13 }
 0x38a   : > { %10634 = vmatpush3.bf16.msra.mxu0 %v11693_v26 }
 0x38b   : > { %10635 = vmatprep.subr.bf16.mxu0 %v11694_v16  ;;  %v11723_v16 = vld [vmem:[%s15191_s5 + $0x200] ss:$8 sps:$4 sm:$0xff]  }
 0x38e   : > { %10636 = vmatpush3.bf16.msra.mxu0 %v11695_v43  ;;  %v11725_v43 = vld [vmem:[%s15191_s5 + $0x204] ss:$8 sps:$4 sm:$0xff]  }
 0x38f   : > { %7759 = vmatprep.subr.bf16.mxu0 %v11698_v31 }
 0x391   : > { %7264 = vmatmul.mubr.bf16.vlgmr.msra.gmra.mxu0 %v14485_v39  ;;  %v11701_v39 = vld [vmem:[%s15191_s5 + $0x184] ss:$8 sps:$4 sm:$0xff]  }
 0x392   : > { %7271 = vmatprep.mubr.bf16.mxu0 %v14250_v35  ;;  %7760 = vmatpush1.bf16.msra.mxu0 %v11696_v48  ;;  %v11702_v35 = vld [vmem:[%s15191_s5 + $0x170] ss:$8 sps:$4 sm:$0xff]  }
 0x393   : > { %7761 = vmatprep.subr.bf16.mxu0 %v11701_v39 }
 0x396   : > { %7762 = vmatpush1.bf16.msra.mxu0 %v11699_v37 }
 0x397   : > { %7763 = vmatprep.subr.bf16.mxu0 %v11704_v15 }
 0x399   : > { %7272 = vmatmul.mubr.bf16.gmra.mxu0 %v14469_v55  ;;  %v11707_v55 = vld [vmem:[%s15191_s5 + $0x164] ss:$8 sps:$4 sm:$0xff]  }
 0x39a   : > { %7764 = vmatpush1.bf16.msra.mxu0 %v11702_v35  ;;  %v11728_v35 = vld [vmem:[%s15191_s5 + $0x1f4] ss:$8 sps:$4 sm:$0xff]  }
 0x39b   : > { %7765 = vmatprep.subr.bf16.mxu0 %v11707_v55 }
 0x39e   : > { %7766 = vmatpush1.bf16.msra.mxu0 %v11705_v1 }
 0x39f   : > { %v6038_v63 = vpop.f32.mrf.mxu1  ;;  %7767 = vmatprep.subr.bf16.mxu0 %v11710_v2 }
 0x3a1   : > { %v6040_v23 = vpop.f32.mrf.mxu1 }
 0x3a2   : > { %7768 = vmatpush1.bf16.msra.mxu0 %v11708_v5 }
 0x3a3   : > { %v6042_v49 = vpop.f32.mrf.mxu1  ;;  %7769 = vmatprep.subr.bf16.mxu0 %v11713_v40 }
 0x3a5   : > { %v6044_v52 = vpop.f32.mrf.mxu1 }
 0x3a6   : > { %7770 = vmatpush1.bf16.msra.mxu0 %v11711_v10  ;;  %v11729_v10 = vld [vmem:[%s15191_s5 + $0x1e0] ss:$8 sps:$4 sm:$0xff]  }
 0x3a7   : > { %v6048_v29 = vpop.f32.mrf.mxu1  ;;  %7771 = vmatprep.subr.bf16.mxu0 %v11716_v57 }
 0x3a9   : > { %v6050_v18 = vpop.f32.mrf.mxu1 }
 0x3aa   : > { %7772 = vmatpush1.bf16.msra.mxu0 %v11714_v46 }
 0x3ab   : > { %v6052_v0 = vpop.f32.mrf.mxu1 }
 0x3ad   : > { %v6053_v19 = vpop.f32.mrf.mxu1 }
 0x3ae   : > { %v11734_v19 = vld [vmem:[%s15191_s5 + $0x1d4] ss:$8 sps:$4 sm:$0xff]  }
 0x3b0   : > { %v5987_v47 = vpop.f32.mrf.mxu0 }
 0x3b1   : > { %v5988_v34 = vadd.f32 %v5987_v47, %v14492_v8  ;;  %v11717_v8 = vld [vmem:[%s15191_s5 + $0x120] ss:$8 sps:$4 sm:$0xff]  }
 0x3b2   : > { %v5989_v56 = vpop.f32.mrf.mxu0 }
 0x3b3   : > { %v5990_v11 = vadd.f32 %v5989_v56, %v14501_v3  ;;  %v6039_v21 = vadd.f32 %v6038_v63, %v5988_v34  ;;  %v11719_v3 = vld [vmem:[%s15191_s5 + $0x124] ss:$8 sps:$4 sm:$0xff]   ;;  %v11732_v34 = vld [vmem:[%s15191_s5 + $0x1d0] ss:$8 sps:$4 sm:$0xff]  }
 0x3b4   : > { %v5991_v62 = vpop.f32.mrf.mxu0  ;;  %7773 = vmatprep.subr.bf16.mxu0 %v11719_v3  ;;  %v11737_v56 = vld [vmem:[%s15191_s5 + $0x1c4] ss:$8 sps:$4 sm:$0xff]  }
 0x3b5   : > { %v5992_v25 = vadd.f32 %v5991_v62, %v14513_v24  ;;  %v6041_v41 = vadd.f32 %v6040_v23, %v5990_v11  ;;  %7774 = vmatpush1.bf16.msra.mxu0 %v11717_v8  ;;  %v11726_v23 = vld [vmem:[%s15191_s5 + $0x1f0] ss:$8 sps:$4 sm:$0xff]   ;;  %v11740_v62 = vld [vmem:[%s15191_s5 + $0x1b4] ss:$8 sps:$4 sm:$0xff]  }
 0x3b6   : > { %v5993_v20 = vpop.f32.mrf.mxu0  ;;  %7775 = vmatprep.subr.bf16.mxu0 %v11722_v53 }
 0x3b7   : > { %v5994_v54 = vadd.f32 %v5993_v20, %v14521_v36  ;;  %v6043_v17 = vadd.f32 %v6042_v49, %v5992_v25  ;;  %v11743_v20 = vld [vmem:[%s15191_s5 + $0x1a4] ss:$8 sps:$4 sm:$0xff]  }
 0x3b8   : > { %v5997_v45 = vpop.f32.mrf.mxu0 }
 0x3b9   : > { %v5998_v58 = vadd.f32 %v5997_v45, %v14534_v28  ;;  %v6045_v61 = vadd.f32 %v6044_v52, %v5994_v54  ;;  %v11720_v28 = vld [vmem:[%s15191_s5 + $0x210] ss:$8 sps:$4 sm:$0xff]   ;;  %v11741_v54 = vld [vmem:[%s15191_s5 + $0x1a0] ss:$8 sps:$4 sm:$0xff]  }
 0x3ba   : > { %v5999_v14 = vpop.f32.mrf.mxu0  ;;  %7776 = vmatpush2.bf16.msra.mxu0 %v11720_v28 }
 0x3bb   : > { %v6000_v24 = vadd.f32 %v5999_v14, %v14543_v33  ;;  %v6049_v6 = vadd.f32 %v6048_v29, %v5998_v58  ;;  %7777 = vmatprep.subr.bf16.mxu0 %v11725_v43  ;;  %v11755_v43 = vld [vmem:[%s15191_s5 + $0x224] ss:$8 sps:$4 sm:$0xff]  }
 0x3bc   : > { %v6001_v42 = vpop.f32.mrf.mxu0 }
 0x3bd   : > { %v6051_v36 = vadd.f32 %v6050_v18, %v6000_v24  ;;  %v11746_v42 = vld [vmem:[%s15191_s5 + $0x114] ss:$8 sps:$4 sm:$0xff]  }
 0x3be   : > { %v6002_v30 = vpop.f32.mrf.mxu0  ;;  %7778 = vmatpush2.bf16.msra.mxu0 %v11723_v16  ;;  %v11753_v16 = vld [vmem:[%s15191_s5 + $0x220] ss:$8 sps:$4 sm:$0xff]  }
 0x3bf   : > { %v10547_v38 = vpop.f32.mrf.mxu1  ;;  %7779 = vmatprep.subr.bf16.mxu0 %v11728_v35  ;;  %v11750_v30 = vld [vmem:[%s15191_s5 + $0x230] ss:$8 sps:$4 sm:$0xff]  }
 0x3c0   : > { %v6089_v51 = vpop.f32.mrf.mxu0 }
 0x3c1   : > { %v14751_v27 = vadd.f32 %v6089_v51, %v6039_v21  ;;  %v10548_v44 = vpop.f32.mrf.mxu1 }
 0x3c2   : > { %v10549_v33 = vadd.f32 %v10548_v44, %v10547_v38  ;;  %v6091_v50 = vpop.f32.mrf.mxu0  ;;  %7780 = vmatpush2.bf16.msra.mxu0 %v11726_v23  ;;  %v11752_v38 = vld [vmem:[%s15191_s5 + $0x234] ss:$8 sps:$4 sm:$0xff]  }
 0x3c3   : > { %v14753_v13 = vadd.f32 %v6091_v50, %v6041_v41  ;;  %v10550_v26 = vpop.f32.mrf.mxu1  ;;  %v11738_v41 = vld [vmem:[%s15191_s5 + $0x1b0] ss:$8 sps:$4 sm:$0xff]   ;;  %7822 = vmatprep.subr.bf16.mxu1 %v11752_v38 }
 0x3c4   : > { %v6141_v48 = vadd.f32 %v10549_v33, %v14643_v32  ;;  %v6093_v31 = vpop.f32.mrf.mxu0  ;;  %v11731_v32 = vld [vmem:[%s15191_s5 + $0x1e4] ss:$8 sps:$4 sm:$0xff]   ;;  %7823 = vmatpush1.bf16.msra.mxu1 %v11750_v30 }
 0x3c5   : > { %v14762_v37 = vadd.f32 %v6093_v31, %v6043_v17  ;;  %v10551_v39 = vpop.f32.mrf.mxu1  ;;  %7781 = vmatprep.subr.bf16.mxu0 %v11731_v32  ;;  %v11758_v31 = vld [vmem:[%s15191_s5 + $0x74] ss:$8 sps:$4 sm:$0xff]   ;;  %7824 = vmatprep.subr.bf16.mxu1 %v11755_v43 }
 0x3c6   : > { %v10552_v15 = vadd.f32 %v10551_v39, %v10550_v26  ;;  %v6095_v63 = vpop.f32.mrf.mxu0  ;;  %7782 = vmatpush2.bf16.msra.mxu0 %v11729_v10 }
 0x3c7   : > { %v14770_v1 = vadd.f32 %v6095_v63, %v6045_v61  ;;  %v10553_v55 = vpop.f32.mrf.mxu1  ;;  %7783 = vmatprep.subr.bf16.mxu0 %v11734_v19 }
 0x3c8   : > { %v6144_v49 = vadd.f32 %v10552_v15, %v14659_v12  ;;  %v6099_v52 = vpop.f32.mrf.mxu0  ;;  %7825 = vmatpush1.bf16.msra.mxu1 %v11753_v16 }
 0x3c9   : > { %v14776_v5 = vadd.f32 %v6099_v52, %v6049_v6  ;;  %v10554_v2 = vpop.f32.mrf.mxu1  ;;  %8047 = vmatprep.subr.bf16.mxu1 %v11758_v31 }
 0x3ca   : > { %v10555_v29 = vadd.f32 %v10554_v2, %v10553_v55  ;;  %v6101_v18 = vpop.f32.mrf.mxu0  ;;  %7784 = vmatpush2.bf16.msra.mxu0 %v11732_v34 }
 0x3cb   : > { %v14781_v40 = vadd.f32 %v6101_v18, %v6051_v36  ;;  %v10556_v0 = vpop.f32.mrf.mxu1  ;;  %7785 = vmatprep.subr.bf16.mxu0 %v11737_v56 }
 0x3cc   : > { %v6149_v12 = vadd.f32 %v10555_v29, %v14669_v22  ;;  %v6103_v46 = vpop.f32.mrf.mxu0  ;;  %v11735_v22 = vld [vmem:[%s15191_s5 + $0x1c0] ss:$8 sps:$4 sm:$0xff]  }
 0x3cd   : > { %v10557_v57 = vpop.f32.mrf.mxu1 }
 0x3ce   : > { %v6104_v47 = vpop.f32.mrf.mxu0  ;;  %7786 = vmatpush2.bf16.msra.mxu0 %v11735_v22 }
 0x3cf   : > { %7787 = vmatprep.subr.bf16.mxu0 %v11740_v62 }
 0x3d0   : > { %v10677_v11 = vpop.f32.mrf.mxu1 }
 0x3d2   : > { %v6236_v21 = vpop.f32.mrf.mxu1  ;;  %7788 = vmatpush2.bf16.msra.mxu0 %v11738_v41 }
 0x3d3   : > { %7789 = vmatprep.subr.bf16.mxu0 %v11743_v20 }
 0x3d4   : > { %v10678_v25 = vpop.f32.mrf.mxu1 }
 0x3d6   : > { %7790 = vmatpush2.bf16.msra.mxu0 %v11741_v54  ;;  %v6239_v28 = vpop.f32.mrf.mxu1 }
 0x3d7   : > { %8110 = vmatprep.subr.bf16.mxu0 %v11746_v42 }
 0x3e1   : > { %v10575_v17 = vpop.f32.mrf.mxu0 }
 0x3e3   : > { %v10576_v45 = vpop.f32.mrf.mxu0 }
 0x3e4   : > { %v10577_v58 = vadd.f32 %v10576_v45, %v10575_v17 }
 0x3e5   : > { %v10578_v61 = vpop.f32.mrf.mxu0 }
 0x3e6   : > { %v6189_v14 = vadd.f32 %v10577_v58, %v6141_v48 }
 0x3e7   : > { %v10579_v8 = vpop.f32.mrf.mxu0 }
 0x3e8   : > { %v14808_v3 = vadd.f32 %v6236_v21, %v6189_v14  ;;  %v10580_v24 = vadd.f32 %v10579_v8, %v10578_v61 }
 0x3e9   : > { %v10581_v6 = vpop.f32.mrf.mxu0 }
 0x3ea   : > { %v6192_v36 = vadd.f32 %v10580_v24, %v6144_v49 }
 0x3eb   : > { %v10582_v53 = vpop.f32.mrf.mxu0 }
 0x3ec   : > { %v14819_v51 = vadd.f32 %v6239_v28, %v6192_v36  ;;  %v10583_v44 = vadd.f32 %v10582_v53, %v10581_v6 }
 0x3ed   : > { %v10584_v33 = vpop.f32.mrf.mxu0 }
 0x3ee   : > { %v6197_v50 = vadd.f32 %v10583_v44, %v6149_v12  ;;  %v14835_v12 = vld [vmem:[%s15190_s4] sm:$0x7] }
 0x3ef   : > { %v10585_v26 = vpop.f32.mrf.mxu0  ;;  %v7341_v21 = vrot.slane %v14835_v12, %v13631_v4  ;;  %v7345_v54 = vrot.slane %v14835_v12, %v13640_v9 }
 0x3f0   : > { %v14827_v48 = vadd.f32 %v10677_v11, %v6197_v50 }
 0x410   : > { %v7115_v39 = vpop.f32.mrf.mxu1 }
 0x412   : > { %v7117_v35 = vpop.f32.mrf.mxu1 }
 0x414   : > { %v7119_v15 = vpop.f32.mrf.mxu1 }
 0x416   : > { %v7121_v63 = vpop.f32.mrf.mxu1 }
 0x418   : > { %v7125_v23 = vpop.f32.mrf.mxu1 }
 0x41a   : > { %v7127_v55 = vpop.f32.mrf.mxu1 }
 0x41c   : > { %v7129_v32 = vpop.f32.mrf.mxu1 }
 0x41e   : > { %v7130_v49 = vpop.f32.mrf.mxu1 }
 0x421   : > { %v7064_v52 = vpop.f32.mrf.mxu0 }
 0x422   : > { %v7116_v57 = vadd.f32 %v7115_v39, %v7064_v52 }
 0x423   : > { %v7066_v2 = vpop.f32.mrf.mxu0 }
 0x424   : > { %v7118_v56 = vadd.f32 %v7117_v35, %v7066_v2 }
 0x425   : > { %v7068_v29 = vpop.f32.mrf.mxu0 }
 0x426   : > { %v7120_v25 = vadd.f32 %v7119_v15, %v7068_v29 }
 0x427   : > { %v7070_v18 = vpop.f32.mrf.mxu0 }
 0x428   : > { %v7122_v58 = vadd.f32 %v7121_v63, %v7070_v18 }
 0x429   : > { %v7074_v10 = vpop.f32.mrf.mxu0 }
 0x42a   : > { %v7126_v24 = vadd.f32 %v7125_v23, %v7074_v10 }
 0x42b   : > { %v7076_v0 = vpop.f32.mrf.mxu0 }
 0x42c   : > { %v7128_v53 = vadd.f32 %v7127_v55, %v7076_v0 }
 0x42d   : > { %v7078_v19 = vpop.f32.mrf.mxu0 }
 0x42f   : > { %v7079_v46 = vpop.f32.mrf.mxu0 }
 0x430   : > { %v14837_v47 = vpop.f32.mrf.mxu1 }
 0x431   : > { %v7166_v34 = vpop.f32.mrf.mxu0 }
 0x432   : > { %v7167_v11 = vadd.f32 %v7166_v34, %v7116_v57  ;;  %v14842_v22 = vpop.f32.mrf.mxu1 }
 0x433   : > { %v7168_v62 = vpop.f32.mrf.mxu0 }
 0x434   : > { %v7327_v41 = vadd.f32 %v7167_v11, %v14751_v27  ;;  %v7169_v20 = vadd.f32 %v7168_v62, %v7118_v56  ;;  %v14847_v17 = vpop.f32.mrf.mxu1 }
 0x435   : > { %v7170_v45 = vpop.f32.mrf.mxu0 }
 0x436   : > { %v7353_v61 = vadd.f32 %v7341_v21, %v7327_v41  ;;  %v7328_v14 = vadd.f32 %v7169_v20, %v14753_v13  ;;  %v7171_v8 = vadd.f32 %v7170_v45, %v7120_v25  ;;  %v14855_v27 = vpop.f32.mrf.mxu1 }
 0x437   : > { %v7172_v6 = vpop.f32.mrf.mxu0 }
 0x438   : > { %7362 = vst [vmem:[%s14852_s20] sm:$0xff] %v7353_v61  ;;  %v7389_v42 = vrot.slane %v7353_v61, 7  ;;  %v7354_v36 = vadd.f32 %v7345_v54, %v7328_v14  ;;  %v7330_v30 = vadd.f32 %v7171_v8, %v14762_v37  ;;  %v7173_v38 = vadd.f32 %v7172_v6, %v7122_v58  ;;  %v14859_v28 = vpop.f32.mrf.mxu1 }
 0x439   : > { %v7176_v44 = vpop.f32.mrf.mxu0 }
 0x43a   : > { %7413 = vst [vmem:[#allocation4] sm:$0xfe] %v7389_v42  ;;  %7363 = vst [vmem:[%s14852_s20 + $0x8] sm:$0xff] %v7354_v36  ;;  %v7390_v13 = vrot.slane %v7354_v36, 7  ;;  %v7356_v33 = vadd.f32 %v7341_v21, %v7330_v30  ;;  %v7331_v50 = vadd.f32 %v7173_v38, %v14770_v1  ;;  %v7177_v26 = vadd.f32 %v7176_v44, %v7126_v24  ;;  %v14863_v16 = vpop.f32.mrf.mxu1  ;;  %v11744_v44 = vld [vmem:[%s15191_s5 + $0x110] ss:$8 sps:$4 sm:$0xff]  }
 0x43b   : > { %v7178_v43 = vpop.f32.mrf.mxu0  ;;  %v10617_v7 = vadd.f32 %v14863_v16, %v14859_v28 }
 0x43c   : > { %7414 = vst [vmem:[#allocation4 + $0x8] sm:$0xfe] %v7390_v13  ;;  %7366 = vst [vmem:[%s14852_s20 + $0x18] sm:$0xff] %v7356_v33  ;;  %v7392_v37 = vrot.slane %v7356_v33, 7  ;;  %v7357_v31 = vadd.f32 %v7345_v54, %v7331_v50  ;;  %v7333_v39 = vadd.f32 %v7177_v26, %v14776_v5  ;;  %v7179_v35 = vadd.f32 %v7178_v43, %v7128_v53  ;;  %v10618_v15 = vpop.f32.mrf.mxu1  ;;  %v11749_v26 = vld [vmem:[%s15191_s5 + $0x104] ss:$8 sps:$4 sm:$0xff]  }
 0x43d   : > { %v7180_v63 = vpop.f32.mrf.mxu0  ;;  %v10611_v43 = vadd.f32 %v14842_v22, %v14837_v47  ;;  %v11747_v15 = vld [vmem:[%s15191_s5 + $0x100] ss:$8 sps:$4 sm:$0xff]   ;;  %v7349_v47 = vrot.slane %v14835_v12, %v3946_v60  ;;  %v10614_v22 = vadd.f32 %v14855_v27, %v14847_v17 }
 0x43e   : > { %v14868_v23 = vsel %vm4017_vm7, %v7389_v42, %v7392_v37  ;;  %7367 = vst [vmem:[%s14852_s20 + $0x20] sm:$0xff] %v7357_v31  ;;  %v7394_v1 = vrot.slane %v7357_v31, 7  ;;  %v7359_v55 = vadd.f32 %v7341_v21, %v7333_v39  ;;  %v7334_v32 = vadd.f32 %v7179_v35, %v14781_v40  ;;  %v10619_v49 = vpop.f32.mrf.mxu1 }
 0x43f   : > { %v7181_v52 = vpop.f32.mrf.mxu0 }
 0x440   : > { %v14873_v2 = vsel %vm4017_vm7, %v7390_v13, %v7394_v1  ;;  %7369 = vst [vmem:[%s14852_s20 + $0x30] sm:$0x3] %v7359_v55  ;;  %v7398_v29 = vrot.slane %v7359_v55, 7  ;;  %v7360_v5 = vadd.f32 %v7345_v54, %v7334_v32 }
 0x441   : > { %v14876_v18 = vpop.f32.mrf.mxu1  ;;  %v7475_v57 = vld [vmem:[#allocation4] sm:$0xfe] }
 0x442   : > { %v7399_v10 = vsel %vm4017_vm7, %v7392_v37, %v7398_v29  ;;  %7370 = vst [vmem:[%s14852_s20 + $0x38] sm:$0x3] %v7360_v5  ;;  %v7400_v0 = vrot.slane %v7360_v5, 7  ;;  %v7481_v11 = vpack.c.bf16 %v14868_v23, %v7475_v57 }
 0x443   : > { %7420 = vst [vmem:[#allocation4 + $0x30] sm:$0x7] %v7399_v10  ;;  %v7313_v19 = vpop.f32.mrf.mxu1  ;;  %v7476_v46 = vld [vmem:[#allocation4 + $0x8] sm:$0xfe] }
 0x444   : > { %v7401_v40 = vsel %vm4017_vm7, %v7394_v1, %v7400_v0  ;;  %v7482_v56 = vpack.c.bf16 %v14873_v2, %v7476_v46  ;;  %v7527_v25 = vshll.u32 %v7481_v11, 16  ;;  %v7525_v24 = vshrl.u32 %v7481_v11, 16  ;;  %v11761_v1 = vld [vmem:[%s15191_s5 + $0x354] ss:$8 sps:$4 sm:$0xff]  }
 0x445   : > { %7421 = vst [vmem:[#allocation4 + $0x38] sm:$0x7] %v7401_v40  ;;  %v10690_v34 = vpop.f32.mrf.mxu1 }
 0x446   : > { %v7539_v21 = vshll.u32 %v7482_v56, 16  ;;  %v7529_v61 = vrot.slane %v7527_v25, 1  ;;  %v7537_v14 = vshrl.u32 %v7482_v56, 16 }
 0x447   : > { %v7316_v10 = vpop.f32.mrf.mxu1 }
 0x448   : > { %v7541_v45 = vrot.slane %v7539_v21, 1  ;;  %v7530_v53 = vor.u32 %v7529_v61, %v7525_v24 }
 0x44a   : > { %v7478_v62 = vld [vmem:[#allocation4 + $0x30] sm:$0x7]  ;;  %v7542_v36 = vor.u32 %v7541_v45, %v7537_v14  ;;  %v11767_v45 = vld [vmem:[%s15191_s5 + $0x344] ss:$8 sps:$4 sm:$0xff]   ;;  %v11765_v14 = vld [vmem:[%s15191_s5 + $0x340] ss:$8 sps:$4 sm:$0xff]  }
 0x44b   : > { %v7484_v41 = vpack.c.bf16 %v7478_v62, %v7478_v62 }
 0x44c   : > { %v7479_v20 = vld [vmem:[#allocation4 + $0x38] sm:$0x7] }
 0x44d   : > { %v7485_v54 = vpack.c.bf16 %v7479_v20, %v7479_v20  ;;  %v7532_v58 = vshll.u32 %v7484_v41, 16  ;;  %v7560_v52 = vshrl.u32 %v7484_v41, 16 }
 0x44f   : > { %v7544_v8 = vshll.u32 %v7485_v54, 16  ;;  %v7534_v6 = vrot.slane %v7532_v58, 1  ;;  %v7563_v38 = vshrl.u32 %v7485_v54, 16 }
 0x451   : > { %v10637_v42 = vpop.f32.mrf.mxu0  ;;  %v7546_v30 = vrot.slane %v7544_v8, 1  ;;  %v7535_v31 = vsel %vm640_vm1, %v7530_v53, %v7534_v6  ;;  %v7562_v46 = vor.u32 %v7560_v52, %v7534_v6  ;;  %v11771_v52 = vld [vmem:[%s15191_s5 + $0x40] ss:$8 sps:$4 sm:$0xff]  }
 0x453   : > { %v10638_v13 = vpop.f32.mrf.mxu0  ;;  %v7547_v33 = vsel %vm640_vm1, %v7542_v36, %v7546_v30  ;;  %v7565_v50 = vor.u32 %v7563_v38, %v7546_v30  ;;  %v11756_v38 = vld [vmem:[%s15191_s5 + $0x70] ss:$8 sps:$4 sm:$0xff]  }
 0x454   : > { %v10639_v37 = vadd.f32 %v10638_v13, %v10637_v42  ;;  %7791 = vmatprep.mubr.bf16.mxu0 %v7547_v33  ;;  %v11764_v33 = vld [vmem:[%s15191_s5 + $0x64] ss:$8 sps:$4 sm:$0xff]  }
 0x455   : > { %v10640_v39 = vpop.f32.mrf.mxu0  ;;  %7792 = vmatmul.mubr.bf16.vlgmr.msra.gmra.mxu0 %v7535_v31  ;;  %v11762_v31 = vld [vmem:[%s15191_s5 + $0x60] ss:$8 sps:$4 sm:$0xff]  }
 0x456   : > { %v7266_v35 = vadd.f32 %v10639_v37, %v10611_v43  ;;  %7801 = vmatprep.mubr.bf16.mxu0 %v7565_v50  ;;  %8111 = vmatpush1.bf16.msra.mxu0 %v11744_v44 }
 0x457   : > { %v10641_v63 = vpop.f32.mrf.mxu0  ;;  %8112 = vmatprep.subr.bf16.mxu0 %v11749_v26 }
 0x458   : > { %v7314_v55 = vadd.f32 %v7313_v19, %v7266_v35  ;;  %v10642_v32 = vadd.f32 %v10641_v63, %v10640_v39  ;;  %v11770_v39 = vld [vmem:[%s15191_s5 + $0x54] ss:$8 sps:$4 sm:$0xff]  }
 0x459   : > { %v10643_v49 = vpop.f32.mrf.mxu0 }
 0x45a   : > { %v7329_v29 = vadd.f32 %v7314_v55, %v14808_v3  ;;  %v7269_v5 = vadd.f32 %v10642_v32, %v10614_v22  ;;  %8113 = vmatpush1.bf16.msra.mxu0 %v11747_v15  ;;  %v11773_v32 = vld [vmem:[%s15191_s5 + $0x44] ss:$8 sps:$4 sm:$0xff]  }
 0x45b   : > { %v10644_v0 = vpop.f32.mrf.mxu0  ;;  %8466 = vmatprep.subr.bf16.mxu0 %v11761_v1  ;;  %v7425_v1 = vld [vmem:[#allocation4 + $0x8] sm:$0xff] }
 0x45c   : > { %v7355_v60 = vadd.f32 %v7349_v47, %v7329_v29  ;;  %v7317_v12 = vadd.f32 %v7316_v10, %v7269_v5  ;;  %v10645_v17 = vadd.f32 %v10644_v0, %v10643_v49  ;;  %v7434_v49 = vpack.c.bf16 %v14873_v2, %v7425_v1  ;;  %v11776_v29 = vld [vmem:[%s15191_s5 + $0x34] ss:$8 sps:$4 sm:$0xff]   ;;  %v11774_v5 = vld [vmem:[%s15191_s5 + $0x30] ss:$8 sps:$4 sm:$0xff]   ;;  %v11777_v10 = vld [vmem:[%s15191_s5 + $0x20] ss:$8 sps:$4 sm:$0xff]  }
 0x45d   : > { %v10646_v27 = vpop.f32.mrf.mxu0  ;;  %7802 = vmatmul.mubr.bf16.gmra.mxu0 %v7562_v46  ;;  %v11782_v0 = vld [vmem:[%s15191_s5 + $0x14] ss:$8 sps:$4 sm:$0xff]   ;;  %v11780_v46 = vld [vmem:[%s15191_s5 + $0x10] ss:$8 sps:$4 sm:$0xff]  }
 0x45e   : > { %7365 = vst.msk [vmem:[%s14852_s20 + $0x10] sm:$0xff] %vm7364_vm12, %v7355_v60  ;;  %v7391_v3 = vrot.slane %v7355_v60, 7  ;;  %v7332_v19 = vadd.f32 %v7317_v12, %v14819_v51  ;;  %v7274_v57 = vadd.f32 %v10645_v17, %v10617_v7  ;;  %8130 = vmatprep.mubr.bf16.mxu0 %v11874_v59  ;;  %v11785_v7 = vld [vmem:[%s15191_s5 + $0x4] ss:$8 sps:$4 sm:$0xff]   ;;  %v11783_v60 = vld [vmem:[%s15191_s5] ss:$8 sps:$4 sm:$0xff]  }
 0x45f   : > { %v10647_v40 = vpop.f32.mrf.mxu0  ;;  %v11788_v12 = vld [vmem:[%s15191_s5 + $0xf4] ss:$8 sps:$4 sm:$0xff]   ;;  %v11786_v17 = vld [vmem:[%s15191_s5 + $0xf0] ss:$8 sps:$4 sm:$0xff]   ;;  %v11791_v27 = vld [vmem:[%s15191_s5 + $0xe4] ss:$8 sps:$4 sm:$0xff]  }
 0x460   : > { %7416 = vst.msk [vmem:[#allocation4 + $0x10] sm:$0xfe] %vm7415_vm13, %v7391_v3  ;;  %v7358_v34 = vadd.f32 %v7349_v47, %v7332_v19  ;;  %v7322_v28 = vadd.f32 %v14876_v18, %v7274_v57  ;;  %v11759_v18 = vld [vmem:[%s15191_s5 + $0x350] ss:$8 sps:$4 sm:$0xff]   ;;  %v11794_v19 = vld [vmem:[%s15191_s5 + $0xd4] ss:$8 sps:$4 sm:$0xff]  }
 0x461   : > { %v11792_v57 = vld [vmem:[%s15191_s5 + $0xd0] ss:$8 sps:$4 sm:$0xff]   ;;  %v11797_v40 = vld [vmem:[%s15191_s5 + $0xc4] ss:$8 sps:$4 sm:$0xff]  }
 0x462   : > { %7368 = vst.msk [vmem:[%s14852_s20 + $0x28] sm:$0xff] %vm7364_vm12, %v7358_v34  ;;  %v7396_v16 = vrot.slane %v7358_v34, 7  ;;  %v7335_v56 = vadd.f32 %v7322_v28, %v14827_v48  ;;  %v11795_v34 = vld [vmem:[%s15191_s5 + $0xc0] ss:$8 sps:$4 sm:$0xff]   ;;  %v11800_v28 = vld [vmem:[%s15191_s5 + $0xb4] ss:$8 sps:$4 sm:$0xff]  }
 0x463   : > { %v11834_v1 = vld [vmem:[%s15191_s5 + $0x330] ss:$8 sps:$4 sm:$0xff]  }
 0x464   : > { %v7397_v11 = vsel %vm4017_vm7, %v7391_v3, %v7396_v16  ;;  %v7361_v21 = vadd.f32 %v7349_v47, %v7335_v56  ;;  %v11768_v47 = vld [vmem:[%s15191_s5 + $0x50] ss:$8 sps:$4 sm:$0xff]   ;;  %v11789_v3 = vld [vmem:[%s15191_s5 + $0xe0] ss:$8 sps:$4 sm:$0xff]   ;;  %v11803_v56 = vld [vmem:[%s15191_s5 + $0xa4] ss:$8 sps:$4 sm:$0xff]  }
 0x465   : > { %7419 = vst.msk [vmem:[#allocation4 + $0x28] sm:$0xff] %vm7364_vm12, %v7397_v11  ;;  %v11801_v11 = vld [vmem:[%s15191_s5 + $0xa0] ss:$8 sps:$4 sm:$0xff]  }
 0x466   : > { %7372 = vst.msk [vmem:[%s14852_s20 + $0x40] sm:$0x3] %vm7371_vm14, %v7361_v21  ;;  %v7402_v51 = vrot.slane %v7361_v21, 7  ;;  %v11806_v21 = vld [vmem:[%s15191_s5 + $0x94] ss:$8 sps:$4 sm:$0xff]  }
 0x467   : > { %v7426_v25 = vld [vmem:[#allocation4 + $0x10] sm:$0xff] }
 0x468   : > { %v7403_v62 = vsel %vm4017_vm7, %v7396_v16, %v7402_v51  ;;  %v7477_v20 = vld [vmem:[#allocation4 + $0x10] sm:$0xfe] }
 0x469   : > { %7423 = vst.msk [vmem:[#allocation4 + $0x40] sm:$0x7] %vm7422_vm15, %v7403_v62  ;;  %v8151_v43 = vld [vmem:[#allocation4 + $0x10] sm:$0xfc]  ;;  %v11809_v62 = vld [vmem:[%s15191_s5 + $0x84] ss:$8 sps:$4 sm:$0xff]  }
 0x46a   : > { %v11798_v16 = vld [vmem:[%s15191_s5 + $0xb0] ss:$8 sps:$4 sm:$0xff]  }
 0x46b   : > { %v11804_v51 = vld [vmem:[%s15191_s5 + $0x90] ss:$8 sps:$4 sm:$0xff]  }
 0x46c   : > { %v7429_v41 = vld [vmem:[#allocation4 + $0x28] sm:$0xff] }
 0x46d   : > { %v7435_v48 = vpack.c.bf16 %v7429_v41, %v7426_v25  ;;  %v7483_v54 = vpack.c.bf16 %v7429_v41, %v7477_v20  ;;  %v8157_v37 = vpack.c.bf16 %v7429_v41, %v8151_v43  ;;  %v11812_v25 = vld [vmem:[%s15191_s5 + $0x2b4] ss:$8 sps:$4 sm:$0xff]   ;;  %v7424_v41 = vld [vmem:[#allocation4] sm:$0xff]  ;;  %v7431_v20 = vld [vmem:[#allocation4 + $0x38] sm:$0x3] }
 0x46e   : > { %v11827_v43 = vld [vmem:[%s15191_s5 + $0x264] ss:$8 sps:$4 sm:$0xff]  }
 0x46f   : > { %10250 = vmatmul.mubr.msk.bf16.vlgmr.msra.gmra.mxu0 %vm7364_vm12, %v7435_v48  ;;  %v7551_v58 = vshll.u32 %v7483_v54, 16  ;;  %v7549_v42 = vshrl.u32 %v7483_v54, 16  ;;  %v8210_v15 = vrot.slane %v8157_v37, 1  ;;  %v11810_v48 = vld [vmem:[%s15191_s5 + $0x2b0] ss:$8 sps:$4 sm:$0xff]  }
 0x470   : > { %8140 = vmatprep.mubr.bf16.mxu0 %v11874_v59  ;;  %v7480_v61 = vld [vmem:[#allocation4 + $0x40] sm:$0x7]  ;;  %8467 = vmatpush1.bf16.msra.mxu0 %v11759_v18  ;;  %v8153_v54 = vld [vmem:[#allocation4 + $0x38] sm:$0xf] }
 0x471   : > { %v7486_v8 = vpack.c.bf16 %v7480_v61, %v7480_v61  ;;  %v7553_v24 = vrot.slane %v7551_v58, 1  ;;  %8468 = vmatprep.subr.bf16.mxu0 %v11767_v45  ;;  %v7432_v6 = vld [vmem:[#allocation4 + $0x40] sm:$0x3]  ;;  %v7433_v45 = vpack.c.bf16 %v14868_v23, %v7424_v41  ;;  %v11815_v58 = vld [vmem:[%s15191_s5 + $0x2a4] ss:$8 sps:$4 sm:$0xff]   ;;  %v7437_v61 = vpack.c.bf16 %v7431_v20, %v7431_v20 }
 0x472   : > { %v8154_v30 = vld [vmem:[#allocation4 + $0x40] sm:$0xf]  ;;  %v7438_v53 = vpack.c.bf16 %v7432_v6, %v7432_v6  ;;  %v11818_v6 = vld [vmem:[%s15191_s5 + $0x294] ss:$8 sps:$4 sm:$0xff]  }
 0x473   : > { %v7556_v36 = vshll.u32 %v7486_v8, 16  ;;  %v7554_v44 = vor.u32 %v7553_v24, %v7549_v42  ;;  %v8160_v50 = vpack.c.bf16 %v8154_v30, %v8154_v30  ;;  %v7566_v63 = vshrl.u32 %v7486_v8, 16  ;;  %v11807_v18 = vld [vmem:[%s15191_s5 + $0x80] ss:$8 sps:$4 sm:$0xff]  }
 0x474   : > { %8469 = vmatpush1.bf16.msra.mxu0 %v11765_v14  ;;  %v8150_v14 = vld [vmem:[#allocation4 + $0x8] sm:$0xfc]  ;;  %v8159_v8 = vpack.c.bf16 %v8153_v54, %v8153_v54  ;;  %v11813_v24 = vld [vmem:[%s15191_s5 + $0x2a0] ss:$8 sps:$4 sm:$0xff]  }
 0x475   : > { %v7558_v13 = vrot.slane %v7556_v36, 1  ;;  %v8211_v35 = vrot.slane %v8160_v50, 1  ;;  %v8156_v42 = vpack.c.bf16 %v14873_v2, %v8150_v14  ;;  %v7430_v36 = vld [vmem:[#allocation4 + $0x30] sm:$0x3]  ;;  %v11819_v2 = vld [vmem:[%s15191_s5 + $0x280] ss:$8 sps:$4 sm:$0xff]  }
 0x476   : > { %v15051_v30 = vrot.slane %v8159_v8, 1  ;;  %v11824_v50 = vld [vmem:[%s15191_s5 + $0x274] ss:$8 sps:$4 sm:$0xff]   ;;  %v11825_v37 = vld [vmem:[%s15191_s5 + $0x260] ss:$8 sps:$4 sm:$0xff]  }
 0x477   : > { %10251 = vmatmul.mubr.msk.bf16.gmra.mxu0 %vm7364_vm12, %v7438_v53  ;;  %v7559_v26 = vsel %vm640_vm1, %v7554_v44, %v7558_v13  ;;  %v8212_v22 = vsel %vm1916_vm2, %v8210_v15, %v8211_v35  ;;  %v7568_v55 = vor.u32 %v7566_v63, %v7558_v13  ;;  %v7436_v53 = vpack.c.bf16 %v7430_v36, %v7430_v36  ;;  %v11821_v13 = vld [vmem:[%s15191_s5 + $0x284] ss:$8 sps:$4 sm:$0xff]   ;;  %v11831_v15 = vld [vmem:[%s15191_s5 + $0x240] ss:$8 sps:$4 sm:$0xff]   ;;  %v11836_v63 = vld [vmem:[%s15191_s5 + $0x334] ss:$8 sps:$4 sm:$0xff]  }
 0x478   : > { %10212 = vmatmul.mubr.msk.bf16.vlgmr.msra.gmra.mxu1 %vm7364_vm12, %v7559_v26  ;;  %8486 = vmatprep.mubr.bf16.mxu0 %v11874_v59  ;;  %v8207_v44 = vrot.slane %v8156_v42, 1  ;;  %v11822_v26 = vld [vmem:[%s15191_s5 + $0x270] ss:$8 sps:$4 sm:$0xff]   ;;  %vm8535_vm1 = vcmask 123904  }
 0x479   : > { %8048 = vmatpush1.bf16.msra.mxu1 %v11756_v38  ;;  %7852 = vmatprep.mubr.bf16.mxu1 %v11874_v59  ;;  %v11816_v38 = vld [vmem:[%s15191_s5 + $0x290] ss:$8 sps:$4 sm:$0xff]  }
 0x47a   : > { %8049 = vmatprep.subr.bf16.mxu1 %v11764_v33  ;;  %v8209_v33 = vsel %vm1916_vm2, %v8207_v44, %v15051_v30 }
 0x47d   : > { %8050 = vmatpush1.bf16.msra.mxu1 %v11762_v31  ;;  %v11830_v31 = vld [vmem:[%s15191_s5 + $0x254] ss:$8 sps:$4 sm:$0xff]  }
 0x47e   : > { %8051 = vmatprep.subr.bf16.mxu1 %v11770_v39  ;;  %v11828_v39 = vld [vmem:[%s15191_s5 + $0x250] ss:$8 sps:$4 sm:$0xff]  }
 0x47f   : > { %10324 = vmatmul.mubr.msk.bf16.vlgmr.msra.gmra.mxu0 %vm7364_vm12, %v8212_v22  ;;  %v11837_v22 = vld [vmem:[%s15191_s5 + $0x320] ss:$8 sps:$4 sm:$0xff]  }
 0x480   : > { %10213 = vmatmul.mubr.msk.bf16.gmra.mxu1 %vm7364_vm12, %v7568_v55  ;;  %8496 = vmatprep.mubr.bf16.mxu0 %v11874_v59  ;;  %v11779_v59 = vld [vmem:[%s15191_s5 + $0x24] ss:$8 sps:$4 sm:$0xff]   ;;  %v11842_v55 = vld [vmem:[%s15191_s5 + $0x314] ss:$8 sps:$4 sm:$0xff]  }
 0x481   : > { %8052 = vmatpush1.bf16.msra.mxu1 %v11768_v47  ;;  %8079 = vmatprep.mubr.bf16.mxu1 %v7434_v49  ;;  %v11839_v47 = vld [vmem:[%s15191_s5 + $0x324] ss:$8 sps:$4 sm:$0xff]  }
 0x482   : > { %8053 = vmatprep.subr.bf16.mxu1 %v11773_v32  ;;  %v11840_v32 = vld [vmem:[%s15191_s5 + $0x310] ss:$8 sps:$4 sm:$0xff]   ;;  %v11845_v49 = vld [vmem:[%s15191_s5 + $0x304] ss:$8 sps:$4 sm:$0xff]  }
 0x485   : > { %8054 = vmatpush1.bf16.msra.mxu1 %v11771_v52  ;;  %v11843_v52 = vld [vmem:[%s15191_s5 + $0x300] ss:$8 sps:$4 sm:$0xff]  }
 0x486   : > { %8055 = vmatprep.subr.bf16.mxu1 %v11776_v29  ;;  %v11848_v29 = vld [vmem:[%s15191_s5 + $0x2f4] ss:$8 sps:$4 sm:$0xff]  }
 0x487   : > { %10325 = vmatmul.mubr.msk.bf16.gmra.mxu0 %vm7364_vm12, %v8211_v35  ;;  %v11833_v35 = vld [vmem:[%s15191_s5 + $0x244] ss:$8 sps:$4 sm:$0xff]  }
 0x489   : > { %8056 = vmatpush1.bf16.msra.mxu1 %v11774_v5  ;;  %v11846_v5 = vld [vmem:[%s15191_s5 + $0x2f0] ss:$8 sps:$4 sm:$0xff]  }
 0x48a   : > { %8057 = vmatprep.subr.bf16.mxu1 %v11779_v59  ;;  %v11851_v59 = vld [vmem:[%s15191_s5 + $0x2e4] ss:$8 sps:$4 sm:$0xff]  }
 0x48d   : > { %8058 = vmatpush1.bf16.msra.mxu1 %v11777_v10  ;;  %v11849_v10 = vld [vmem:[%s15191_s5 + $0x2e0] ss:$8 sps:$4 sm:$0xff]  }
 0x48e   : > { %8059 = vmatprep.subr.bf16.mxu1 %v11782_v0  ;;  %v11854_v0 = vld [vmem:[%s15191_s5 + $0x2d4] ss:$8 sps:$4 sm:$0xff]  }
 0x491   : > { %8060 = vmatpush1.bf16.msra.mxu1 %v11780_v46  ;;  %v8152_v46 = vld [vmem:[#allocation4 + $0x30] sm:$0xf] }
 0x492   : > { %8061 = vmatprep.subr.bf16.mxu1 %v11785_v7  ;;  %v11852_v7 = vld [vmem:[%s15191_s5 + $0x2d0] ss:$8 sps:$4 sm:$0xff]  }
 0x495   : > { %8062 = vmatpush1.bf16.msra.mxu1 %v11783_v60  ;;  %v11857_v60 = vld [vmem:[%s15191_s5 + $0x2c4] ss:$8 sps:$4 sm:$0xff]  }
 0x496   : > { %8063 = vmatprep.subr.bf16.mxu1 %v11788_v12  ;;  %v8149_v12 = vld [vmem:[#allocation4] sm:$0xfc] }
 0x499   : > { %8064 = vmatpush2.bf16.msra.mxu1 %v11786_v17  ;;  %v8158_v17 = vpack.c.bf16 %v8152_v46, %v8152_v46 }
 0x49a   : > { %8065 = vmatprep.subr.bf16.mxu1 %v11791_v27  ;;  %v11855_v27 = vld [vmem:[%s15191_s5 + $0x2c0] ss:$8 sps:$4 sm:$0xff]  }
 0x49d   : > { %8066 = vmatpush2.bf16.msra.mxu1 %v11789_v3  ;;  %v8155_v3 = vpack.c.bf16 %v14868_v23, %v8149_v12 }
 0x49e   : > { %8067 = vmatprep.subr.bf16.mxu1 %v11794_v19  ;;  %v8205_v19 = vrot.slane %v8158_v17, 1 }
 0x4a1   : > { %8068 = vmatpush2.bf16.msra.mxu1 %v11792_v57  ;;  %v8204_v57 = vrot.slane %v8155_v3, 1 }
 0x4a2   : > { %8069 = vmatprep.subr.bf16.mxu1 %v11797_v40 }
 0x4a3   : > { %v8206_v40 = vsel %vm1916_vm2, %v8204_v57, %v8205_v19 }
 0x4a5   : > { %8070 = vmatpush2.bf16.msra.mxu1 %v11795_v34 }
 0x4a6   : > { %8071 = vmatprep.subr.bf16.mxu1 %v11800_v28 }
 0x4a9   : > { %8072 = vmatpush2.bf16.msra.mxu1 %v11798_v16 }
 0x4aa   : > { %8073 = vmatprep.subr.bf16.mxu1 %v11803_v56 }
 0x4ad   : > { %8074 = vmatpush2.bf16.msra.mxu1 %v11801_v11 }
 0x4ae   : > { %8075 = vmatprep.subr.bf16.mxu1 %v11806_v21 }
 0x4b1   : > { %8076 = vmatpush2.bf16.msra.mxu1 %v11804_v51 }
 0x4b2   : > { %8077 = vmatprep.subr.bf16.mxu1 %v11809_v62 }
 0x4b5   : > { %8078 = vmatpush2.bf16.msra.mxu1 %v11807_v18 }
 0x4b6   : > { %8403 = vmatprep.subr.bf16.mxu1 %v11812_v25 }
 0x4b8   : > { %8080 = vmatmul.mubr.bf16.vlgmr.msra.gmra.mxu1 %v7433_v45 }
 0x4b9   : > { %8089 = vmatprep.mubr.bf16.mxu1 %v7437_v61  ;;  %8404 = vmatpush1.bf16.msra.mxu1 %v11810_v48 }
 0x4ba   : > { %8405 = vmatprep.subr.bf16.mxu1 %v11815_v58 }
 0x4bd   : > { %8406 = vmatpush1.bf16.msra.mxu1 %v11813_v24 }
 0x4be   : > { %8407 = vmatprep.subr.bf16.mxu1 %v11818_v6 }
 0x4c0   : > { %8090 = vmatmul.mubr.bf16.gmra.mxu1 %v7436_v53 }
 0x4c1   : > { %8408 = vmatpush1.bf16.msra.mxu1 %v11816_v38  ;;  %8435 = vmatprep.mubr.bf16.mxu1 %v8209_v33 }
 0x4c2   : > { %8409 = vmatprep.subr.bf16.mxu1 %v11821_v13 }
 0x4c5   : > { %8410 = vmatpush1.bf16.msra.mxu1 %v11819_v2 }
 0x4c6   : > { %8411 = vmatprep.subr.bf16.mxu1 %v11824_v50 }
 0x4c9   : > { %8412 = vmatpush1.bf16.msra.mxu1 %v11822_v26 }
 0x4ca   : > { %8413 = vmatprep.subr.bf16.mxu1 %v11827_v43 }
 0x4cd   : > { %8414 = vmatpush1.bf16.msra.mxu1 %v11825_v37 }
 0x4ce   : > { %8415 = vmatprep.subr.bf16.mxu1 %v11830_v31 }
 0x4d1   : > { %8416 = vmatpush1.bf16.msra.mxu1 %v11828_v39 }
 0x4d2   : > { %8417 = vmatprep.subr.bf16.mxu1 %v11833_v35 }
 0x4d5   : > { %8418 = vmatpush1.bf16.msra.mxu1 %v11831_v15 }
 0x4d6   : > { %8419 = vmatprep.subr.bf16.mxu1 %v11836_v63 }
 0x4d9   : > { %8420 = vmatpush2.bf16.msra.mxu1 %v11834_v1 }
 0x4da   : > { %8421 = vmatprep.subr.bf16.mxu1 %v11839_v47 }
 0x4dd   : > { %8422 = vmatpush2.bf16.msra.mxu1 %v11837_v22 }
 0x4de   : > { %8423 = vmatprep.subr.bf16.mxu1 %v11842_v55 }
 0x4e1   : > { %8424 = vmatpush2.bf16.msra.mxu1 %v11840_v32 }
 0x4e2   : > { %8425 = vmatprep.subr.bf16.mxu1 %v11845_v49 }
 0x4e5   : > { %8426 = vmatpush2.bf16.msra.mxu1 %v11843_v52 }
 0x4e6   : > { %8427 = vmatprep.subr.bf16.mxu1 %v11848_v29  ;;  %v8511_v29 = vld [vmem:[%s15192_s6] sm:$0x3] }
 0x4e9   : > { %8428 = vmatpush2.bf16.msra.mxu1 %v11846_v5 }
 0x4ea   : > { %8429 = vmatprep.subr.bf16.mxu1 %v11851_v59 }
 0x4ed   : > { %8430 = vmatpush2.bf16.msra.mxu1 %v11849_v10 }
 0x4ee   : > { %8431 = vmatprep.subr.bf16.mxu1 %v11854_v0 }
 0x4f1   : > { %8432 = vmatpush2.bf16.msra.mxu1 %v11852_v7  ;;  %v8516_v7 = vrot.slane %v8511_v29, %v13631_v4 }
 0x4f2   : > { %8433 = vmatprep.subr.bf16.mxu1 %v11857_v60 }
 0x4f5   : > { %8434 = vmatpush2.bf16.msra.mxu1 %v11855_v27 }
 0x4f8   : > { %8436 = vmatmul.mubr.bf16.vlgmr.msra.gmra.mxu1 %v8206_v40 }
 0x4f9   : > { %8445 = vmatprep.mubr.bf16.mxu1 %v15051_v30 }
 0x500   : > { %8446 = vmatmul.mubr.bf16.gmra.mxu1 %v8205_v19  ;;  %v8520_v19 = vrot.slane %v8511_v29, %v13640_v9 }
 0x515   : > { %v7793_v34 = vpop.f32.mrf.mxu0 }
 0x517   : > { %v7795_v28 = vpop.f32.mrf.mxu0 }
 0x519   : > { %v7797_v16 = vpop.f32.mrf.mxu0 }
 0x51b   : > { %v7799_v56 = vpop.f32.mrf.mxu0 }
 0x51d   : > { %v7803_v11 = vpop.f32.mrf.mxu0 }
 0x51f   : > { %v7805_v21 = vpop.f32.mrf.mxu0 }
 0x521   : > { %v7807_v51 = vpop.f32.mrf.mxu0 }
 0x523   : > { %v7808_v62 = vpop.f32.mrf.mxu0 }
 0x52f   : > { %v8132_v18 = vpop.f32.mrf.mxu0 }
 0x531   : > { %v8134_v23 = vpop.f32.mrf.mxu0 }
 0x533   : > { %v8136_v25 = vpop.f32.mrf.mxu0 }
 0x535   : > { %v8138_v41 = vpop.f32.mrf.mxu0 }
 0x537   : > { %v15139_v20 = vpop.f32.mrf.mxu0 }
 0x538   : > { %v7844_v48 = vpop.f32.mrf.mxu1 }
 0x539   : > { %v7845_v54 = vadd.f32 %v7844_v48, %v7793_v34  ;;  %v15141_v45 = vpop.f32.mrf.mxu0 }
 0x53a   : > { %v7846_v58 = vpop.f32.mrf.mxu1 }
 0x53b   : > { %v7847_v61 = vadd.f32 %v7846_v58, %v7795_v28  ;;  %v8146_v14 = vpop.f32.mrf.mxu0 }
 0x53c   : > { %v7848_v8 = vpop.f32.mrf.mxu1 }
 0x53d   : > { %v7849_v24 = vadd.f32 %v7848_v8, %v7797_v16  ;;  %v8147_v6 = vpop.f32.mrf.mxu0 }
 0x53e   : > { %v7850_v42 = vpop.f32.mrf.mxu1 }
 0x53f   : > { %v7851_v36 = vadd.f32 %v7850_v42, %v7799_v56  ;;  %v8488_v30 = vpop.f32.mrf.mxu0 }
 0x540   : > { %v7854_v38 = vpop.f32.mrf.mxu1 }
 0x541   : > { %v7855_v53 = vadd.f32 %v7854_v38, %v7803_v11  ;;  %v8490_v44 = vpop.f32.mrf.mxu0 }
 0x542   : > { %v7856_v13 = vpop.f32.mrf.mxu1 }
 0x543   : > { %v7857_v33 = vadd.f32 %v7856_v13, %v7805_v21  ;;  %v8492_v2 = vpop.f32.mrf.mxu0 }
 0x544   : > { %v7858_v50 = vpop.f32.mrf.mxu1 }
 0x545   : > { %v8494_v26 = vpop.f32.mrf.mxu0 }
 0x546   : > { %v7859_v43 = vpop.f32.mrf.mxu1 }
 0x547   : > { %v8498_v37 = vpop.f32.mrf.mxu0 }
 0x549   : > { %v8500_v31 = vpop.f32.mrf.mxu0 }
 0x54b   : > { %v8502_v39 = vpop.f32.mrf.mxu0 }
 0x54d   : > { %v8503_v35 = vpop.f32.mrf.mxu0 }
 0x578   : > { %v8081_v15 = vpop.f32.mrf.mxu1 }
 0x579   : > { %v8082_v52 = vadd.f32 %v8081_v15, %v7845_v54 }
 0x57a   : > { %v8083_v63 = vpop.f32.mrf.mxu1 }
 0x57b   : > { %v8084_v5 = vadd.f32 %v8083_v63, %v7847_v61  ;;  %v8133_v10 = vadd.f32 %v8132_v18, %v8082_v52 }
 0x57c   : > { %v8085_v1 = vpop.f32.mrf.mxu1 }
 0x57d   : > { %v8086_v0 = vadd.f32 %v8085_v1, %v7849_v24  ;;  %v8135_v17 = vadd.f32 %v8134_v23, %v8084_v5 }
 0x57e   : > { %v8087_v47 = vpop.f32.mrf.mxu1 }
 0x57f   : > { %v8088_v60 = vadd.f32 %v8087_v47, %v7851_v36  ;;  %v8137_v40 = vadd.f32 %v8136_v25, %v8086_v0 }
 0x580   : > { %v8091_v22 = vpop.f32.mrf.mxu1 }
 0x581   : > { %v8139_v16 = vadd.f32 %v8138_v41, %v8088_v60  ;;  %v8092_v56 = vadd.f32 %v8091_v22, %v7855_v53 }
 0x582   : > { %v8093_v55 = vpop.f32.mrf.mxu1 }
 0x583   : > { %v8094_v18 = vadd.f32 %v8093_v55, %v7857_v33  ;;  %v8143_v41 = vadd.f32 %v15139_v20, %v8092_v56 }
 0x584   : > { %v8095_v32 = vpop.f32.mrf.mxu1 }
 0x585   : > { %v8145_v36 = vadd.f32 %v15141_v45, %v8094_v18 }
 0x586   : > { %v8096_v49 = vpop.f32.mrf.mxu1 }
 0x5b8   : > { %v8437_v59 = vpop.f32.mrf.mxu1 }
 0x5b9   : > { %v8489_v46 = vadd.f32 %v8488_v30, %v8437_v59 }
 0x5ba   : > { %v8439_v12 = vpop.f32.mrf.mxu1 }
 0x5bb   : > { %v8505_v27 = vadd.f32 %v8489_v46, %v8133_v10  ;;  %v8491_v3 = vadd.f32 %v8490_v44, %v8439_v12 }
 0x5bc   : > { %v8441_v57 = vpop.f32.mrf.mxu1 }
 0x5bd   : > { %v8523_v34 = vadd.f32 %v8516_v7, %v8505_v27  ;;  %v8506_v28 = vadd.f32 %v8491_v3, %v8135_v17  ;;  %v8493_v4 = vadd.f32 %v8492_v2, %v8441_v57 }
 0x5be   : > { %v8443_v11 = vpop.f32.mrf.mxu1 }
 0x5bf   : > { %8529 = vst [vmem:[%s15154_s27] sm:$0xff] %v8523_v34  ;;  %v8537_v21 = vadd.f32 4.0, %v8523_v34  ;;  %v8524_v9 = vadd.f32 %v8520_v19, %v8506_v28  ;;  %v8507_v51 = vadd.f32 %v8493_v4, %v8137_v40  ;;  %v8495_v62 = vadd.f32 %v8494_v26, %v8443_v11 }
 0x5c0   : > { %v8447_v23 = vpop.f32.mrf.mxu1 }
 0x5c1   : > { %v8543_v48 = vmax.f32 %v8537_v21, 0.0  ;;  %8531 = vst.msk [vmem:[%s15154_s27 + $0x8] sm:$0xff] %vm8530_vm0, %v8524_v9  ;;  %v8538_v25 = vadd.f32 4.0, %v8524_v9  ;;  %v8525_v54 = vadd.f32 %v8516_v7, %v8507_v51  ;;  %v8508_v58 = vadd.f32 %v8495_v62, %v8139_v16 }
 0x5c2   : > { %v8499_v61 = vadd.f32 %v8498_v37, %v8447_v23  ;;  %v8449_v14 = vpop.f32.mrf.mxu1 }
 0x5c3   : > { %v8549_v8 = vmin.f32 %v8543_v48, 8.0  ;;  %v8544_v24 = vmax.f32 %v8538_v25, 0.0  ;;  %8532 = vst [vmem:[%s15154_s27 + $0x10] sm:$0xff] %v8525_v54  ;;  %v8539_v6 = vadd.f32 4.0, %v8525_v54  ;;  %v8526_v42 = vadd.f32 %v8520_v19, %v8508_v58 }
 0x5c4   : > { %v8509_v30 = vadd.f32 %v8499_v61, %v8143_v41  ;;  %v8501_v20 = vadd.f32 %v8500_v31, %v8449_v14  ;;  %v8451_v38 = vpop.f32.mrf.mxu1 }
 0x5c5   : > { %v8555_v53 = vmul.f32 0.125, %v8549_v8  ;;  %v8550_v44 = vmin.f32 %v8544_v24, 8.0  ;;  %v8545_v13 = vmax.f32 %v8539_v6, 0.0  ;;  %8533 = vst.msk [vmem:[%s15154_s27 + $0x18] sm:$0xff] %vm8530_vm0, %v8526_v42  ;;  %v8540_v33 = vadd.f32 4.0, %v8526_v42 }
 0x5c6   : > { %v8527_v45 = vadd.f32 %v8516_v7, %v8509_v30  ;;  %v8510_v2 = vadd.f32 %v8501_v20, %v8145_v36  ;;  %v8452_v50 = vpop.f32.mrf.mxu1 }
 0x5c7   : > { %8561 = vst [vmem:[%s15167_s30] sm:$0xff] %v8555_v53  ;;  %v8556_v26 = vmul.f32 0.125, %v8550_v44  ;;  %v8551_v43 = vmin.f32 %v8545_v13, 8.0  ;;  %v8546_v37 = vmax.f32 %v8540_v33, 0.0 }
 0x5c8   : > { %8534 = vst [vmem:[%s15154_s27 + $0x20] sm:$0x3] %v8527_v45  ;;  %v8541_v31 = vadd.f32 4.0, %v8527_v45  ;;  %v8528_v39 = vadd.f32 %v8520_v19, %v8510_v2 }
 0x5c9   : > { %8562 = vst.msk [vmem:[%s15167_s30 + $0x8] sm:$0xff] %vm8530_vm0, %v8556_v26  ;;  %v8557_v35 = vmul.f32 0.125, %v8551_v43  ;;  %v8552_v15 = vmin.f32 %v8546_v37, 8.0 }
 0x5ca   : > { %v8547_v63 = vmax.f32 %v8541_v31, 0.0  ;;  %8536 = vst.msk [vmem:[%s15154_s27 + $0x28] sm:$0x3] %vm8535_vm1, %v8528_v39  ;;  %v8542_v1 = vadd.f32 4.0, %v8528_v39 }
 0x5cb   : > { %8563 = vst [vmem:[%s15167_s30 + $0x10] sm:$0xff] %v8557_v35  ;;  %v8558_v47 = vmul.f32 0.125, %v8552_v15 }
 0x5cc   : > { %v8553_v22 = vmin.f32 %v8547_v63, 8.0  ;;  %v8548_v55 = vmax.f32 %v8542_v1, 0.0 }
 0x5cd   : > { %8564 = vst.msk [vmem:[%s15167_s30 + $0x18] sm:$0xff] %vm8530_vm0, %v8558_v47 }
 0x5ce   : > { %v8559_v32 = vmul.f32 0.125, %v8553_v22  ;;  %v8554_v49 = vmin.f32 %v8548_v55, 8.0 }
 0x5d0   : > { %8565 = vst [vmem:[%s15167_s30 + $0x20] sm:$0x3] %v8559_v32  ;;  %v8560_v52 = vmul.f32 0.125, %v8554_v49 }
 0x5d2   : > { %8566 = vst.msk [vmem:[%s15167_s30 + $0x28] sm:$0x3] %vm8535_vm1, %v8560_v52 }
 0x5d3 PF: > { %s21_s13 = sadd.s32 1, %s11871_s13  }
 0x5d4   : > { %p18_p4 = scmp.ge.s32.totalorder %s21_s13, 4  }
 0x5d6   :  { %20 = sbr.rel (!%p18_p4) target bundleno = 1 (0x1), region = 124 }

</bundles_post_ra>
